<compile_context>
chip_gen: v6e
topology: v6e:2x2x1
jax: 0.10.0
libtpu: 0.0.40
codegen_flags: <defaults>
</compile_context>

<pallas_src>
import functools

import jax
import jax.numpy as jnp
from jax import lax
from jax.experimental import pallas as pl
from jax.experimental.pallas import tpu as pltpu


def _round_up(n, m):
    return ((n + m - 1) // m) * m


def _sigmoid(z):
    # 0.5*(1 + tanh(z/2)): one EUP op per sigmoid (vs exp + reciprocal = 2).
    return 0.5 * (jnp.tanh(0.5 * z) + 1.0)


def _const_spec(shape):
    """BlockSpec for a grid-invariant (weight/bias) operand, single-buffered."""
    idx = lambda i: (0,) * len(shape)
    try:
        return pl.BlockSpec(shape, idx, pipeline_mode=pl.Buffered(1))
    except (TypeError, AttributeError, ValueError):
        # Older jax without pipeline_mode / Buffered(1): fall back to default buffering.
        return pl.BlockSpec(shape, idx)


def _pick_ts(S, bp, target_rows=256):
    """Largest divisor of S such that the hoisted matmul has <= ~256 rows."""
    ts = 1
    for d in range(1, S + 1):
        if S % d == 0 and d * bp <= max(target_rows, bp):
            ts = d
    return ts


# ----------------------------------------------------------------------------
# Fused dual-LSTM kernel: LSTM1 -> ReLU -> LSTM2, time-chunked grid, hoisted
# input projections. Operates on 2-D (seq*batch, feature) layouts (lane-dense).
# ----------------------------------------------------------------------------
def _dual_lstm_kernel(x_ref, wih1_ref, whh1_ref, b1_ref, wih2_ref, whh2_ref, b2_ref,
                      o_ref,
                      h1_ref, c1_ref, h2_ref, c2_ref, gx1_ref, h1s_ref, gx2_ref,
                      *, ts, bp):
    tc = pl.program_id(0)

    @pl.when(tc == 0)
    def _init():
        h1_ref[...] = jnp.zeros_like(h1_ref)
        c1_ref[...] = jnp.zeros_like(c1_ref)
        h2_ref[...] = jnp.zeros_like(h2_ref)
        c2_ref[...] = jnp.zeros_like(c2_ref)

    h1p = h1_ref.shape[-1]
    h2p = h2_ref.shape[-1]

    def cell(gates, c_prev, hp):
        # gate order [i | f | g | o]; hp is a multiple of 128 so slices are lane-aligned
        i_g = _sigmoid(gates[:, 0 * hp:1 * hp])
        f_g = _sigmoid(gates[:, 1 * hp:2 * hp])
        g_g = jnp.tanh(gates[:, 2 * hp:3 * hp])
        o_g = _sigmoid(gates[:, 3 * hp:4 * hp])
        c_new = f_g * c_prev + i_g * g_g
        h_new = o_g * jnp.tanh(c_new)
        return h_new, c_new

    # Phase A: hoisted input projection of cell 1 over the whole time chunk
    # (M = ts*bp rows keeps the MXU fed instead of bp rows per step).
    gx1_ref[...] = (jnp.dot(x_ref[...], wih1_ref[...],
                            preferred_element_type=jnp.float32) + b1_ref[...])

    # Phase B: cell-1 recurrence; only h@W_hh remains inside the sequential loop.
    def step1(i, carry):
        row = pl.multiple_of(i * bp, bp)
        gates = gx1_ref[pl.ds(row, bp), :] + jnp.dot(
            h1_ref[...], whh1_ref[...], preferred_element_type=jnp.float32)
        h_new, c_new = cell(gates, c1_ref[...], h1p)
        c1_ref[...] = c_new
        h1_ref[...] = h_new.astype(h1_ref.dtype)
        # fused inter-cell ReLU, buffered so cell 2's input projection can be hoisted too
        h1s_ref[pl.ds(row, bp), :] = jnp.maximum(h_new, 0.0).astype(h1s_ref.dtype)
        return carry

    lax.fori_loop(0, ts, step1, 0, unroll=True)

    # Phase C: hoisted input projection of cell 2 over the chunk.
    gx2_ref[...] = (jnp.dot(h1s_ref[...], wih2_ref[...],
                            preferred_element_type=jnp.float32) + b2_ref[...])

    # Phase D: cell-2 recurrence; lane-dense bf16 output stores.
    def step2(i, carry):
        row = pl.multiple_of(i * bp, bp)
        gates = gx2_ref[pl.ds(row, bp), :] + jnp.dot(
            h2_ref[...], whh2_ref[...], preferred_element_type=jnp.float32)
        h_new, c_new = cell(gates, c2_ref[...], h2p)
        c2_ref[...] = c_new
        h2_ref[...] = h_new.astype(h2_ref.dtype)
        o_ref[pl.ds(row, bp), :] = h_new.astype(o_ref.dtype)
        return carry

    lax.fori_loop(0, ts, step2, 0, unroll=True)


def dual_lstm_forward(x2d, bp, lstm1, lstm2):
    """x2d: (S*bp, Dp) bf16; lstm*: (w_ih (Kp,4Hp) bf16, w_hh (Hp,4Hp) bf16, b (1,4Hp) f32)."""
    wih1, whh1, b1 = lstm1
    wih2, whh2, b2 = lstm2
    SB, Dp = x2d.shape
    S = SB // bp
    H1 = whh1.shape[0]
    H2 = whh2.shape[0]
    ts = _pick_ts(S, bp)
    kernel = functools.partial(_dual_lstm_kernel, ts=ts, bp=bp)
    return pl.pallas_call(
        kernel,
        out_shape=jax.ShapeDtypeStruct((SB, H2), jnp.bfloat16),
        grid_spec=pltpu.PrefetchScalarGridSpec(
            num_scalar_prefetch=0,
            grid=(S // ts,),
            in_specs=[
                pl.BlockSpec((ts * bp, Dp), lambda t: (t, 0)),     # x time chunk
                _const_spec(wih1.shape), _const_spec(whh1.shape), _const_spec(b1.shape),
                _const_spec(wih2.shape), _const_spec(whh2.shape), _const_spec(b2.shape),
            ],
            out_specs=pl.BlockSpec((ts * bp, H2), lambda t: (t, 0)),
            scratch_shapes=[
                pltpu.VMEM((bp, H1), jnp.bfloat16),            # h1 carry (bf16)
                pltpu.VMEM((bp, H1), jnp.float32),             # c1 carry
                pltpu.VMEM((bp, H2), jnp.bfloat16),            # h2 carry (bf16)
                pltpu.VMEM((bp, H2), jnp.float32),             # c2 carry
                pltpu.VMEM((ts * bp, 4 * H1), jnp.float32),    # hoisted x@W_ih1 + b1
                pltpu.VMEM((ts * bp, H1), jnp.bfloat16),       # ReLU(h1) chunk buffer
                pltpu.VMEM((ts * bp, 4 * H2), jnp.float32),    # hoisted relu(h1)@W_ih2 + b2
            ],
        ),
        compiler_params=pltpu.CompilerParams(
            dimension_semantics=("arbitrary",),                # time recurrence: sequential
        ),
    )(x2d, wih1, whh1, b1, wih2, whh2, b2)


# ----------------------------------------------------------------------------
# Fused 4-layer MLP kernel: ReLU(x@W1+b1) -> ReLU(.@W2+b2) -> Sigmoid = mu
#                           ReLU(mu@W3+b3) -> ReLU(.@W4+b4)           = z2
# ----------------------------------------------------------------------------
def _mlp4_kernel(x_ref, w1_ref, b1_ref, w2_ref, b2_ref, w3_ref, b3_ref, w4_ref, b4_ref,
                 mu_ref, z2_ref, *, v_latent):
    h1 = jnp.maximum(
        jnp.dot(x_ref[...], w1_ref[...], preferred_element_type=jnp.float32) + b1_ref[...],
        0.0)
    z = jnp.maximum(
        jnp.dot(h1.astype(w2_ref.dtype), w2_ref[...],
                preferred_element_type=jnp.float32) + b2_ref[...],
        0.0)
    mu = _sigmoid(z)
    # Zero the padded latent columns (sigmoid(0)=0.5) so decode is correct regardless
    # of how lin3's padded weight rows are initialized.
    col = lax.broadcasted_iota(jnp.int32, mu.shape, 1)
    mu = jnp.where(col < v_latent, mu, 0.0)
    mu_ref[...] = mu.astype(mu_ref.dtype)

    h3 = jnp.maximum(
        jnp.dot(mu.astype(w3_ref.dtype), w3_ref[...],
                preferred_element_type=jnp.float32) + b3_ref[...],
        0.0)
    z2 = jnp.maximum(
        jnp.dot(h3.astype(w4_ref.dtype), w4_ref[...],
                preferred_element_type=jnp.float32) + b4_ref[...],
        0.0)
    z2_ref[...] = z2.astype(z2_ref.dtype)


def mlp4_forward(x, lin1, lin2, lin3, lin4, *, v_latent):
    w1, b1 = lin1
    w2, b2 = lin2
    w3, b3 = lin3
    w4, b4 = lin4
    Bq, F1 = x.shape
    V = w2.shape[1]
    F4 = w4.shape[1]
    block_b = Bq
    for cand in (256, 128, 64, 32, 16):                 # 256-row tile matches v6e/v7x MXU
        if Bq % cand == 0:
            block_b = cand
            break
    kernel = functools.partial(_mlp4_kernel, v_latent=v_latent)
    return pl.pallas_call(
        kernel,
        out_shape=(jax.ShapeDtypeStruct((Bq, V), jnp.float32),
                   jax.ShapeDtypeStruct((Bq, F4), jnp.bfloat16)),
        grid_spec=pltpu.PrefetchScalarGridSpec(
            num_scalar_prefetch=0,
            grid=(Bq // block_b,),
            in_specs=[pl.BlockSpec((block_b, F1), lambda i: (i, 0)),
                      _const_spec(w1.shape), _const_spec(b1.shape),
                      _const_spec(w2.shape), _const_spec(b2.shape),
                      _const_spec(w3.shape), _const_spec(b3.shape),
                      _const_spec(w4.shape), _const_spec(b4.shape)],
            out_specs=(pl.BlockSpec((block_b, V), lambda i: (i, 0)),
                       pl.BlockSpec((block_b, F4), lambda i: (i, 0))),
        ),
        compiler_params=pltpu.CompilerParams(dimension_semantics=("parallel",)),
    )(x, w1, b1, w2, b2, w3, b3, w4, b4)


# ----------------------------------------------------------------------------
# Parameter preparation: pad to lane/MXU-aligned shapes, cast matmul operands to bf16.
# ----------------------------------------------------------------------------
def _pad_gate_cols(w, h, hp):
    # w: (K, 4h) with [i|f|g|o] gate blocks; pad each gate block's columns to hp.
    if h == hp:
        return w
    parts = [jnp.pad(w[:, g * h:(g + 1) * h], ((0, 0), (0, hp - h))) for g in range(4)]
    return jnp.concatenate(parts, axis=1)


def _pad_gate_vec(b, h, hp):
    if h == hp:
        return b
    parts = [jnp.pad(b[g * h:(g + 1) * h], (0, hp - h)) for g in range(4)]
    return jnp.concatenate(parts)


def _prep_lstm(p):
    w_ih, w_hh = p["w_ih"], p["w_hh"]          # (K, 4H), (H, 4H)
    b = p["b_ih"] + p["b_hh"]                  # (4H,)
    K = w_ih.shape[0]
    H = w_hh.shape[0]
    Kp, Hp = _round_up(K, 128), _round_up(H, 128)
    w_ih_p = jnp.pad(_pad_gate_cols(w_ih, H, Hp), ((0, Kp - K), (0, 0))).astype(jnp.bfloat16)
    w_hh_p = jnp.pad(_pad_gate_cols(w_hh, H, Hp), ((0, Hp - H), (0, 0))).astype(jnp.bfloat16)
    b_p = _pad_gate_vec(b, H, Hp).reshape(1, 4 * Hp).astype(jnp.float32)
    return w_ih_p, w_hh_p, b_p


def _prep_linear(p):
    w, b = p["w"], p["b"]                      # (in, out), (out,)
    K, N = w.shape
    Kp, Np = _round_up(K, 128), _round_up(N, 128)
    w_p = jnp.pad(w, ((0, Kp - K), (0, Np - N))).astype(jnp.bfloat16)
    b_p = jnp.pad(b, (0, Np - N)).reshape(1, Np).astype(jnp.float32)
    return w_p, b_p


# ----------------------------------------------------------------------------
# Full forward pass (encode + decode), mirroring svsVAE_deterministic.forward.
# ----------------------------------------------------------------------------
@jax.jit
def svs_vae_forward(x, params):
    """x: (seq, batch, input_dim) f32. Returns (muTheta (seq,batch,out_dim), mu (batch,v_latent))."""
    S, B, Din = x.shape
    latent = params["fc21"]["w_hh"].shape[0]
    out_dim = params["fc41"]["w_hh"].shape[0]
    v_latent = params["lin2"]["w"].shape[1]

    fc1_w, fc21_w = _prep_lstm(params["fc1"]), _prep_lstm(params["fc21"])
    fc3_w, fc41_w = _prep_lstm(params["fc3"]), _prep_lstm(params["fc41"])
    lin1_w, lin2_w = _prep_linear(params["lin1"]), _prep_linear(params["lin2"])
    lin3_w, lin4_w = _prep_linear(params["lin3"]), _prep_linear(params["lin4"])

    Bp = _round_up(B, 16)                      # bf16 packs 16 sublanes per vreg
    Din_p = _round_up(Din, 128)
    Lp = _round_up(latent, 128)
    Op = _round_up(out_dim, 128)

    # ------------------------------ encode ------------------------------
    x_p = jnp.pad(x, ((0, 0), (0, Bp - B), (0, Din_p - Din))).astype(jnp.bfloat16)
    enc = dual_lstm_forward(x_p.reshape(S * Bp, Din_p), Bp, fc1_w, fc21_w)
    enc = enc.reshape(S, Bp, Lp)                                   # fc21 hidden states

    # out21.permute(1,2,0).view(B, latent*seq) — tiny XLA layout plumbing between kernels.
    flat = jnp.transpose(enc[:, :B, :latent], (1, 2, 0)).reshape(B, latent * S)
    F_in = latent * S
    F_in_p = _round_up(F_in, 128)
    flat_p = jnp.pad(flat, ((0, Bp - B), (0, F_in_p - F_in)))      # bf16

    mu_p, z2_p = mlp4_forward(flat_p, lin1_w, lin2_w, lin3_w, lin4_w, v_latent=v_latent)
    mu = mu_p[:B, :v_latent]                                       # f32

    # ------------------------------ decode ------------------------------
    z2 = z2_p[:B, :F_in]
    z_seq = jnp.transpose(z2.reshape(B, latent, S), (2, 0, 1))     # (S, B, latent) bf16
    z_seq_p = jnp.pad(z_seq, ((0, 0), (0, Bp - B), (0, Lp - latent)))

    dec = dual_lstm_forward(z_seq_p.reshape(S * Bp, Lp), Bp, fc3_w, fc41_w)
    dec = dec.reshape(S, Bp, Op)
    mu_theta = dec[:, :B, :out_dim].astype(jnp.float32)
    return mu_theta, mu


# ----------------------------------------------------------------------------
# Parameter init (PyTorch-like defaults) and pure-JAX f32 reference.
# ----------------------------------------------------------------------------
def init_params(key, input_dim, output_dim, seq_length,
                mid_dim_i=60, mid_dim_o=800, latent_dim=20, v_mid=800, v_latent=40,
                dtype=jnp.float32):
    def linear(k, fan_in, fan_out):
        kw, kb = jax.random.split(k)
        bound = float(fan_in) ** -0.5
        return {"w": jax.random.uniform(kw, (fan_in, fan_out), dtype, -bound, bound),
                "b": jax.random.uniform(kb, (fan_out,), dtype, -bound, bound)}

    def lstm(k, in_dim, hidden):
        k1, k2, k3, k4 = jax.random.split(k, 4)
        bound = float(hidden) ** -0.5
        return {  # stored transposed relative to PyTorch: (in, 4H)/(H, 4H); gate order [i|f|g|o]
            "w_ih": jax.random.uniform(k1, (in_dim, 4 * hidden), dtype, -bound, bound),
            "w_hh": jax.random.uniform(k2, (hidden, 4 * hidden), dtype, -bound, bound),
            "b_ih": jax.random.uniform(k3, (4 * hidden,), dtype, -bound, bound),
            "b_hh": jax.random.uniform(k4, (4 * hidden,), dtype, -bound, bound),
        }

    ks = jax.random.split(key, 8)
    return {
        "fc1": lstm(ks[0], input_dim, mid_dim_i),
        "fc21": lstm(ks[1], mid_dim_i, latent_dim),
        "fc3": lstm(ks[2], latent_dim, mid_dim_o),
        "fc41": lstm(ks[3], mid_dim_o, output_dim),
        "lin1": linear(ks[4], latent_dim * seq_length, v_mid),
        "lin2": linear(ks[5], v_mid, v_latent),
        "lin3": linear(ks[6], v_latent, v_mid),
        "lin4": linear(ks[7], v_mid, latent_dim * seq_length),
    }


def reference_forward(x, params):
    def lstm(x_seq, p):
        w_ih, w_hh = p["w_ih"], p["w_hh"]
        b = p["b_ih"] + p["b_hh"]
        H = w_hh.shape[0]
        B = x_seq.shape[1]

        def step(carry, x_t):
            h, c = carry
            g = x_t @ w_ih + h @ w_hh + b
            i = jax.nn.sigmoid(g[:, :H])
            f = jax.nn.sigmoid(g[:, H:2 * H])
            gg = jnp.tanh(g[:, 2 * H:3 * H])
            o = jax.nn.sigmoid(g[:, 3 * H:])
            c = f * c + i * gg
            h = o * jnp.tanh(c)
            return (h, c), h

        init = (jnp.zeros((B, H), jnp.float32), jnp.zeros((B, H), jnp.float32))
        _, ys = jax.lax.scan(step, init, x_seq)
        return ys

    S, B, _ = x.shape
    latent = params["fc21"]["w_hh"].shape[0]
    out = lstm(x, params["fc1"])
    out21 = lstm(jnp.maximum(out, 0.0), params["fc21"])
    flat = jnp.transpose(out21, (1, 2, 0)).reshape(B, -1)
    h = jnp.maximum(flat @ params["lin1"]["w"] + params["lin1"]["b"], 0.0)
    h = jnp.maximum(h @ params["lin2"]["w"] + params["lin2"]["b"], 0.0)
    mu = jax.nn.sigmoid(h)
    z1 = jnp.maximum(mu @ params["lin3"]["w"] + params["lin3"]["b"], 0.0)
    z2 = jnp.maximum(z1 @ params["lin4"]["w"] + params["lin4"]["b"], 0.0)
    z_seq = jnp.transpose(z2.reshape(B, latent, -1), (2, 0, 1))
    out3 = lstm(z_seq, params["fc3"])
    mu_theta = lstm(jnp.maximum(out3, 0.0), params["fc41"])
    return mu_theta, mu


if __name__ == "__main__":
    key = jax.random.PRNGKey(0)
    kx, kp = jax.random.split(key)

    # Small shapes consistent with the module: x is (seq, batch, input_dim).
    S, B = 8, 4
    input_dim, output_dim = 16, 16
    mid_dim_i, mid_dim_o = 32, 48
    latent_dim, v_mid, v_latent = 8, 64, 16

    params = init_params(kp, input_dim, output_dim, S,
                         mid_dim_i=mid_dim_i, mid_dim_o=mid_dim_o,
                         latent_dim=latent_dim, v_mid=v_mid, v_latent=v_latent)
    x = jax.random.normal(kx, (S, B, input_dim), jnp.float32)

    mu_theta, mu = svs_vae_forward(x, params)
    mu_theta, mu = jax.block_until_ready((mu_theta, mu))

    ref_theta, ref_mu = reference_forward(x, params)
    assert mu_theta.shape == (S, B, output_dim)
    assert mu.shape == (B, v_latent)
    # Kernels use bf16 MXU operands (f32 accumulation); compare loosely vs f32 reference.
    assert jnp.allclose(mu, ref_mu, atol=5e-2, rtol=5e-2), "mu mismatch vs reference"
    assert jnp.allclose(mu_theta, ref_theta, atol=5e-2, rtol=5e-2), "muTheta mismatch vs reference"

    print("KERNEL_OK")
</pallas_src>

<mosaic_0001>
module attributes {stable_mosaic.version = 11 : i64} {
  func.func @_dual_lstm_kernel(%arg0: i32, %arg1: memref<128x128xbf16, #tpu.memory_space<vmem>>, %arg2: memref<128x512xbf16, #tpu.memory_space<vmem>>, %arg3: memref<128x512xbf16, #tpu.memory_space<vmem>>, %arg4: memref<1x512xf32, #tpu.memory_space<vmem>>, %arg5: memref<128x512xbf16, #tpu.memory_space<vmem>>, %arg6: memref<128x512xbf16, #tpu.memory_space<vmem>>, %arg7: memref<1x512xf32, #tpu.memory_space<vmem>>, %arg8: memref<128x128xbf16, #tpu.memory_space<vmem>>, %arg9: memref<16x128xbf16, #tpu.memory_space<vmem>>, %arg10: memref<16x128xf32, #tpu.memory_space<vmem>>, %arg11: memref<16x128xbf16, #tpu.memory_space<vmem>>, %arg12: memref<16x128xf32, #tpu.memory_space<vmem>>, %arg13: memref<128x512xf32, #tpu.memory_space<vmem>>, %arg14: memref<128x128xbf16, #tpu.memory_space<vmem>>, %arg15: memref<128x512xf32, #tpu.memory_space<vmem>>) attributes {dimension_semantics = [#tpu.dimension_semantics<arbitrary>], iteration_bounds = array<i64: 1>, scalar_prefetch = 0 : i64, scratch_operands = 7 : i64, tpu.core_type = #tpu.core_type<tc>, window_params = [{transform_indices = @transform_0, window_bounds = array<i64: 128, 128>}, {pipeline_mode = #tpu.pipeline_mode<synchronous>, transform_indices = @transform_1, window_bounds = array<i64: 128, 512>}, {pipeline_mode = #tpu.pipeline_mode<synchronous>, transform_indices = @transform_2, window_bounds = array<i64: 128, 512>}, {pipeline_mode = #tpu.pipeline_mode<synchronous>, transform_indices = @transform_3, window_bounds = array<i64: 1, 512>}, {pipeline_mode = #tpu.pipeline_mode<synchronous>, transform_indices = @transform_4, window_bounds = array<i64: 128, 512>}, {pipeline_mode = #tpu.pipeline_mode<synchronous>, transform_indices = @transform_5, window_bounds = array<i64: 128, 512>}, {pipeline_mode = #tpu.pipeline_mode<synchronous>, transform_indices = @transform_6, window_bounds = array<i64: 1, 512>}, {transform_indices = @transform_7, window_bounds = array<i64: 128, 128>}]} {
    %c0_i32 = arith.constant 0 : i32
    %0 = arith.cmpi eq, %arg0, %c0_i32 : i32
    %1 = arith.extui %0 : i1 to i32
    %c0_i32_0 = arith.constant 0 : i32
    %2 = arith.cmpi ne, %1, %c0_i32_0 : i32
    scf.if %2 {
      %cst_402 = arith.constant 0.000000e+00 : bf16
      %769 = vector.broadcast %cst_402 : bf16 to vector<16x128xbf16>
      %c0_403 = arith.constant 0 : index
      %c0_404 = arith.constant 0 : index
      %770 = vector.load %arg9[%c0_403, %c0_404] : memref<16x128xbf16, #tpu.memory_space<vmem>>, vector<16x128xbf16>
      tpu.vector_store %arg9[%c0_403, %c0_404], %769 {strides = array<i32>} : memref<16x128xbf16, #tpu.memory_space<vmem>>, vector<16x128xbf16>,
      %cst_405 = arith.constant 0.000000e+00 : f32
      %771 = vector.broadcast %cst_405 : f32 to vector<16x128xf32>
      %c0_406 = arith.constant 0 : index
      %c0_407 = arith.constant 0 : index
      %772 = vector.load %arg10[%c0_406, %c0_407] : memref<16x128xf32, #tpu.memory_space<vmem>>, vector<16x128xf32>
      tpu.vector_store %arg10[%c0_406, %c0_407], %771 {strides = array<i32>} : memref<16x128xf32, #tpu.memory_space<vmem>>, vector<16x128xf32>,
      %cst_408 = arith.constant 0.000000e+00 : bf16
      %773 = vector.broadcast %cst_408 : bf16 to vector<16x128xbf16>
      %c0_409 = arith.constant 0 : index
      %c0_410 = arith.constant 0 : index
      %774 = vector.load %arg11[%c0_409, %c0_410] : memref<16x128xbf16, #tpu.memory_space<vmem>>, vector<16x128xbf16>
      tpu.vector_store %arg11[%c0_409, %c0_410], %773 {strides = array<i32>} : memref<16x128xbf16, #tpu.memory_space<vmem>>, vector<16x128xbf16>,
      %cst_411 = arith.constant 0.000000e+00 : f32
      %775 = vector.broadcast %cst_411 : f32 to vector<16x128xf32>
      %c0_412 = arith.constant 0 : index
      %c0_413 = arith.constant 0 : index
      %776 = vector.load %arg12[%c0_412, %c0_413] : memref<16x128xf32, #tpu.memory_space<vmem>>, vector<16x128xf32>
      tpu.vector_store %arg12[%c0_412, %c0_413], %775 {strides = array<i32>} : memref<16x128xf32, #tpu.memory_space<vmem>>, vector<16x128xf32>,
    } else {
    }
    %c0 = arith.constant 0 : index
    %c0_1 = arith.constant 0 : index
    %3 = vector.load %arg1[%c0, %c0_1] : memref<128x128xbf16, #tpu.memory_space<vmem>>, vector<128x128xbf16>
    %c0_2 = arith.constant 0 : index
    %c0_3 = arith.constant 0 : index
    %4 = vector.load %arg2[%c0_2, %c0_3] : memref<128x512xbf16, #tpu.memory_space<vmem>>, vector<128x512xbf16>
    %cst = arith.constant dense<0.000000e+00> : vector<128x512xf32>
    %5 = tpu.matmul %3, %4, %cst {dimension_numbers = #tpu.dot_dimension_numbers<[1], [0], [0], [1], [0, 0, 1, 1], [], []>} : vector<128x128xbf16>, vector<128x512xbf16>, vector<128x512xf32> -> vector<128x512xf32>
    %c0_4 = arith.constant 0 : index
    %c0_5 = arith.constant 0 : index
    %6 = vector.load %arg4[%c0_4, %c0_5] : memref<1x512xf32, #tpu.memory_space<vmem>>, vector<1x512xf32>
    %7 = vector.broadcast %6 : vector<1x512xf32> to vector<128x512xf32>
    %8 = arith.addf %5, %7 : vector<128x512xf32>
    %c0_6 = arith.constant 0 : index
    %c0_7 = arith.constant 0 : index
    %9 = vector.load %arg13[%c0_6, %c0_7] : memref<128x512xf32, #tpu.memory_space<vmem>>, vector<128x512xf32>
    tpu.vector_store %arg13[%c0_6, %c0_7], %8 {strides = array<i32>} : memref<128x512xf32, #tpu.memory_space<vmem>>, vector<128x512xf32>,
    %c0_i32_8 = arith.constant 0 : i32
    %c16_i32 = arith.constant 16 : i32
    %10 = arith.muli %c0_i32_8, %c16_i32 : i32
    %11 = tpu.assume_multiple %10, 16 : i32
    %12 = arith.index_cast %11 : i32 to index
    %c0_9 = arith.constant 0 : index
    %13 = vector.load %arg13[%12, %c0_9] : memref<128x512xf32, #tpu.memory_space<vmem>>, vector<16x512xf32>
    %c0_10 = arith.constant 0 : index
    %c0_11 = arith.constant 0 : index
    %14 = vector.load %arg9[%c0_10, %c0_11] : memref<16x128xbf16, #tpu.memory_space<vmem>>, vector<16x128xbf16>
    %c0_12 = arith.constant 0 : index
    %c0_13 = arith.constant 0 : index
    %15 = vector.load %arg3[%c0_12, %c0_13] : memref<128x512xbf16, #tpu.memory_space<vmem>>, vector<128x512xbf16>
    %cst_14 = arith.constant dense<0.000000e+00> : vector<16x512xf32>
    %16 = tpu.matmul %14, %15, %cst_14 {dimension_numbers = #tpu.dot_dimension_numbers<[1], [0], [0], [1], [0, 0, 1, 1], [], []>} : vector<16x128xbf16>, vector<128x512xbf16>, vector<16x512xf32> -> vector<16x512xf32>
    %17 = arith.addf %13, %16 : vector<16x512xf32>
    %c0_15 = arith.constant 0 : index
    %c0_16 = arith.constant 0 : index
    %18 = vector.load %arg10[%c0_15, %c0_16] : memref<16x128xf32, #tpu.memory_space<vmem>>, vector<16x128xf32>
    %19 = vector.extract_strided_slice %17 {offsets = [0, 0], sizes = [16, 128], strides = [1, 1]} : vector<16x512xf32> to vector<16x128xf32>
    %cst_17 = arith.constant 5.000000e-01 : f32
    %20 = vector.broadcast %cst_17 : f32 to vector<16x128xf32>
    %21 = arith.mulf %20, %19 : vector<16x128xf32>
    %22 = math.tanh %21 : vector<16x128xf32>
    %cst_18 = arith.constant 1.000000e+00 : f32
    %23 = vector.broadcast %cst_18 : f32 to vector<16x128xf32>
    %24 = arith.addf %22, %23 : vector<16x128xf32>
    %cst_19 = arith.constant 5.000000e-01 : f32
    %25 = vector.broadcast %cst_19 : f32 to vector<16x128xf32>
    %26 = arith.mulf %25, %24 : vector<16x128xf32>
    %27 = vector.extract_strided_slice %17 {offsets = [0, 128], sizes = [16, 128], strides = [1, 1]} : vector<16x512xf32> to vector<16x128xf32>
    %cst_20 = arith.constant 5.000000e-01 : f32
    %28 = vector.broadcast %cst_20 : f32 to vector<16x128xf32>
    %29 = arith.mulf %28, %27 : vector<16x128xf32>
    %30 = math.tanh %29 : vector<16x128xf32>
    %cst_21 = arith.constant 1.000000e+00 : f32
    %31 = vector.broadcast %cst_21 : f32 to vector<16x128xf32>
    %32 = arith.addf %30, %31 : vector<16x128xf32>
    %cst_22 = arith.constant 5.000000e-01 : f32
    %33 = vector.broadcast %cst_22 : f32 to vector<16x128xf32>
    %34 = arith.mulf %33, %32 : vector<16x128xf32>
    %35 = vector.extract_strided_slice %17 {offsets = [0, 256], sizes = [16, 128], strides = [1, 1]} : vector<16x512xf32> to vector<16x128xf32>
    %36 = math.tanh %35 : vector<16x128xf32>
    %37 = vector.extract_strided_slice %17 {offsets = [0, 384], sizes = [16, 128], strides = [1, 1]} : vector<16x512xf32> to vector<16x128xf32>
    %cst_23 = arith.constant 5.000000e-01 : f32
    %38 = vector.broadcast %cst_23 : f32 to vector<16x128xf32>
    %39 = arith.mulf %38, %37 : vector<16x128xf32>
    %40 = math.tanh %39 : vector<16x128xf32>
    %cst_24 = arith.constant 1.000000e+00 : f32
    %41 = vector.broadcast %cst_24 : f32 to vector<16x128xf32>
    %42 = arith.addf %40, %41 : vector<16x128xf32>
    %cst_25 = arith.constant 5.000000e-01 : f32
    %43 = vector.broadcast %cst_25 : f32 to vector<16x128xf32>
    %44 = arith.mulf %43, %42 : vector<16x128xf32>
    %45 = arith.mulf %34, %18 : vector<16x128xf32>
    %46 = arith.mulf %26, %36 : vector<16x128xf32>
    %47 = arith.addf %45, %46 : vector<16x128xf32>
    %48 = math.tanh %47 : vector<16x128xf32>
    %49 = arith.mulf %44, %48 : vector<16x128xf32>
    %c0_26 = arith.constant 0 : index
    %c0_27 = arith.constant 0 : index
    %50 = vector.load %arg10[%c0_26, %c0_27] : memref<16x128xf32, #tpu.memory_space<vmem>>, vector<16x128xf32>
    tpu.vector_store %arg10[%c0_26, %c0_27], %47 {strides = array<i32>} : memref<16x128xf32, #tpu.memory_space<vmem>>, vector<16x128xf32>,
    %51 = arith.truncf %49 : vector<16x128xf32> to vector<16x128xbf16>
    %c0_28 = arith.constant 0 : index
    %c0_29 = arith.constant 0 : index
    %52 = vector.load %arg9[%c0_28, %c0_29] : memref<16x128xbf16, #tpu.memory_space<vmem>>, vector<16x128xbf16>
    tpu.vector_store %arg9[%c0_28, %c0_29], %51 {strides = array<i32>} : memref<16x128xbf16, #tpu.memory_space<vmem>>, vector<16x128xbf16>,
    %cst_30 = arith.constant 0.000000e+00 : f32
    %53 = vector.broadcast %cst_30 : f32 to vector<16x128xf32>
    %54 = arith.maximumf %49, %53 : vector<16x128xf32>
    %55 = arith.truncf %54 : vector<16x128xf32> to vector<16x128xbf16>
    %56 = arith.index_cast %11 : i32 to index
    %c0_31 = arith.constant 0 : index
    %57 = vector.load %arg14[%56, %c0_31] : memref<128x128xbf16, #tpu.memory_space<vmem>>, vector<16x128xbf16>
    tpu.vector_store %arg14[%56, %c0_31], %55 {strides = array<i32>} : memref<128x128xbf16, #tpu.memory_space<vmem>>, vector<16x128xbf16>,
    %c1_i32 = arith.constant 1 : i32
    %c16_i32_32 = arith.constant 16 : i32
    %58 = arith.muli %c1_i32, %c16_i32_32 : i32
    %59 = tpu.assume_multiple %58, 16 : i32
    %60 = arith.index_cast %59 : i32 to index
    %c0_33 = arith.constant 0 : index
    %61 = vector.load %arg13[%60, %c0_33] : memref<128x512xf32, #tpu.memory_space<vmem>>, vector<16x512xf32>
    %c0_34 = arith.constant 0 : index
    %c0_35 = arith.constant 0 : index
    %62 = vector.load %arg9[%c0_34, %c0_35] : memref<16x128xbf16, #tpu.memory_space<vmem>>, vector<16x128xbf16>
    %c0_36 = arith.constant 0 : index
    %c0_37 = arith.constant 0 : index
    %63 = vector.load %arg3[%c0_36, %c0_37] : memref<128x512xbf16, #tpu.memory_space<vmem>>, vector<128x512xbf16>
    %cst_38 = arith.constant dense<0.000000e+00> : vector<16x512xf32>
    %64 = tpu.matmul %62, %63, %cst_38 {dimension_numbers = #tpu.dot_dimension_numbers<[1], [0], [0], [1], [0, 0, 1, 1], [], []>} : vector<16x128xbf16>, vector<128x512xbf16>, vector<16x512xf32> -> vector<16x512xf32>
    %65 = arith.addf %61, %64 : vector<16x512xf32>
    %c0_39 = arith.constant 0 : index
    %c0_40 = arith.constant 0 : index
    %66 = vector.load %arg10[%c0_39, %c0_40] : memref<16x128xf32, #tpu.memory_space<vmem>>, vector<16x128xf32>
    %67 = vector.extract_strided_slice %65 {offsets = [0, 0], sizes = [16, 128], strides = [1, 1]} : vector<16x512xf32> to vector<16x128xf32>
    %cst_41 = arith.constant 5.000000e-01 : f32
    %68 = vector.broadcast %cst_41 : f32 to vector<16x128xf32>
    %69 = arith.mulf %68, %67 : vector<16x128xf32>
    %70 = math.tanh %69 : vector<16x128xf32>
    %cst_42 = arith.constant 1.000000e+00 : f32
    %71 = vector.broadcast %cst_42 : f32 to vector<16x128xf32>
    %72 = arith.addf %70, %71 : vector<16x128xf32>
    %cst_43 = arith.constant 5.000000e-01 : f32
    %73 = vector.broadcast %cst_43 : f32 to vector<16x128xf32>
    %74 = arith.mulf %73, %72 : vector<16x128xf32>
    %75 = vector.extract_strided_slice %65 {offsets = [0, 128], sizes = [16, 128], strides = [1, 1]} : vector<16x512xf32> to vector<16x128xf32>
    %cst_44 = arith.constant 5.000000e-01 : f32
    %76 = vector.broadcast %cst_44 : f32 to vector<16x128xf32>
    %77 = arith.mulf %76, %75 : vector<16x128xf32>
    %78 = math.tanh %77 : vector<16x128xf32>
    %cst_45 = arith.constant 1.000000e+00 : f32
    %79 = vector.broadcast %cst_45 : f32 to vector<16x128xf32>
    %80 = arith.addf %78, %79 : vector<16x128xf32>
    %cst_46 = arith.constant 5.000000e-01 : f32
    %81 = vector.broadcast %cst_46 : f32 to vector<16x128xf32>
    %82 = arith.mulf %81, %80 : vector<16x128xf32>
    %83 = vector.extract_strided_slice %65 {offsets = [0, 256], sizes = [16, 128], strides = [1, 1]} : vector<16x512xf32> to vector<16x128xf32>
    %84 = math.tanh %83 : vector<16x128xf32>
    %85 = vector.extract_strided_slice %65 {offsets = [0, 384], sizes = [16, 128], strides = [1, 1]} : vector<16x512xf32> to vector<16x128xf32>
    %cst_47 = arith.constant 5.000000e-01 : f32
    %86 = vector.broadcast %cst_47 : f32 to vector<16x128xf32>
    %87 = arith.mulf %86, %85 : vector<16x128xf32>
    %88 = math.tanh %87 : vector<16x128xf32>
    %cst_48 = arith.constant 1.000000e+00 : f32
    %89 = vector.broadcast %cst_48 : f32 to vector<16x128xf32>
    %90 = arith.addf %88, %89 : vector<16x128xf32>
    %cst_49 = arith.constant 5.000000e-01 : f32
    %91 = vector.broadcast %cst_49 : f32 to vector<16x128xf32>
    %92 = arith.mulf %91, %90 : vector<16x128xf32>
    %93 = arith.mulf %82, %66 : vector<16x128xf32>
    %94 = arith.mulf %74, %84 : vector<16x128xf32>
    %95 = arith.addf %93, %94 : vector<16x128xf32>
    %96 = math.tanh %95 : vector<16x128xf32>
    %97 = arith.mulf %92, %96 : vector<16x128xf32>
    %c0_50 = arith.constant 0 : index
    %c0_51 = arith.constant 0 : index
    %98 = vector.load %arg10[%c0_50, %c0_51] : memref<16x128xf32, #tpu.memory_space<vmem>>, vector<16x128xf32>
    tpu.vector_store %arg10[%c0_50, %c0_51], %95 {strides = array<i32>} : memref<16x128xf32, #tpu.memory_space<vmem>>, vector<16x128xf32>,
    %99 = arith.truncf %97 : vector<16x128xf32> to vector<16x128xbf16>
    %c0_52 = arith.constant 0 : index
    %c0_53 = arith.constant 0 : index
    %100 = vector.load %arg9[%c0_52, %c0_53] : memref<16x128xbf16, #tpu.memory_space<vmem>>, vector<16x128xbf16>
    tpu.vector_store %arg9[%c0_52, %c0_53], %99 {strides = array<i32>} : memref<16x128xbf16, #tpu.memory_space<vmem>>, vector<16x128xbf16>,
    %cst_54 = arith.constant 0.000000e+00 : f32
    %101 = vector.broadcast %cst_54 : f32 to vector<16x128xf32>
    %102 = arith.maximumf %97, %101 : vector<16x128xf32>
    %103 = arith.truncf %102 : vector<16x128xf32> to vector<16x128xbf16>
    %104 = arith.index_cast %59 : i32 to index
    %c0_55 = arith.constant 0 : index
    %105 = vector.load %arg14[%104, %c0_55] : memref<128x128xbf16, #tpu.memory_space<vmem>>, vector<16x128xbf16>
    tpu.vector_store %arg14[%104, %c0_55], %103 {strides = array<i32>} : memref<128x128xbf16, #tpu.memory_space<vmem>>, vector<16x128xbf16>,
    %c2_i32 = arith.constant 2 : i32
    %c16_i32_56 = arith.constant 16 : i32
    %106 = arith.muli %c2_i32, %c16_i32_56 : i32
    %107 = tpu.assume_multiple %106, 16 : i32
    %108 = arith.index_cast %107 : i32 to index
    %c0_57 = arith.constant 0 : index
    %109 = vector.load %arg13[%108, %c0_57] : memref<128x512xf32, #tpu.memory_space<vmem>>, vector<16x512xf32>
    %c0_58 = arith.constant 0 : index
    %c0_59 = arith.constant 0 : index
    %110 = vector.load %arg9[%c0_58, %c0_59] : memref<16x128xbf16, #tpu.memory_space<vmem>>, vector<16x128xbf16>
    %c0_60 = arith.constant 0 : index
    %c0_61 = arith.constant 0 : index
    %111 = vector.load %arg3[%c0_60, %c0_61] : memref<128x512xbf16, #tpu.memory_space<vmem>>, vector<128x512xbf16>
    %cst_62 = arith.constant dense<0.000000e+00> : vector<16x512xf32>
    %112 = tpu.matmul %110, %111, %cst_62 {dimension_numbers = #tpu.dot_dimension_numbers<[1], [0], [0], [1], [0, 0, 1, 1], [], []>} : vector<16x128xbf16>, vector<128x512xbf16>, vector<16x512xf32> -> vector<16x512xf32>
    %113 = arith.addf %109, %112 : vector<16x512xf32>
    %c0_63 = arith.constant 0 : index
    %c0_64 = arith.constant 0 : index
    %114 = vector.load %arg10[%c0_63, %c0_64] : memref<16x128xf32, #tpu.memory_space<vmem>>, vector<16x128xf32>
    %115 = vector.extract_strided_slice %113 {offsets = [0, 0], sizes = [16, 128], strides = [1, 1]} : vector<16x512xf32> to vector<16x128xf32>
    %cst_65 = arith.constant 5.000000e-01 : f32
    %116 = vector.broadcast %cst_65 : f32 to vector<16x128xf32>
    %117 = arith.mulf %116, %115 : vector<16x128xf32>
    %118 = math.tanh %117 : vector<16x128xf32>
    %cst_66 = arith.constant 1.000000e+00 : f32
    %119 = vector.broadcast %cst_66 : f32 to vector<16x128xf32>
    %120 = arith.addf %118, %119 : vector<16x128xf32>
    %cst_67 = arith.constant 5.000000e-01 : f32
    %121 = vector.broadcast %cst_67 : f32 to vector<16x128xf32>
    %122 = arith.mulf %121, %120 : vector<16x128xf32>
    %123 = vector.extract_strided_slice %113 {offsets = [0, 128], sizes = [16, 128], strides = [1, 1]} : vector<16x512xf32> to vector<16x128xf32>
    %cst_68 = arith.constant 5.000000e-01 : f32
    %124 = vector.broadcast %cst_68 : f32 to vector<16x128xf32>
    %125 = arith.mulf %124, %123 : vector<16x128xf32>
    %126 = math.tanh %125 : vector<16x128xf32>
    %cst_69 = arith.constant 1.000000e+00 : f32
    %127 = vector.broadcast %cst_69 : f32 to vector<16x128xf32>
    %128 = arith.addf %126, %127 : vector<16x128xf32>
    %cst_70 = arith.constant 5.000000e-01 : f32
    %129 = vector.broadcast %cst_70 : f32 to vector<16x128xf32>
    %130 = arith.mulf %129, %128 : vector<16x128xf32>
    %131 = vector.extract_strided_slice %113 {offsets = [0, 256], sizes = [16, 128], strides = [1, 1]} : vector<16x512xf32> to vector<16x128xf32>
    %132 = math.tanh %131 : vector<16x128xf32>
    %133 = vector.extract_strided_slice %113 {offsets = [0, 384], sizes = [16, 128], strides = [1, 1]} : vector<16x512xf32> to vector<16x128xf32>
    %cst_71 = arith.constant 5.000000e-01 : f32
    %134 = vector.broadcast %cst_71 : f32 to vector<16x128xf32>
    %135 = arith.mulf %134, %133 : vector<16x128xf32>
    %136 = math.tanh %135 : vector<16x128xf32>
    %cst_72 = arith.constant 1.000000e+00 : f32
    %137 = vector.broadcast %cst_72 : f32 to vector<16x128xf32>
    %138 = arith.addf %136, %137 : vector<16x128xf32>
    %cst_73 = arith.constant 5.000000e-01 : f32
    %139 = vector.broadcast %cst_73 : f32 to vector<16x128xf32>
    %140 = arith.mulf %139, %138 : vector<16x128xf32>
    %141 = arith.mulf %130, %114 : vector<16x128xf32>
    %142 = arith.mulf %122, %132 : vector<16x128xf32>
    %143 = arith.addf %141, %142 : vector<16x128xf32>
    %144 = math.tanh %143 : vector<16x128xf32>
    %145 = arith.mulf %140, %144 : vector<16x128xf32>
    %c0_74 = arith.constant 0 : index
    %c0_75 = arith.constant 0 : index
    %146 = vector.load %arg10[%c0_74, %c0_75] : memref<16x128xf32, #tpu.memory_space<vmem>>, vector<16x128xf32>
    tpu.vector_store %arg10[%c0_74, %c0_75], %143 {strides = array<i32>} : memref<16x128xf32, #tpu.memory_space<vmem>>, vector<16x128xf32>,
    %147 = arith.truncf %145 : vector<16x128xf32> to vector<16x128xbf16>
    %c0_76 = arith.constant 0 : index
    %c0_77 = arith.constant 0 : index
    %148 = vector.load %arg9[%c0_76, %c0_77] : memref<16x128xbf16, #tpu.memory_space<vmem>>, vector<16x128xbf16>
    tpu.vector_store %arg9[%c0_76, %c0_77], %147 {strides = array<i32>} : memref<16x128xbf16, #tpu.memory_space<vmem>>, vector<16x128xbf16>,
    %cst_78 = arith.constant 0.000000e+00 : f32
    %149 = vector.broadcast %cst_78 : f32 to vector<16x128xf32>
    %150 = arith.maximumf %145, %149 : vector<16x128xf32>
    %151 = arith.truncf %150 : vector<16x128xf32> to vector<16x128xbf16>
    %152 = arith.index_cast %107 : i32 to index
    %c0_79 = arith.constant 0 : index
    %153 = vector.load %arg14[%152, %c0_79] : memref<128x128xbf16, #tpu.memory_space<vmem>>, vector<16x128xbf16>
    tpu.vector_store %arg14[%152, %c0_79], %151 {strides = array<i32>} : memref<128x128xbf16, #tpu.memory_space<vmem>>, vector<16x128xbf16>,
    %c3_i32 = arith.constant 3 : i32
    %c16_i32_80 = arith.constant 16 : i32
    %154 = arith.muli %c3_i32, %c16_i32_80 : i32
    %155 = tpu.assume_multiple %154, 16 : i32
    %156 = arith.index_cast %155 : i32 to index
    %c0_81 = arith.constant 0 : index
    %157 = vector.load %arg13[%156, %c0_81] : memref<128x512xf32, #tpu.memory_space<vmem>>, vector<16x512xf32>
    %c0_82 = arith.constant 0 : index
    %c0_83 = arith.constant 0 : index
    %158 = vector.load %arg9[%c0_82, %c0_83] : memref<16x128xbf16, #tpu.memory_space<vmem>>, vector<16x128xbf16>
    %c0_84 = arith.constant 0 : index
    %c0_85 = arith.constant 0 : index
    %159 = vector.load %arg3[%c0_84, %c0_85] : memref<128x512xbf16, #tpu.memory_space<vmem>>, vector<128x512xbf16>
    %cst_86 = arith.constant dense<0.000000e+00> : vector<16x512xf32>
    %160 = tpu.matmul %158, %159, %cst_86 {dimension_numbers = #tpu.dot_dimension_numbers<[1], [0], [0], [1], [0, 0, 1, 1], [], []>} : vector<16x128xbf16>, vector<128x512xbf16>, vector<16x512xf32> -> vector<16x512xf32>
    %161 = arith.addf %157, %160 : vector<16x512xf32>
    %c0_87 = arith.constant 0 : index
    %c0_88 = arith.constant 0 : index
    %162 = vector.load %arg10[%c0_87, %c0_88] : memref<16x128xf32, #tpu.memory_space<vmem>>, vector<16x128xf32>
    %163 = vector.extract_strided_slice %161 {offsets = [0, 0], sizes = [16, 128], strides = [1, 1]} : vector<16x512xf32> to vector<16x128xf32>
    %cst_89 = arith.constant 5.000000e-01 : f32
    %164 = vector.broadcast %cst_89 : f32 to vector<16x128xf32>
    %165 = arith.mulf %164, %163 : vector<16x128xf32>
    %166 = math.tanh %165 : vector<16x128xf32>
    %cst_90 = arith.constant 1.000000e+00 : f32
    %167 = vector.broadcast %cst_90 : f32 to vector<16x128xf32>
    %168 = arith.addf %166, %167 : vector<16x128xf32>
    %cst_91 = arith.constant 5.000000e-01 : f32
    %169 = vector.broadcast %cst_91 : f32 to vector<16x128xf32>
    %170 = arith.mulf %169, %168 : vector<16x128xf32>
    %171 = vector.extract_strided_slice %161 {offsets = [0, 128], sizes = [16, 128], strides = [1, 1]} : vector<16x512xf32> to vector<16x128xf32>
    %cst_92 = arith.constant 5.000000e-01 : f32
    %172 = vector.broadcast %cst_92 : f32 to vector<16x128xf32>
    %173 = arith.mulf %172, %171 : vector<16x128xf32>
    %174 = math.tanh %173 : vector<16x128xf32>
    %cst_93 = arith.constant 1.000000e+00 : f32
    %175 = vector.broadcast %cst_93 : f32 to vector<16x128xf32>
    %176 = arith.addf %174, %175 : vector<16x128xf32>
    %cst_94 = arith.constant 5.000000e-01 : f32
    %177 = vector.broadcast %cst_94 : f32 to vector<16x128xf32>
    %178 = arith.mulf %177, %176 : vector<16x128xf32>
    %179 = vector.extract_strided_slice %161 {offsets = [0, 256], sizes = [16, 128], strides = [1, 1]} : vector<16x512xf32> to vector<16x128xf32>
    %180 = math.tanh %179 : vector<16x128xf32>
    %181 = vector.extract_strided_slice %161 {offsets = [0, 384], sizes = [16, 128], strides = [1, 1]} : vector<16x512xf32> to vector<16x128xf32>
    %cst_95 = arith.constant 5.000000e-01 : f32
    %182 = vector.broadcast %cst_95 : f32 to vector<16x128xf32>
    %183 = arith.mulf %182, %181 : vector<16x128xf32>
    %184 = math.tanh %183 : vector<16x128xf32>
    %cst_96 = arith.constant 1.000000e+00 : f32
    %185 = vector.broadcast %cst_96 : f32 to vector<16x128xf32>
    %186 = arith.addf %184, %185 : vector<16x128xf32>
    %cst_97 = arith.constant 5.000000e-01 : f32
    %187 = vector.broadcast %cst_97 : f32 to vector<16x128xf32>
    %188 = arith.mulf %187, %186 : vector<16x128xf32>
    %189 = arith.mulf %178, %162 : vector<16x128xf32>
    %190 = arith.mulf %170, %180 : vector<16x128xf32>
    %191 = arith.addf %189, %190 : vector<16x128xf32>
    %192 = math.tanh %191 : vector<16x128xf32>
    %193 = arith.mulf %188, %192 : vector<16x128xf32>
    %c0_98 = arith.constant 0 : index
    %c0_99 = arith.constant 0 : index
    %194 = vector.load %arg10[%c0_98, %c0_99] : memref<16x128xf32, #tpu.memory_space<vmem>>, vector<16x128xf32>
    tpu.vector_store %arg10[%c0_98, %c0_99], %191 {strides = array<i32>} : memref<16x128xf32, #tpu.memory_space<vmem>>, vector<16x128xf32>,
    %195 = arith.truncf %193 : vector<16x128xf32> to vector<16x128xbf16>
    %c0_100 = arith.constant 0 : index
    %c0_101 = arith.constant 0 : index
    %196 = vector.load %arg9[%c0_100, %c0_101] : memref<16x128xbf16, #tpu.memory_space<vmem>>, vector<16x128xbf16>
    tpu.vector_store %arg9[%c0_100, %c0_101], %195 {strides = array<i32>} : memref<16x128xbf16, #tpu.memory_space<vmem>>, vector<16x128xbf16>,
    %cst_102 = arith.constant 0.000000e+00 : f32
    %197 = vector.broadcast %cst_102 : f32 to vector<16x128xf32>
    %198 = arith.maximumf %193, %197 : vector<16x128xf32>
    %199 = arith.truncf %198 : vector<16x128xf32> to vector<16x128xbf16>
    %200 = arith.index_cast %155 : i32 to index
    %c0_103 = arith.constant 0 : index
    %201 = vector.load %arg14[%200, %c0_103] : memref<128x128xbf16, #tpu.memory_space<vmem>>, vector<16x128xbf16>
    tpu.vector_store %arg14[%200, %c0_103], %199 {strides = array<i32>} : memref<128x128xbf16, #tpu.memory_space<vmem>>, vector<16x128xbf16>,
    %c4_i32 = arith.constant 4 : i32
    %c16_i32_104 = arith.constant 16 : i32
    %202 = arith.muli %c4_i32, %c16_i32_104 : i32
    %203 = tpu.assume_multiple %202, 16 : i32
    %204 = arith.index_cast %203 : i32 to index
    %c0_105 = arith.constant 0 : index
    %205 = vector.load %arg13[%204, %c0_105] : memref<128x512xf32, #tpu.memory_space<vmem>>, vector<16x512xf32>
    %c0_106 = arith.constant 0 : index
    %c0_107 = arith.constant 0 : index
    %206 = vector.load %arg9[%c0_106, %c0_107] : memref<16x128xbf16, #tpu.memory_space<vmem>>, vector<16x128xbf16>
    %c0_108 = arith.constant 0 : index
    %c0_109 = arith.constant 0 : index
    %207 = vector.load %arg3[%c0_108, %c0_109] : memref<128x512xbf16, #tpu.memory_space<vmem>>, vector<128x512xbf16>
    %cst_110 = arith.constant dense<0.000000e+00> : vector<16x512xf32>
    %208 = tpu.matmul %206, %207, %cst_110 {dimension_numbers = #tpu.dot_dimension_numbers<[1], [0], [0], [1], [0, 0, 1, 1], [], []>} : vector<16x128xbf16>, vector<128x512xbf16>, vector<16x512xf32> -> vector<16x512xf32>
    %209 = arith.addf %205, %208 : vector<16x512xf32>
    %c0_111 = arith.constant 0 : index
    %c0_112 = arith.constant 0 : index
    %210 = vector.load %arg10[%c0_111, %c0_112] : memref<16x128xf32, #tpu.memory_space<vmem>>, vector<16x128xf32>
    %211 = vector.extract_strided_slice %209 {offsets = [0, 0], sizes = [16, 128], strides = [1, 1]} : vector<16x512xf32> to vector<16x128xf32>
    %cst_113 = arith.constant 5.000000e-01 : f32
    %212 = vector.broadcast %cst_113 : f32 to vector<16x128xf32>
    %213 = arith.mulf %212, %211 : vector<16x128xf32>
    %214 = math.tanh %213 : vector<16x128xf32>
    %cst_114 = arith.constant 1.000000e+00 : f32
    %215 = vector.broadcast %cst_114 : f32 to vector<16x128xf32>
    %216 = arith.addf %214, %215 : vector<16x128xf32>
    %cst_115 = arith.constant 5.000000e-01 : f32
    %217 = vector.broadcast %cst_115 : f32 to vector<16x128xf32>
    %218 = arith.mulf %217, %216 : vector<16x128xf32>
    %219 = vector.extract_strided_slice %209 {offsets = [0, 128], sizes = [16, 128], strides = [1, 1]} : vector<16x512xf32> to vector<16x128xf32>
    %cst_116 = arith.constant 5.000000e-01 : f32
    %220 = vector.broadcast %cst_116 : f32 to vector<16x128xf32>
    %221 = arith.mulf %220, %219 : vector<16x128xf32>
    %222 = math.tanh %221 : vector<16x128xf32>
    %cst_117 = arith.constant 1.000000e+00 : f32
    %223 = vector.broadcast %cst_117 : f32 to vector<16x128xf32>
    %224 = arith.addf %222, %223 : vector<16x128xf32>
    %cst_118 = arith.constant 5.000000e-01 : f32
    %225 = vector.broadcast %cst_118 : f32 to vector<16x128xf32>
    %226 = arith.mulf %225, %224 : vector<16x128xf32>
    %227 = vector.extract_strided_slice %209 {offsets = [0, 256], sizes = [16, 128], strides = [1, 1]} : vector<16x512xf32> to vector<16x128xf32>
    %228 = math.tanh %227 : vector<16x128xf32>
    %229 = vector.extract_strided_slice %209 {offsets = [0, 384], sizes = [16, 128], strides = [1, 1]} : vector<16x512xf32> to vector<16x128xf32>
    %cst_119 = arith.constant 5.000000e-01 : f32
    %230 = vector.broadcast %cst_119 : f32 to vector<16x128xf32>
    %231 = arith.mulf %230, %229 : vector<16x128xf32>
    %232 = math.tanh %231 : vector<16x128xf32>
    %cst_120 = arith.constant 1.000000e+00 : f32
    %233 = vector.broadcast %cst_120 : f32 to vector<16x128xf32>
    %234 = arith.addf %232, %233 : vector<16x128xf32>
    %cst_121 = arith.constant 5.000000e-01 : f32
    %235 = vector.broadcast %cst_121 : f32 to vector<16x128xf32>
    %236 = arith.mulf %235, %234 : vector<16x128xf32>
    %237 = arith.mulf %226, %210 : vector<16x128xf32>
    %238 = arith.mulf %218, %228 : vector<16x128xf32>
    %239 = arith.addf %237, %238 : vector<16x128xf32>
    %240 = math.tanh %239 : vector<16x128xf32>
    %241 = arith.mulf %236, %240 : vector<16x128xf32>
    %c0_122 = arith.constant 0 : index
    %c0_123 = arith.constant 0 : index
    %242 = vector.load %arg10[%c0_122, %c0_123] : memref<16x128xf32, #tpu.memory_space<vmem>>, vector<16x128xf32>
    tpu.vector_store %arg10[%c0_122, %c0_123], %239 {strides = array<i32>} : memref<16x128xf32, #tpu.memory_space<vmem>>, vector<16x128xf32>,
    %243 = arith.truncf %241 : vector<16x128xf32> to vector<16x128xbf16>
    %c0_124 = arith.constant 0 : index
    %c0_125 = arith.constant 0 : index
    %244 = vector.load %arg9[%c0_124, %c0_125] : memref<16x128xbf16, #tpu.memory_space<vmem>>, vector<16x128xbf16>
    tpu.vector_store %arg9[%c0_124, %c0_125], %243 {strides = array<i32>} : memref<16x128xbf16, #tpu.memory_space<vmem>>, vector<16x128xbf16>,
    %cst_126 = arith.constant 0.000000e+00 : f32
    %245 = vector.broadcast %cst_126 : f32 to vector<16x128xf32>
    %246 = arith.maximumf %241, %245 : vector<16x128xf32>
    %247 = arith.truncf %246 : vector<16x128xf32> to vector<16x128xbf16>
    %248 = arith.index_cast %203 : i32 to index
    %c0_127 = arith.constant 0 : index
    %249 = vector.load %arg14[%248, %c0_127] : memref<128x128xbf16, #tpu.memory_space<vmem>>, vector<16x128xbf16>
    tpu.vector_store %arg14[%248, %c0_127], %247 {strides = array<i32>} : memref<128x128xbf16, #tpu.memory_space<vmem>>, vector<16x128xbf16>,
    %c5_i32 = arith.constant 5 : i32
    %c16_i32_128 = arith.constant 16 : i32
    %250 = arith.muli %c5_i32, %c16_i32_128 : i32
    %251 = tpu.assume_multiple %250, 16 : i32
    %252 = arith.index_cast %251 : i32 to index
    %c0_129 = arith.constant 0 : index
    %253 = vector.load %arg13[%252, %c0_129] : memref<128x512xf32, #tpu.memory_space<vmem>>, vector<16x512xf32>
    %c0_130 = arith.constant 0 : index
    %c0_131 = arith.constant 0 : index
    %254 = vector.load %arg9[%c0_130, %c0_131] : memref<16x128xbf16, #tpu.memory_space<vmem>>, vector<16x128xbf16>
    %c0_132 = arith.constant 0 : index
    %c0_133 = arith.constant 0 : index
    %255 = vector.load %arg3[%c0_132, %c0_133] : memref<128x512xbf16, #tpu.memory_space<vmem>>, vector<128x512xbf16>
    %cst_134 = arith.constant dense<0.000000e+00> : vector<16x512xf32>
    %256 = tpu.matmul %254, %255, %cst_134 {dimension_numbers = #tpu.dot_dimension_numbers<[1], [0], [0], [1], [0, 0, 1, 1], [], []>} : vector<16x128xbf16>, vector<128x512xbf16>, vector<16x512xf32> -> vector<16x512xf32>
    %257 = arith.addf %253, %256 : vector<16x512xf32>
    %c0_135 = arith.constant 0 : index
    %c0_136 = arith.constant 0 : index
    %258 = vector.load %arg10[%c0_135, %c0_136] : memref<16x128xf32, #tpu.memory_space<vmem>>, vector<16x128xf32>
    %259 = vector.extract_strided_slice %257 {offsets = [0, 0], sizes = [16, 128], strides = [1, 1]} : vector<16x512xf32> to vector<16x128xf32>
    %cst_137 = arith.constant 5.000000e-01 : f32
    %260 = vector.broadcast %cst_137 : f32 to vector<16x128xf32>
    %261 = arith.mulf %260, %259 : vector<16x128xf32>
    %262 = math.tanh %261 : vector<16x128xf32>
    %cst_138 = arith.constant 1.000000e+00 : f32
    %263 = vector.broadcast %cst_138 : f32 to vector<16x128xf32>
    %264 = arith.addf %262, %263 : vector<16x128xf32>
    %cst_139 = arith.constant 5.000000e-01 : f32
    %265 = vector.broadcast %cst_139 : f32 to vector<16x128xf32>
    %266 = arith.mulf %265, %264 : vector<16x128xf32>
    %267 = vector.extract_strided_slice %257 {offsets = [0, 128], sizes = [16, 128], strides = [1, 1]} : vector<16x512xf32> to vector<16x128xf32>
    %cst_140 = arith.constant 5.000000e-01 : f32
    %268 = vector.broadcast %cst_140 : f32 to vector<16x128xf32>
    %269 = arith.mulf %268, %267 : vector<16x128xf32>
    %270 = math.tanh %269 : vector<16x128xf32>
    %cst_141 = arith.constant 1.000000e+00 : f32
    %271 = vector.broadcast %cst_141 : f32 to vector<16x128xf32>
    %272 = arith.addf %270, %271 : vector<16x128xf32>
    %cst_142 = arith.constant 5.000000e-01 : f32
    %273 = vector.broadcast %cst_142 : f32 to vector<16x128xf32>
    %274 = arith.mulf %273, %272 : vector<16x128xf32>
    %275 = vector.extract_strided_slice %257 {offsets = [0, 256], sizes = [16, 128], strides = [1, 1]} : vector<16x512xf32> to vector<16x128xf32>
    %276 = math.tanh %275 : vector<16x128xf32>
    %277 = vector.extract_strided_slice %257 {offsets = [0, 384], sizes = [16, 128], strides = [1, 1]} : vector<16x512xf32> to vector<16x128xf32>
    %cst_143 = arith.constant 5.000000e-01 : f32
    %278 = vector.broadcast %cst_143 : f32 to vector<16x128xf32>
    %279 = arith.mulf %278, %277 : vector<16x128xf32>
    %280 = math.tanh %279 : vector<16x128xf32>
    %cst_144 = arith.constant 1.000000e+00 : f32
    %281 = vector.broadcast %cst_144 : f32 to vector<16x128xf32>
    %282 = arith.addf %280, %281 : vector<16x128xf32>
    %cst_145 = arith.constant 5.000000e-01 : f32
    %283 = vector.broadcast %cst_145 : f32 to vector<16x128xf32>
    %284 = arith.mulf %283, %282 : vector<16x128xf32>
    %285 = arith.mulf %274, %258 : vector<16x128xf32>
    %286 = arith.mulf %266, %276 : vector<16x128xf32>
    %287 = arith.addf %285, %286 : vector<16x128xf32>
    %288 = math.tanh %287 : vector<16x128xf32>
    %289 = arith.mulf %284, %288 : vector<16x128xf32>
    %c0_146 = arith.constant 0 : index
    %c0_147 = arith.constant 0 : index
    %290 = vector.load %arg10[%c0_146, %c0_147] : memref<16x128xf32, #tpu.memory_space<vmem>>, vector<16x128xf32>
    tpu.vector_store %arg10[%c0_146, %c0_147], %287 {strides = array<i32>} : memref<16x128xf32, #tpu.memory_space<vmem>>, vector<16x128xf32>,
    %291 = arith.truncf %289 : vector<16x128xf32> to vector<16x128xbf16>
    %c0_148 = arith.constant 0 : index
    %c0_149 = arith.constant 0 : index
    %292 = vector.load %arg9[%c0_148, %c0_149] : memref<16x128xbf16, #tpu.memory_space<vmem>>, vector<16x128xbf16>
    tpu.vector_store %arg9[%c0_148, %c0_149], %291 {strides = array<i32>} : memref<16x128xbf16, #tpu.memory_space<vmem>>, vector<16x128xbf16>,
    %cst_150 = arith.constant 0.000000e+00 : f32
    %293 = vector.broadcast %cst_150 : f32 to vector<16x128xf32>
    %294 = arith.maximumf %289, %293 : vector<16x128xf32>
    %295 = arith.truncf %294 : vector<16x128xf32> to vector<16x128xbf16>
    %296 = arith.index_cast %251 : i32 to index
    %c0_151 = arith.constant 0 : index
    %297 = vector.load %arg14[%296, %c0_151] : memref<128x128xbf16, #tpu.memory_space<vmem>>, vector<16x128xbf16>
    tpu.vector_store %arg14[%296, %c0_151], %295 {strides = array<i32>} : memref<128x128xbf16, #tpu.memory_space<vmem>>, vector<16x128xbf16>,
    %c6_i32 = arith.constant 6 : i32
    %c16_i32_152 = arith.constant 16 : i32
    %298 = arith.muli %c6_i32, %c16_i32_152 : i32
    %299 = tpu.assume_multiple %298, 16 : i32
    %300 = arith.index_cast %299 : i32 to index
    %c0_153 = arith.constant 0 : index
    %301 = vector.load %arg13[%300, %c0_153] : memref<128x512xf32, #tpu.memory_space<vmem>>, vector<16x512xf32>
    %c0_154 = arith.constant 0 : index
    %c0_155 = arith.constant 0 : index
    %302 = vector.load %arg9[%c0_154, %c0_155] : memref<16x128xbf16, #tpu.memory_space<vmem>>, vector<16x128xbf16>
    %c0_156 = arith.constant 0 : index
    %c0_157 = arith.constant 0 : index
    %303 = vector.load %arg3[%c0_156, %c0_157] : memref<128x512xbf16, #tpu.memory_space<vmem>>, vector<128x512xbf16>
    %cst_158 = arith.constant dense<0.000000e+00> : vector<16x512xf32>
    %304 = tpu.matmul %302, %303, %cst_158 {dimension_numbers = #tpu.dot_dimension_numbers<[1], [0], [0], [1], [0, 0, 1, 1], [], []>} : vector<16x128xbf16>, vector<128x512xbf16>, vector<16x512xf32> -> vector<16x512xf32>
    %305 = arith.addf %301, %304 : vector<16x512xf32>
    %c0_159 = arith.constant 0 : index
    %c0_160 = arith.constant 0 : index
    %306 = vector.load %arg10[%c0_159, %c0_160] : memref<16x128xf32, #tpu.memory_space<vmem>>, vector<16x128xf32>
    %307 = vector.extract_strided_slice %305 {offsets = [0, 0], sizes = [16, 128], strides = [1, 1]} : vector<16x512xf32> to vector<16x128xf32>
    %cst_161 = arith.constant 5.000000e-01 : f32
    %308 = vector.broadcast %cst_161 : f32 to vector<16x128xf32>
    %309 = arith.mulf %308, %307 : vector<16x128xf32>
    %310 = math.tanh %309 : vector<16x128xf32>
    %cst_162 = arith.constant 1.000000e+00 : f32
    %311 = vector.broadcast %cst_162 : f32 to vector<16x128xf32>
    %312 = arith.addf %310, %311 : vector<16x128xf32>
    %cst_163 = arith.constant 5.000000e-01 : f32
    %313 = vector.broadcast %cst_163 : f32 to vector<16x128xf32>
    %314 = arith.mulf %313, %312 : vector<16x128xf32>
    %315 = vector.extract_strided_slice %305 {offsets = [0, 128], sizes = [16, 128], strides = [1, 1]} : vector<16x512xf32> to vector<16x128xf32>
    %cst_164 = arith.constant 5.000000e-01 : f32
    %316 = vector.broadcast %cst_164 : f32 to vector<16x128xf32>
    %317 = arith.mulf %316, %315 : vector<16x128xf32>
    %318 = math.tanh %317 : vector<16x128xf32>
    %cst_165 = arith.constant 1.000000e+00 : f32
    %319 = vector.broadcast %cst_165 : f32 to vector<16x128xf32>
    %320 = arith.addf %318, %319 : vector<16x128xf32>
    %cst_166 = arith.constant 5.000000e-01 : f32
    %321 = vector.broadcast %cst_166 : f32 to vector<16x128xf32>
    %322 = arith.mulf %321, %320 : vector<16x128xf32>
    %323 = vector.extract_strided_slice %305 {offsets = [0, 256], sizes = [16, 128], strides = [1, 1]} : vector<16x512xf32> to vector<16x128xf32>
    %324 = math.tanh %323 : vector<16x128xf32>
    %325 = vector.extract_strided_slice %305 {offsets = [0, 384], sizes = [16, 128], strides = [1, 1]} : vector<16x512xf32> to vector<16x128xf32>
    %cst_167 = arith.constant 5.000000e-01 : f32
    %326 = vector.broadcast %cst_167 : f32 to vector<16x128xf32>
    %327 = arith.mulf %326, %325 : vector<16x128xf32>
    %328 = math.tanh %327 : vector<16x128xf32>
    %cst_168 = arith.constant 1.000000e+00 : f32
    %329 = vector.broadcast %cst_168 : f32 to vector<16x128xf32>
    %330 = arith.addf %328, %329 : vector<16x128xf32>
    %cst_169 = arith.constant 5.000000e-01 : f32
    %331 = vector.broadcast %cst_169 : f32 to vector<16x128xf32>
    %332 = arith.mulf %331, %330 : vector<16x128xf32>
    %333 = arith.mulf %322, %306 : vector<16x128xf32>
    %334 = arith.mulf %314, %324 : vector<16x128xf32>
    %335 = arith.addf %333, %334 : vector<16x128xf32>
    %336 = math.tanh %335 : vector<16x128xf32>
    %337 = arith.mulf %332, %336 : vector<16x128xf32>
    %c0_170 = arith.constant 0 : index
    %c0_171 = arith.constant 0 : index
    %338 = vector.load %arg10[%c0_170, %c0_171] : memref<16x128xf32, #tpu.memory_space<vmem>>, vector<16x128xf32>
    tpu.vector_store %arg10[%c0_170, %c0_171], %335 {strides = array<i32>} : memref<16x128xf32, #tpu.memory_space<vmem>>, vector<16x128xf32>,
    %339 = arith.truncf %337 : vector<16x128xf32> to vector<16x128xbf16>
    %c0_172 = arith.constant 0 : index
    %c0_173 = arith.constant 0 : index
    %340 = vector.load %arg9[%c0_172, %c0_173] : memref<16x128xbf16, #tpu.memory_space<vmem>>, vector<16x128xbf16>
    tpu.vector_store %arg9[%c0_172, %c0_173], %339 {strides = array<i32>} : memref<16x128xbf16, #tpu.memory_space<vmem>>, vector<16x128xbf16>,
    %cst_174 = arith.constant 0.000000e+00 : f32
    %341 = vector.broadcast %cst_174 : f32 to vector<16x128xf32>
    %342 = arith.maximumf %337, %341 : vector<16x128xf32>
    %343 = arith.truncf %342 : vector<16x128xf32> to vector<16x128xbf16>
    %344 = arith.index_cast %299 : i32 to index
    %c0_175 = arith.constant 0 : index
    %345 = vector.load %arg14[%344, %c0_175] : memref<128x128xbf16, #tpu.memory_space<vmem>>, vector<16x128xbf16>
    tpu.vector_store %arg14[%344, %c0_175], %343 {strides = array<i32>} : memref<128x128xbf16, #tpu.memory_space<vmem>>, vector<16x128xbf16>,
    %c7_i32 = arith.constant 7 : i32
    %c16_i32_176 = arith.constant 16 : i32
    %346 = arith.muli %c7_i32, %c16_i32_176 : i32
    %347 = tpu.assume_multiple %346, 16 : i32
    %348 = arith.index_cast %347 : i32 to index
    %c0_177 = arith.constant 0 : index
    %349 = vector.load %arg13[%348, %c0_177] : memref<128x512xf32, #tpu.memory_space<vmem>>, vector<16x512xf32>
    %c0_178 = arith.constant 0 : index
    %c0_179 = arith.constant 0 : index
    %350 = vector.load %arg9[%c0_178, %c0_179] : memref<16x128xbf16, #tpu.memory_space<vmem>>, vector<16x128xbf16>
    %c0_180 = arith.constant 0 : index
    %c0_181 = arith.constant 0 : index
    %351 = vector.load %arg3[%c0_180, %c0_181] : memref<128x512xbf16, #tpu.memory_space<vmem>>, vector<128x512xbf16>
    %cst_182 = arith.constant dense<0.000000e+00> : vector<16x512xf32>
    %352 = tpu.matmul %350, %351, %cst_182 {dimension_numbers = #tpu.dot_dimension_numbers<[1], [0], [0], [1], [0, 0, 1, 1], [], []>} : vector<16x128xbf16>, vector<128x512xbf16>, vector<16x512xf32> -> vector<16x512xf32>
    %353 = arith.addf %349, %352 : vector<16x512xf32>
    %c0_183 = arith.constant 0 : index
    %c0_184 = arith.constant 0 : index
    %354 = vector.load %arg10[%c0_183, %c0_184] : memref<16x128xf32, #tpu.memory_space<vmem>>, vector<16x128xf32>
    %355 = vector.extract_strided_slice %353 {offsets = [0, 0], sizes = [16, 128], strides = [1, 1]} : vector<16x512xf32> to vector<16x128xf32>
    %cst_185 = arith.constant 5.000000e-01 : f32
    %356 = vector.broadcast %cst_185 : f32 to vector<16x128xf32>
    %357 = arith.mulf %356, %355 : vector<16x128xf32>
    %358 = math.tanh %357 : vector<16x128xf32>
    %cst_186 = arith.constant 1.000000e+00 : f32
    %359 = vector.broadcast %cst_186 : f32 to vector<16x128xf32>
    %360 = arith.addf %358, %359 : vector<16x128xf32>
    %cst_187 = arith.constant 5.000000e-01 : f32
    %361 = vector.broadcast %cst_187 : f32 to vector<16x128xf32>
    %362 = arith.mulf %361, %360 : vector<16x128xf32>
    %363 = vector.extract_strided_slice %353 {offsets = [0, 128], sizes = [16, 128], strides = [1, 1]} : vector<16x512xf32> to vector<16x128xf32>
    %cst_188 = arith.constant 5.000000e-01 : f32
    %364 = vector.broadcast %cst_188 : f32 to vector<16x128xf32>
    %365 = arith.mulf %364, %363 : vector<16x128xf32>
    %366 = math.tanh %365 : vector<16x128xf32>
    %cst_189 = arith.constant 1.000000e+00 : f32
    %367 = vector.broadcast %cst_189 : f32 to vector<16x128xf32>
    %368 = arith.addf %366, %367 : vector<16x128xf32>
    %cst_190 = arith.constant 5.000000e-01 : f32
    %369 = vector.broadcast %cst_190 : f32 to vector<16x128xf32>
    %370 = arith.mulf %369, %368 : vector<16x128xf32>
    %371 = vector.extract_strided_slice %353 {offsets = [0, 256], sizes = [16, 128], strides = [1, 1]} : vector<16x512xf32> to vector<16x128xf32>
    %372 = math.tanh %371 : vector<16x128xf32>
    %373 = vector.extract_strided_slice %353 {offsets = [0, 384], sizes = [16, 128], strides = [1, 1]} : vector<16x512xf32> to vector<16x128xf32>
    %cst_191 = arith.constant 5.000000e-01 : f32
    %374 = vector.broadcast %cst_191 : f32 to vector<16x128xf32>
    %375 = arith.mulf %374, %373 : vector<16x128xf32>
    %376 = math.tanh %375 : vector<16x128xf32>
    %cst_192 = arith.constant 1.000000e+00 : f32
    %377 = vector.broadcast %cst_192 : f32 to vector<16x128xf32>
    %378 = arith.addf %376, %377 : vector<16x128xf32>
    %cst_193 = arith.constant 5.000000e-01 : f32
    %379 = vector.broadcast %cst_193 : f32 to vector<16x128xf32>
    %380 = arith.mulf %379, %378 : vector<16x128xf32>
    %381 = arith.mulf %370, %354 : vector<16x128xf32>
    %382 = arith.mulf %362, %372 : vector<16x128xf32>
    %383 = arith.addf %381, %382 : vector<16x128xf32>
    %384 = math.tanh %383 : vector<16x128xf32>
    %385 = arith.mulf %380, %384 : vector<16x128xf32>
    %c0_194 = arith.constant 0 : index
    %c0_195 = arith.constant 0 : index
    %386 = vector.load %arg10[%c0_194, %c0_195] : memref<16x128xf32, #tpu.memory_space<vmem>>, vector<16x128xf32>
    tpu.vector_store %arg10[%c0_194, %c0_195], %383 {strides = array<i32>} : memref<16x128xf32, #tpu.memory_space<vmem>>, vector<16x128xf32>,
    %387 = arith.truncf %385 : vector<16x128xf32> to vector<16x128xbf16>
    %c0_196 = arith.constant 0 : index
    %c0_197 = arith.constant 0 : index
    %388 = vector.load %arg9[%c0_196, %c0_197] : memref<16x128xbf16, #tpu.memory_space<vmem>>, vector<16x128xbf16>
    tpu.vector_store %arg9[%c0_196, %c0_197], %387 {strides = array<i32>} : memref<16x128xbf16, #tpu.memory_space<vmem>>, vector<16x128xbf16>,
    %cst_198 = arith.constant 0.000000e+00 : f32
    %389 = vector.broadcast %cst_198 : f32 to vector<16x128xf32>
    %390 = arith.maximumf %385, %389 : vector<16x128xf32>
    %391 = arith.truncf %390 : vector<16x128xf32> to vector<16x128xbf16>
    %392 = arith.index_cast %347 : i32 to index
    %c0_199 = arith.constant 0 : index
    %393 = vector.load %arg14[%392, %c0_199] : memref<128x128xbf16, #tpu.memory_space<vmem>>, vector<16x128xbf16>
    tpu.vector_store %arg14[%392, %c0_199], %391 {strides = array<i32>} : memref<128x128xbf16, #tpu.memory_space<vmem>>, vector<16x128xbf16>,
    %c8_i32 = arith.constant 8 : i32
    %c0_200 = arith.constant 0 : index
    %c0_201 = arith.constant 0 : index
    %394 = vector.load %arg14[%c0_200, %c0_201] : memref<128x128xbf16, #tpu.memory_space<vmem>>, vector<128x128xbf16>
    %c0_202 = arith.constant 0 : index
    %c0_203 = arith.constant 0 : index
    %395 = vector.load %arg5[%c0_202, %c0_203] : memref<128x512xbf16, #tpu.memory_space<vmem>>, vector<128x512xbf16>
    %cst_204 = arith.constant dense<0.000000e+00> : vector<128x512xf32>
    %396 = tpu.matmul %394, %395, %cst_204 {dimension_numbers = #tpu.dot_dimension_numbers<[1], [0], [0], [1], [0, 0, 1, 1], [], []>} : vector<128x128xbf16>, vector<128x512xbf16>, vector<128x512xf32> -> vector<128x512xf32>
    %c0_205 = arith.constant 0 : index
    %c0_206 = arith.constant 0 : index
    %397 = vector.load %arg7[%c0_205, %c0_206] : memref<1x512xf32, #tpu.memory_space<vmem>>, vector<1x512xf32>
    %398 = vector.broadcast %397 : vector<1x512xf32> to vector<128x512xf32>
    %399 = arith.addf %396, %398 : vector<128x512xf32>
    %c0_207 = arith.constant 0 : index
    %c0_208 = arith.constant 0 : index
    %400 = vector.load %arg15[%c0_207, %c0_208] : memref<128x512xf32, #tpu.memory_space<vmem>>, vector<128x512xf32>
    tpu.vector_store %arg15[%c0_207, %c0_208], %399 {strides = array<i32>} : memref<128x512xf32, #tpu.memory_space<vmem>>, vector<128x512xf32>,
    %c0_i32_209 = arith.constant 0 : i32
    %c16_i32_210 = arith.constant 16 : i32
    %401 = arith.muli %c0_i32_209, %c16_i32_210 : i32
    %402 = tpu.assume_multiple %401, 16 : i32
    %403 = arith.index_cast %402 : i32 to index
    %c0_211 = arith.constant 0 : index
    %404 = vector.load %arg15[%403, %c0_211] : memref<128x512xf32, #tpu.memory_space<vmem>>, vector<16x512xf32>
    %c0_212 = arith.constant 0 : index
    %c0_213 = arith.constant 0 : index
    %405 = vector.load %arg11[%c0_212, %c0_213] : memref<16x128xbf16, #tpu.memory_space<vmem>>, vector<16x128xbf16>
    %c0_214 = arith.constant 0 : index
    %c0_215 = arith.constant 0 : index
    %406 = vector.load %arg6[%c0_214, %c0_215] : memref<128x512xbf16, #tpu.memory_space<vmem>>, vector<128x512xbf16>
    %cst_216 = arith.constant dense<0.000000e+00> : vector<16x512xf32>
    %407 = tpu.matmul %405, %406, %cst_216 {dimension_numbers = #tpu.dot_dimension_numbers<[1], [0], [0], [1], [0, 0, 1, 1], [], []>} : vector<16x128xbf16>, vector<128x512xbf16>, vector<16x512xf32> -> vector<16x512xf32>
    %408 = arith.addf %404, %407 : vector<16x512xf32>
    %c0_217 = arith.constant 0 : index
    %c0_218 = arith.constant 0 : index
    %409 = vector.load %arg12[%c0_217, %c0_218] : memref<16x128xf32, #tpu.memory_space<vmem>>, vector<16x128xf32>
    %410 = vector.extract_strided_slice %408 {offsets = [0, 0], sizes = [16, 128], strides = [1, 1]} : vector<16x512xf32> to vector<16x128xf32>
    %cst_219 = arith.constant 5.000000e-01 : f32
    %411 = vector.broadcast %cst_219 : f32 to vector<16x128xf32>
    %412 = arith.mulf %411, %410 : vector<16x128xf32>
    %413 = math.tanh %412 : vector<16x128xf32>
    %cst_220 = arith.constant 1.000000e+00 : f32
    %414 = vector.broadcast %cst_220 : f32 to vector<16x128xf32>
    %415 = arith.addf %413, %414 : vector<16x128xf32>
    %cst_221 = arith.constant 5.000000e-01 : f32
    %416 = vector.broadcast %cst_221 : f32 to vector<16x128xf32>
    %417 = arith.mulf %416, %415 : vector<16x128xf32>
    %418 = vector.extract_strided_slice %408 {offsets = [0, 128], sizes = [16, 128], strides = [1, 1]} : vector<16x512xf32> to vector<16x128xf32>
    %cst_222 = arith.constant 5.000000e-01 : f32
    %419 = vector.broadcast %cst_222 : f32 to vector<16x128xf32>
    %420 = arith.mulf %419, %418 : vector<16x128xf32>
    %421 = math.tanh %420 : vector<16x128xf32>
    %cst_223 = arith.constant 1.000000e+00 : f32
    %422 = vector.broadcast %cst_223 : f32 to vector<16x128xf32>
    %423 = arith.addf %421, %422 : vector<16x128xf32>
    %cst_224 = arith.constant 5.000000e-01 : f32
    %424 = vector.broadcast %cst_224 : f32 to vector<16x128xf32>
    %425 = arith.mulf %424, %423 : vector<16x128xf32>
    %426 = vector.extract_strided_slice %408 {offsets = [0, 256], sizes = [16, 128], strides = [1, 1]} : vector<16x512xf32> to vector<16x128xf32>
    %427 = math.tanh %426 : vector<16x128xf32>
    %428 = vector.extract_strided_slice %408 {offsets = [0, 384], sizes = [16, 128], strides = [1, 1]} : vector<16x512xf32> to vector<16x128xf32>
    %cst_225 = arith.constant 5.000000e-01 : f32
    %429 = vector.broadcast %cst_225 : f32 to vector<16x128xf32>
    %430 = arith.mulf %429, %428 : vector<16x128xf32>
    %431 = math.tanh %430 : vector<16x128xf32>
    %cst_226 = arith.constant 1.000000e+00 : f32
    %432 = vector.broadcast %cst_226 : f32 to vector<16x128xf32>
    %433 = arith.addf %431, %432 : vector<16x128xf32>
    %cst_227 = arith.constant 5.000000e-01 : f32
    %434 = vector.broadcast %cst_227 : f32 to vector<16x128xf32>
    %435 = arith.mulf %434, %433 : vector<16x128xf32>
    %436 = arith.mulf %425, %409 : vector<16x128xf32>
    %437 = arith.mulf %417, %427 : vector<16x128xf32>
    %438 = arith.addf %436, %437 : vector<16x128xf32>
    %439 = math.tanh %438 : vector<16x128xf32>
    %440 = arith.mulf %435, %439 : vector<16x128xf32>
    %c0_228 = arith.constant 0 : index
    %c0_229 = arith.constant 0 : index
    %441 = vector.load %arg12[%c0_228, %c0_229] : memref<16x128xf32, #tpu.memory_space<vmem>>, vector<16x128xf32>
    tpu.vector_store %arg12[%c0_228, %c0_229], %438 {strides = array<i32>} : memref<16x128xf32, #tpu.memory_space<vmem>>, vector<16x128xf32>,
    %442 = arith.truncf %440 : vector<16x128xf32> to vector<16x128xbf16>
    %c0_230 = arith.constant 0 : index
    %c0_231 = arith.constant 0 : index
    %443 = vector.load %arg11[%c0_230, %c0_231] : memref<16x128xbf16, #tpu.memory_space<vmem>>, vector<16x128xbf16>
    tpu.vector_store %arg11[%c0_230, %c0_231], %442 {strides = array<i32>} : memref<16x128xbf16, #tpu.memory_space<vmem>>, vector<16x128xbf16>,
    %444 = arith.truncf %440 : vector<16x128xf32> to vector<16x128xbf16>
    %445 = arith.index_cast %402 : i32 to index
    %c0_232 = arith.constant 0 : index
    %446 = vector.load %arg8[%445, %c0_232] : memref<128x128xbf16, #tpu.memory_space<vmem>>, vector<16x128xbf16>
    tpu.vector_store %arg8[%445, %c0_232], %444 {strides = array<i32>} : memref<128x128xbf16, #tpu.memory_space<vmem>>, vector<16x128xbf16>,
    %c1_i32_233 = arith.constant 1 : i32
    %c16_i32_234 = arith.constant 16 : i32
    %447 = arith.muli %c1_i32_233, %c16_i32_234 : i32
    %448 = tpu.assume_multiple %447, 16 : i32
    %449 = arith.index_cast %448 : i32 to index
    %c0_235 = arith.constant 0 : index
    %450 = vector.load %arg15[%449, %c0_235] : memref<128x512xf32, #tpu.memory_space<vmem>>, vector<16x512xf32>
    %c0_236 = arith.constant 0 : index
    %c0_237 = arith.constant 0 : index
    %451 = vector.load %arg11[%c0_236, %c0_237] : memref<16x128xbf16, #tpu.memory_space<vmem>>, vector<16x128xbf16>
    %c0_238 = arith.constant 0 : index
    %c0_239 = arith.constant 0 : index
    %452 = vector.load %arg6[%c0_238, %c0_239] : memref<128x512xbf16, #tpu.memory_space<vmem>>, vector<128x512xbf16>
    %cst_240 = arith.constant dense<0.000000e+00> : vector<16x512xf32>
    %453 = tpu.matmul %451, %452, %cst_240 {dimension_numbers = #tpu.dot_dimension_numbers<[1], [0], [0], [1], [0, 0, 1, 1], [], []>} : vector<16x128xbf16>, vector<128x512xbf16>, vector<16x512xf32> -> vector<16x512xf32>
    %454 = arith.addf %450, %453 : vector<16x512xf32>
    %c0_241 = arith.constant 0 : index
    %c0_242 = arith.constant 0 : index
    %455 = vector.load %arg12[%c0_241, %c0_242] : memref<16x128xf32, #tpu.memory_space<vmem>>, vector<16x128xf32>
    %456 = vector.extract_strided_slice %454 {offsets = [0, 0], sizes = [16, 128], strides = [1, 1]} : vector<16x512xf32> to vector<16x128xf32>
    %cst_243 = arith.constant 5.000000e-01 : f32
    %457 = vector.broadcast %cst_243 : f32 to vector<16x128xf32>
    %458 = arith.mulf %457, %456 : vector<16x128xf32>
    %459 = math.tanh %458 : vector<16x128xf32>
    %cst_244 = arith.constant 1.000000e+00 : f32
    %460 = vector.broadcast %cst_244 : f32 to vector<16x128xf32>
    %461 = arith.addf %459, %460 : vector<16x128xf32>
    %cst_245 = arith.constant 5.000000e-01 : f32
    %462 = vector.broadcast %cst_245 : f32 to vector<16x128xf32>
    %463 = arith.mulf %462, %461 : vector<16x128xf32>
    %464 = vector.extract_strided_slice %454 {offsets = [0, 128], sizes = [16, 128], strides = [1, 1]} : vector<16x512xf32> to vector<16x128xf32>
    %cst_246 = arith.constant 5.000000e-01 : f32
    %465 = vector.broadcast %cst_246 : f32 to vector<16x128xf32>
    %466 = arith.mulf %465, %464 : vector<16x128xf32>
    %467 = math.tanh %466 : vector<16x128xf32>
    %cst_247 = arith.constant 1.000000e+00 : f32
    %468 = vector.broadcast %cst_247 : f32 to vector<16x128xf32>
    %469 = arith.addf %467, %468 : vector<16x128xf32>
    %cst_248 = arith.constant 5.000000e-01 : f32
    %470 = vector.broadcast %cst_248 : f32 to vector<16x128xf32>
    %471 = arith.mulf %470, %469 : vector<16x128xf32>
    %472 = vector.extract_strided_slice %454 {offsets = [0, 256], sizes = [16, 128], strides = [1, 1]} : vector<16x512xf32> to vector<16x128xf32>
    %473 = math.tanh %472 : vector<16x128xf32>
    %474 = vector.extract_strided_slice %454 {offsets = [0, 384], sizes = [16, 128], strides = [1, 1]} : vector<16x512xf32> to vector<16x128xf32>
    %cst_249 = arith.constant 5.000000e-01 : f32
    %475 = vector.broadcast %cst_249 : f32 to vector<16x128xf32>
    %476 = arith.mulf %475, %474 : vector<16x128xf32>
    %477 = math.tanh %476 : vector<16x128xf32>
    %cst_250 = arith.constant 1.000000e+00 : f32
    %478 = vector.broadcast %cst_250 : f32 to vector<16x128xf32>
    %479 = arith.addf %477, %478 : vector<16x128xf32>
    %cst_251 = arith.constant 5.000000e-01 : f32
    %480 = vector.broadcast %cst_251 : f32 to vector<16x128xf32>
    %481 = arith.mulf %480, %479 : vector<16x128xf32>
    %482 = arith.mulf %471, %455 : vector<16x128xf32>
    %483 = arith.mulf %463, %473 : vector<16x128xf32>
    %484 = arith.addf %482, %483 : vector<16x128xf32>
    %485 = math.tanh %484 : vector<16x128xf32>
    %486 = arith.mulf %481, %485 : vector<16x128xf32>
    %c0_252 = arith.constant 0 : index
    %c0_253 = arith.constant 0 : index
    %487 = vector.load %arg12[%c0_252, %c0_253] : memref<16x128xf32, #tpu.memory_space<vmem>>, vector<16x128xf32>
    tpu.vector_store %arg12[%c0_252, %c0_253], %484 {strides = array<i32>} : memref<16x128xf32, #tpu.memory_space<vmem>>, vector<16x128xf32>,
    %488 = arith.truncf %486 : vector<16x128xf32> to vector<16x128xbf16>
    %c0_254 = arith.constant 0 : index
    %c0_255 = arith.constant 0 : index
    %489 = vector.load %arg11[%c0_254, %c0_255] : memref<16x128xbf16, #tpu.memory_space<vmem>>, vector<16x128xbf16>
    tpu.vector_store %arg11[%c0_254, %c0_255], %488 {strides = array<i32>} : memref<16x128xbf16, #tpu.memory_space<vmem>>, vector<16x128xbf16>,
    %490 = arith.truncf %486 : vector<16x128xf32> to vector<16x128xbf16>
    %491 = arith.index_cast %448 : i32 to index
    %c0_256 = arith.constant 0 : index
    %492 = vector.load %arg8[%491, %c0_256] : memref<128x128xbf16, #tpu.memory_space<vmem>>, vector<16x128xbf16>
    tpu.vector_store %arg8[%491, %c0_256], %490 {strides = array<i32>} : memref<128x128xbf16, #tpu.memory_space<vmem>>, vector<16x128xbf16>,
    %c2_i32_257 = arith.constant 2 : i32
    %c16_i32_258 = arith.constant 16 : i32
    %493 = arith.muli %c2_i32_257, %c16_i32_258 : i32
    %494 = tpu.assume_multiple %493, 16 : i32
    %495 = arith.index_cast %494 : i32 to index
    %c0_259 = arith.constant 0 : index
    %496 = vector.load %arg15[%495, %c0_259] : memref<128x512xf32, #tpu.memory_space<vmem>>, vector<16x512xf32>
    %c0_260 = arith.constant 0 : index
    %c0_261 = arith.constant 0 : index
    %497 = vector.load %arg11[%c0_260, %c0_261] : memref<16x128xbf16, #tpu.memory_space<vmem>>, vector<16x128xbf16>
    %c0_262 = arith.constant 0 : index
    %c0_263 = arith.constant 0 : index
    %498 = vector.load %arg6[%c0_262, %c0_263] : memref<128x512xbf16, #tpu.memory_space<vmem>>, vector<128x512xbf16>
    %cst_264 = arith.constant dense<0.000000e+00> : vector<16x512xf32>
    %499 = tpu.matmul %497, %498, %cst_264 {dimension_numbers = #tpu.dot_dimension_numbers<[1], [0], [0], [1], [0, 0, 1, 1], [], []>} : vector<16x128xbf16>, vector<128x512xbf16>, vector<16x512xf32> -> vector<16x512xf32>
    %500 = arith.addf %496, %499 : vector<16x512xf32>
    %c0_265 = arith.constant 0 : index
    %c0_266 = arith.constant 0 : index
    %501 = vector.load %arg12[%c0_265, %c0_266] : memref<16x128xf32, #tpu.memory_space<vmem>>, vector<16x128xf32>
    %502 = vector.extract_strided_slice %500 {offsets = [0, 0], sizes = [16, 128], strides = [1, 1]} : vector<16x512xf32> to vector<16x128xf32>
    %cst_267 = arith.constant 5.000000e-01 : f32
    %503 = vector.broadcast %cst_267 : f32 to vector<16x128xf32>
    %504 = arith.mulf %503, %502 : vector<16x128xf32>
    %505 = math.tanh %504 : vector<16x128xf32>
    %cst_268 = arith.constant 1.000000e+00 : f32
    %506 = vector.broadcast %cst_268 : f32 to vector<16x128xf32>
    %507 = arith.addf %505, %506 : vector<16x128xf32>
    %cst_269 = arith.constant 5.000000e-01 : f32
    %508 = vector.broadcast %cst_269 : f32 to vector<16x128xf32>
    %509 = arith.mulf %508, %507 : vector<16x128xf32>
    %510 = vector.extract_strided_slice %500 {offsets = [0, 128], sizes = [16, 128], strides = [1, 1]} : vector<16x512xf32> to vector<16x128xf32>
    %cst_270 = arith.constant 5.000000e-01 : f32
    %511 = vector.broadcast %cst_270 : f32 to vector<16x128xf32>
    %512 = arith.mulf %511, %510 : vector<16x128xf32>
    %513 = math.tanh %512 : vector<16x128xf32>
    %cst_271 = arith.constant 1.000000e+00 : f32
    %514 = vector.broadcast %cst_271 : f32 to vector<16x128xf32>
    %515 = arith.addf %513, %514 : vector<16x128xf32>
    %cst_272 = arith.constant 5.000000e-01 : f32
    %516 = vector.broadcast %cst_272 : f32 to vector<16x128xf32>
    %517 = arith.mulf %516, %515 : vector<16x128xf32>
    %518 = vector.extract_strided_slice %500 {offsets = [0, 256], sizes = [16, 128], strides = [1, 1]} : vector<16x512xf32> to vector<16x128xf32>
    %519 = math.tanh %518 : vector<16x128xf32>
    %520 = vector.extract_strided_slice %500 {offsets = [0, 384], sizes = [16, 128], strides = [1, 1]} : vector<16x512xf32> to vector<16x128xf32>
    %cst_273 = arith.constant 5.000000e-01 : f32
    %521 = vector.broadcast %cst_273 : f32 to vector<16x128xf32>
    %522 = arith.mulf %521, %520 : vector<16x128xf32>
    %523 = math.tanh %522 : vector<16x128xf32>
    %cst_274 = arith.constant 1.000000e+00 : f32
    %524 = vector.broadcast %cst_274 : f32 to vector<16x128xf32>
    %525 = arith.addf %523, %524 : vector<16x128xf32>
    %cst_275 = arith.constant 5.000000e-01 : f32
    %526 = vector.broadcast %cst_275 : f32 to vector<16x128xf32>
    %527 = arith.mulf %526, %525 : vector<16x128xf32>
    %528 = arith.mulf %517, %501 : vector<16x128xf32>
    %529 = arith.mulf %509, %519 : vector<16x128xf32>
    %530 = arith.addf %528, %529 : vector<16x128xf32>
    %531 = math.tanh %530 : vector<16x128xf32>
    %532 = arith.mulf %527, %531 : vector<16x128xf32>
    %c0_276 = arith.constant 0 : index
    %c0_277 = arith.constant 0 : index
    %533 = vector.load %arg12[%c0_276, %c0_277] : memref<16x128xf32, #tpu.memory_space<vmem>>, vector<16x128xf32>
    tpu.vector_store %arg12[%c0_276, %c0_277], %530 {strides = array<i32>} : memref<16x128xf32, #tpu.memory_space<vmem>>, vector<16x128xf32>,
    %534 = arith.truncf %532 : vector<16x128xf32> to vector<16x128xbf16>
    %c0_278 = arith.constant 0 : index
    %c0_279 = arith.constant 0 : index
    %535 = vector.load %arg11[%c0_278, %c0_279] : memref<16x128xbf16, #tpu.memory_space<vmem>>, vector<16x128xbf16>
    tpu.vector_store %arg11[%c0_278, %c0_279], %534 {strides = array<i32>} : memref<16x128xbf16, #tpu.memory_space<vmem>>, vector<16x128xbf16>,
    %536 = arith.truncf %532 : vector<16x128xf32> to vector<16x128xbf16>
    %537 = arith.index_cast %494 : i32 to index
    %c0_280 = arith.constant 0 : index
    %538 = vector.load %arg8[%537, %c0_280] : memref<128x128xbf16, #tpu.memory_space<vmem>>, vector<16x128xbf16>
    tpu.vector_store %arg8[%537, %c0_280], %536 {strides = array<i32>} : memref<128x128xbf16, #tpu.memory_space<vmem>>, vector<16x128xbf16>,
    %c3_i32_281 = arith.constant 3 : i32
    %c16_i32_282 = arith.constant 16 : i32
    %539 = arith.muli %c3_i32_281, %c16_i32_282 : i32
    %540 = tpu.assume_multiple %539, 16 : i32
    %541 = arith.index_cast %540 : i32 to index
    %c0_283 = arith.constant 0 : index
    %542 = vector.load %arg15[%541, %c0_283] : memref<128x512xf32, #tpu.memory_space<vmem>>, vector<16x512xf32>
    %c0_284 = arith.constant 0 : index
    %c0_285 = arith.constant 0 : index
    %543 = vector.load %arg11[%c0_284, %c0_285] : memref<16x128xbf16, #tpu.memory_space<vmem>>, vector<16x128xbf16>
    %c0_286 = arith.constant 0 : index
    %c0_287 = arith.constant 0 : index
    %544 = vector.load %arg6[%c0_286, %c0_287] : memref<128x512xbf16, #tpu.memory_space<vmem>>, vector<128x512xbf16>
    %cst_288 = arith.constant dense<0.000000e+00> : vector<16x512xf32>
    %545 = tpu.matmul %543, %544, %cst_288 {dimension_numbers = #tpu.dot_dimension_numbers<[1], [0], [0], [1], [0, 0, 1, 1], [], []>} : vector<16x128xbf16>, vector<128x512xbf16>, vector<16x512xf32> -> vector<16x512xf32>
    %546 = arith.addf %542, %545 : vector<16x512xf32>
    %c0_289 = arith.constant 0 : index
    %c0_290 = arith.constant 0 : index
    %547 = vector.load %arg12[%c0_289, %c0_290] : memref<16x128xf32, #tpu.memory_space<vmem>>, vector<16x128xf32>
    %548 = vector.extract_strided_slice %546 {offsets = [0, 0], sizes = [16, 128], strides = [1, 1]} : vector<16x512xf32> to vector<16x128xf32>
    %cst_291 = arith.constant 5.000000e-01 : f32
    %549 = vector.broadcast %cst_291 : f32 to vector<16x128xf32>
    %550 = arith.mulf %549, %548 : vector<16x128xf32>
    %551 = math.tanh %550 : vector<16x128xf32>
    %cst_292 = arith.constant 1.000000e+00 : f32
    %552 = vector.broadcast %cst_292 : f32 to vector<16x128xf32>
    %553 = arith.addf %551, %552 : vector<16x128xf32>
    %cst_293 = arith.constant 5.000000e-01 : f32
    %554 = vector.broadcast %cst_293 : f32 to vector<16x128xf32>
    %555 = arith.mulf %554, %553 : vector<16x128xf32>
    %556 = vector.extract_strided_slice %546 {offsets = [0, 128], sizes = [16, 128], strides = [1, 1]} : vector<16x512xf32> to vector<16x128xf32>
    %cst_294 = arith.constant 5.000000e-01 : f32
    %557 = vector.broadcast %cst_294 : f32 to vector<16x128xf32>
    %558 = arith.mulf %557, %556 : vector<16x128xf32>
    %559 = math.tanh %558 : vector<16x128xf32>
    %cst_295 = arith.constant 1.000000e+00 : f32
    %560 = vector.broadcast %cst_295 : f32 to vector<16x128xf32>
    %561 = arith.addf %559, %560 : vector<16x128xf32>
    %cst_296 = arith.constant 5.000000e-01 : f32
    %562 = vector.broadcast %cst_296 : f32 to vector<16x128xf32>
    %563 = arith.mulf %562, %561 : vector<16x128xf32>
    %564 = vector.extract_strided_slice %546 {offsets = [0, 256], sizes = [16, 128], strides = [1, 1]} : vector<16x512xf32> to vector<16x128xf32>
    %565 = math.tanh %564 : vector<16x128xf32>
    %566 = vector.extract_strided_slice %546 {offsets = [0, 384], sizes = [16, 128], strides = [1, 1]} : vector<16x512xf32> to vector<16x128xf32>
    %cst_297 = arith.constant 5.000000e-01 : f32
    %567 = vector.broadcast %cst_297 : f32 to vector<16x128xf32>
    %568 = arith.mulf %567, %566 : vector<16x128xf32>
    %569 = math.tanh %568 : vector<16x128xf32>
    %cst_298 = arith.constant 1.000000e+00 : f32
    %570 = vector.broadcast %cst_298 : f32 to vector<16x128xf32>
    %571 = arith.addf %569, %570 : vector<16x128xf32>
    %cst_299 = arith.constant 5.000000e-01 : f32
    %572 = vector.broadcast %cst_299 : f32 to vector<16x128xf32>
    %573 = arith.mulf %572, %571 : vector<16x128xf32>
    %574 = arith.mulf %563, %547 : vector<16x128xf32>
    %575 = arith.mulf %555, %565 : vector<16x128xf32>
    %576 = arith.addf %574, %575 : vector<16x128xf32>
    %577 = math.tanh %576 : vector<16x128xf32>
    %578 = arith.mulf %573, %577 : vector<16x128xf32>
    %c0_300 = arith.constant 0 : index
    %c0_301 = arith.constant 0 : index
    %579 = vector.load %arg12[%c0_300, %c0_301] : memref<16x128xf32, #tpu.memory_space<vmem>>, vector<16x128xf32>
    tpu.vector_store %arg12[%c0_300, %c0_301], %576 {strides = array<i32>} : memref<16x128xf32, #tpu.memory_space<vmem>>, vector<16x128xf32>,
    %580 = arith.truncf %578 : vector<16x128xf32> to vector<16x128xbf16>
    %c0_302 = arith.constant 0 : index
    %c0_303 = arith.constant 0 : index
    %581 = vector.load %arg11[%c0_302, %c0_303] : memref<16x128xbf16, #tpu.memory_space<vmem>>, vector<16x128xbf16>
    tpu.vector_store %arg11[%c0_302, %c0_303], %580 {strides = array<i32>} : memref<16x128xbf16, #tpu.memory_space<vmem>>, vector<16x128xbf16>,
    %582 = arith.truncf %578 : vector<16x128xf32> to vector<16x128xbf16>
    %583 = arith.index_cast %540 : i32 to index
    %c0_304 = arith.constant 0 : index
    %584 = vector.load %arg8[%583, %c0_304] : memref<128x128xbf16, #tpu.memory_space<vmem>>, vector<16x128xbf16>
    tpu.vector_store %arg8[%583, %c0_304], %582 {strides = array<i32>} : memref<128x128xbf16, #tpu.memory_space<vmem>>, vector<16x128xbf16>,
    %c4_i32_305 = arith.constant 4 : i32
    %c16_i32_306 = arith.constant 16 : i32
    %585 = arith.muli %c4_i32_305, %c16_i32_306 : i32
    %586 = tpu.assume_multiple %585, 16 : i32
    %587 = arith.index_cast %586 : i32 to index
    %c0_307 = arith.constant 0 : index
    %588 = vector.load %arg15[%587, %c0_307] : memref<128x512xf32, #tpu.memory_space<vmem>>, vector<16x512xf32>
    %c0_308 = arith.constant 0 : index
    %c0_309 = arith.constant 0 : index
    %589 = vector.load %arg11[%c0_308, %c0_309] : memref<16x128xbf16, #tpu.memory_space<vmem>>, vector<16x128xbf16>
    %c0_310 = arith.constant 0 : index
    %c0_311 = arith.constant 0 : index
    %590 = vector.load %arg6[%c0_310, %c0_311] : memref<128x512xbf16, #tpu.memory_space<vmem>>, vector<128x512xbf16>
    %cst_312 = arith.constant dense<0.000000e+00> : vector<16x512xf32>
    %591 = tpu.matmul %589, %590, %cst_312 {dimension_numbers = #tpu.dot_dimension_numbers<[1], [0], [0], [1], [0, 0, 1, 1], [], []>} : vector<16x128xbf16>, vector<128x512xbf16>, vector<16x512xf32> -> vector<16x512xf32>
    %592 = arith.addf %588, %591 : vector<16x512xf32>
    %c0_313 = arith.constant 0 : index
    %c0_314 = arith.constant 0 : index
    %593 = vector.load %arg12[%c0_313, %c0_314] : memref<16x128xf32, #tpu.memory_space<vmem>>, vector<16x128xf32>
    %594 = vector.extract_strided_slice %592 {offsets = [0, 0], sizes = [16, 128], strides = [1, 1]} : vector<16x512xf32> to vector<16x128xf32>
    %cst_315 = arith.constant 5.000000e-01 : f32
    %595 = vector.broadcast %cst_315 : f32 to vector<16x128xf32>
    %596 = arith.mulf %595, %594 : vector<16x128xf32>
    %597 = math.tanh %596 : vector<16x128xf32>
    %cst_316 = arith.constant 1.000000e+00 : f32
    %598 = vector.broadcast %cst_316 : f32 to vector<16x128xf32>
    %599 = arith.addf %597, %598 : vector<16x128xf32>
    %cst_317 = arith.constant 5.000000e-01 : f32
    %600 = vector.broadcast %cst_317 : f32 to vector<16x128xf32>
    %601 = arith.mulf %600, %599 : vector<16x128xf32>
    %602 = vector.extract_strided_slice %592 {offsets = [0, 128], sizes = [16, 128], strides = [1, 1]} : vector<16x512xf32> to vector<16x128xf32>
    %cst_318 = arith.constant 5.000000e-01 : f32
    %603 = vector.broadcast %cst_318 : f32 to vector<16x128xf32>
    %604 = arith.mulf %603, %602 : vector<16x128xf32>
    %605 = math.tanh %604 : vector<16x128xf32>
    %cst_319 = arith.constant 1.000000e+00 : f32
    %606 = vector.broadcast %cst_319 : f32 to vector<16x128xf32>
    %607 = arith.addf %605, %606 : vector<16x128xf32>
    %cst_320 = arith.constant 5.000000e-01 : f32
    %608 = vector.broadcast %cst_320 : f32 to vector<16x128xf32>
    %609 = arith.mulf %608, %607 : vector<16x128xf32>
    %610 = vector.extract_strided_slice %592 {offsets = [0, 256], sizes = [16, 128], strides = [1, 1]} : vector<16x512xf32> to vector<16x128xf32>
    %611 = math.tanh %610 : vector<16x128xf32>
    %612 = vector.extract_strided_slice %592 {offsets = [0, 384], sizes = [16, 128], strides = [1, 1]} : vector<16x512xf32> to vector<16x128xf32>
    %cst_321 = arith.constant 5.000000e-01 : f32
    %613 = vector.broadcast %cst_321 : f32 to vector<16x128xf32>
    %614 = arith.mulf %613, %612 : vector<16x128xf32>
    %615 = math.tanh %614 : vector<16x128xf32>
    %cst_322 = arith.constant 1.000000e+00 : f32
    %616 = vector.broadcast %cst_322 : f32 to vector<16x128xf32>
    %617 = arith.addf %615, %616 : vector<16x128xf32>
    %cst_323 = arith.constant 5.000000e-01 : f32
    %618 = vector.broadcast %cst_323 : f32 to vector<16x128xf32>
    %619 = arith.mulf %618, %617 : vector<16x128xf32>
    %620 = arith.mulf %609, %593 : vector<16x128xf32>
    %621 = arith.mulf %601, %611 : vector<16x128xf32>
    %622 = arith.addf %620, %621 : vector<16x128xf32>
    %623 = math.tanh %622 : vector<16x128xf32>
    %624 = arith.mulf %619, %623 : vector<16x128xf32>
    %c0_324 = arith.constant 0 : index
    %c0_325 = arith.constant 0 : index
    %625 = vector.load %arg12[%c0_324, %c0_325] : memref<16x128xf32, #tpu.memory_space<vmem>>, vector<16x128xf32>
    tpu.vector_store %arg12[%c0_324, %c0_325], %622 {strides = array<i32>} : memref<16x128xf32, #tpu.memory_space<vmem>>, vector<16x128xf32>,
    %626 = arith.truncf %624 : vector<16x128xf32> to vector<16x128xbf16>
    %c0_326 = arith.constant 0 : index
    %c0_327 = arith.constant 0 : index
    %627 = vector.load %arg11[%c0_326, %c0_327] : memref<16x128xbf16, #tpu.memory_space<vmem>>, vector<16x128xbf16>
    tpu.vector_store %arg11[%c0_326, %c0_327], %626 {strides = array<i32>} : memref<16x128xbf16, #tpu.memory_space<vmem>>, vector<16x128xbf16>,
    %628 = arith.truncf %624 : vector<16x128xf32> to vector<16x128xbf16>
    %629 = arith.index_cast %586 : i32 to index
    %c0_328 = arith.constant 0 : index
    %630 = vector.load %arg8[%629, %c0_328] : memref<128x128xbf16, #tpu.memory_space<vmem>>, vector<16x128xbf16>
    tpu.vector_store %arg8[%629, %c0_328], %628 {strides = array<i32>} : memref<128x128xbf16, #tpu.memory_space<vmem>>, vector<16x128xbf16>,
    %c5_i32_329 = arith.constant 5 : i32
    %c16_i32_330 = arith.constant 16 : i32
    %631 = arith.muli %c5_i32_329, %c16_i32_330 : i32
    %632 = tpu.assume_multiple %631, 16 : i32
    %633 = arith.index_cast %632 : i32 to index
    %c0_331 = arith.constant 0 : index
    %634 = vector.load %arg15[%633, %c0_331] : memref<128x512xf32, #tpu.memory_space<vmem>>, vector<16x512xf32>
    %c0_332 = arith.constant 0 : index
    %c0_333 = arith.constant 0 : index
    %635 = vector.load %arg11[%c0_332, %c0_333] : memref<16x128xbf16, #tpu.memory_space<vmem>>, vector<16x128xbf16>
    %c0_334 = arith.constant 0 : index
    %c0_335 = arith.constant 0 : index
    %636 = vector.load %arg6[%c0_334, %c0_335] : memref<128x512xbf16, #tpu.memory_space<vmem>>, vector<128x512xbf16>
    %cst_336 = arith.constant dense<0.000000e+00> : vector<16x512xf32>
    %637 = tpu.matmul %635, %636, %cst_336 {dimension_numbers = #tpu.dot_dimension_numbers<[1], [0], [0], [1], [0, 0, 1, 1], [], []>} : vector<16x128xbf16>, vector<128x512xbf16>, vector<16x512xf32> -> vector<16x512xf32>
    %638 = arith.addf %634, %637 : vector<16x512xf32>
    %c0_337 = arith.constant 0 : index
    %c0_338 = arith.constant 0 : index
    %639 = vector.load %arg12[%c0_337, %c0_338] : memref<16x128xf32, #tpu.memory_space<vmem>>, vector<16x128xf32>
    %640 = vector.extract_strided_slice %638 {offsets = [0, 0], sizes = [16, 128], strides = [1, 1]} : vector<16x512xf32> to vector<16x128xf32>
    %cst_339 = arith.constant 5.000000e-01 : f32
    %641 = vector.broadcast %cst_339 : f32 to vector<16x128xf32>
    %642 = arith.mulf %641, %640 : vector<16x128xf32>
    %643 = math.tanh %642 : vector<16x128xf32>
    %cst_340 = arith.constant 1.000000e+00 : f32
    %644 = vector.broadcast %cst_340 : f32 to vector<16x128xf32>
    %645 = arith.addf %643, %644 : vector<16x128xf32>
    %cst_341 = arith.constant 5.000000e-01 : f32
    %646 = vector.broadcast %cst_341 : f32 to vector<16x128xf32>
    %647 = arith.mulf %646, %645 : vector<16x128xf32>
    %648 = vector.extract_strided_slice %638 {offsets = [0, 128], sizes = [16, 128], strides = [1, 1]} : vector<16x512xf32> to vector<16x128xf32>
    %cst_342 = arith.constant 5.000000e-01 : f32
    %649 = vector.broadcast %cst_342 : f32 to vector<16x128xf32>
    %650 = arith.mulf %649, %648 : vector<16x128xf32>
    %651 = math.tanh %650 : vector<16x128xf32>
    %cst_343 = arith.constant 1.000000e+00 : f32
    %652 = vector.broadcast %cst_343 : f32 to vector<16x128xf32>
    %653 = arith.addf %651, %652 : vector<16x128xf32>
    %cst_344 = arith.constant 5.000000e-01 : f32
    %654 = vector.broadcast %cst_344 : f32 to vector<16x128xf32>
    %655 = arith.mulf %654, %653 : vector<16x128xf32>
    %656 = vector.extract_strided_slice %638 {offsets = [0, 256], sizes = [16, 128], strides = [1, 1]} : vector<16x512xf32> to vector<16x128xf32>
    %657 = math.tanh %656 : vector<16x128xf32>
    %658 = vector.extract_strided_slice %638 {offsets = [0, 384], sizes = [16, 128], strides = [1, 1]} : vector<16x512xf32> to vector<16x128xf32>
    %cst_345 = arith.constant 5.000000e-01 : f32
    %659 = vector.broadcast %cst_345 : f32 to vector<16x128xf32>
    %660 = arith.mulf %659, %658 : vector<16x128xf32>
    %661 = math.tanh %660 : vector<16x128xf32>
    %cst_346 = arith.constant 1.000000e+00 : f32
    %662 = vector.broadcast %cst_346 : f32 to vector<16x128xf32>
    %663 = arith.addf %661, %662 : vector<16x128xf32>
    %cst_347 = arith.constant 5.000000e-01 : f32
    %664 = vector.broadcast %cst_347 : f32 to vector<16x128xf32>
    %665 = arith.mulf %664, %663 : vector<16x128xf32>
    %666 = arith.mulf %655, %639 : vector<16x128xf32>
    %667 = arith.mulf %647, %657 : vector<16x128xf32>
    %668 = arith.addf %666, %667 : vector<16x128xf32>
    %669 = math.tanh %668 : vector<16x128xf32>
    %670 = arith.mulf %665, %669 : vector<16x128xf32>
    %c0_348 = arith.constant 0 : index
    %c0_349 = arith.constant 0 : index
    %671 = vector.load %arg12[%c0_348, %c0_349] : memref<16x128xf32, #tpu.memory_space<vmem>>, vector<16x128xf32>
    tpu.vector_store %arg12[%c0_348, %c0_349], %668 {strides = array<i32>} : memref<16x128xf32, #tpu.memory_space<vmem>>, vector<16x128xf32>,
    %672 = arith.truncf %670 : vector<16x128xf32> to vector<16x128xbf16>
    %c0_350 = arith.constant 0 : index
    %c0_351 = arith.constant 0 : index
    %673 = vector.load %arg11[%c0_350, %c0_351] : memref<16x128xbf16, #tpu.memory_space<vmem>>, vector<16x128xbf16>
    tpu.vector_store %arg11[%c0_350, %c0_351], %672 {strides = array<i32>} : memref<16x128xbf16, #tpu.memory_space<vmem>>, vector<16x128xbf16>,
    %674 = arith.truncf %670 : vector<16x128xf32> to vector<16x128xbf16>
    %675 = arith.index_cast %632 : i32 to index
    %c0_352 = arith.constant 0 : index
    %676 = vector.load %arg8[%675, %c0_352] : memref<128x128xbf16, #tpu.memory_space<vmem>>, vector<16x128xbf16>
    tpu.vector_store %arg8[%675, %c0_352], %674 {strides = array<i32>} : memref<128x128xbf16, #tpu.memory_space<vmem>>, vector<16x128xbf16>,
    %c6_i32_353 = arith.constant 6 : i32
    %c16_i32_354 = arith.constant 16 : i32
    %677 = arith.muli %c6_i32_353, %c16_i32_354 : i32
    %678 = tpu.assume_multiple %677, 16 : i32
    %679 = arith.index_cast %678 : i32 to index
    %c0_355 = arith.constant 0 : index
    %680 = vector.load %arg15[%679, %c0_355] : memref<128x512xf32, #tpu.memory_space<vmem>>, vector<16x512xf32>
    %c0_356 = arith.constant 0 : index
    %c0_357 = arith.constant 0 : index
    %681 = vector.load %arg11[%c0_356, %c0_357] : memref<16x128xbf16, #tpu.memory_space<vmem>>, vector<16x128xbf16>
    %c0_358 = arith.constant 0 : index
    %c0_359 = arith.constant 0 : index
    %682 = vector.load %arg6[%c0_358, %c0_359] : memref<128x512xbf16, #tpu.memory_space<vmem>>, vector<128x512xbf16>
    %cst_360 = arith.constant dense<0.000000e+00> : vector<16x512xf32>
    %683 = tpu.matmul %681, %682, %cst_360 {dimension_numbers = #tpu.dot_dimension_numbers<[1], [0], [0], [1], [0, 0, 1, 1], [], []>} : vector<16x128xbf16>, vector<128x512xbf16>, vector<16x512xf32> -> vector<16x512xf32>
    %684 = arith.addf %680, %683 : vector<16x512xf32>
    %c0_361 = arith.constant 0 : index
    %c0_362 = arith.constant 0 : index
    %685 = vector.load %arg12[%c0_361, %c0_362] : memref<16x128xf32, #tpu.memory_space<vmem>>, vector<16x128xf32>
    %686 = vector.extract_strided_slice %684 {offsets = [0, 0], sizes = [16, 128], strides = [1, 1]} : vector<16x512xf32> to vector<16x128xf32>
    %cst_363 = arith.constant 5.000000e-01 : f32
    %687 = vector.broadcast %cst_363 : f32 to vector<16x128xf32>
    %688 = arith.mulf %687, %686 : vector<16x128xf32>
    %689 = math.tanh %688 : vector<16x128xf32>
    %cst_364 = arith.constant 1.000000e+00 : f32
    %690 = vector.broadcast %cst_364 : f32 to vector<16x128xf32>
    %691 = arith.addf %689, %690 : vector<16x128xf32>
    %cst_365 = arith.constant 5.000000e-01 : f32
    %692 = vector.broadcast %cst_365 : f32 to vector<16x128xf32>
    %693 = arith.mulf %692, %691 : vector<16x128xf32>
    %694 = vector.extract_strided_slice %684 {offsets = [0, 128], sizes = [16, 128], strides = [1, 1]} : vector<16x512xf32> to vector<16x128xf32>
    %cst_366 = arith.constant 5.000000e-01 : f32
    %695 = vector.broadcast %cst_366 : f32 to vector<16x128xf32>
    %696 = arith.mulf %695, %694 : vector<16x128xf32>
    %697 = math.tanh %696 : vector<16x128xf32>
    %cst_367 = arith.constant 1.000000e+00 : f32
    %698 = vector.broadcast %cst_367 : f32 to vector<16x128xf32>
    %699 = arith.addf %697, %698 : vector<16x128xf32>
    %cst_368 = arith.constant 5.000000e-01 : f32
    %700 = vector.broadcast %cst_368 : f32 to vector<16x128xf32>
    %701 = arith.mulf %700, %699 : vector<16x128xf32>
    %702 = vector.extract_strided_slice %684 {offsets = [0, 256], sizes = [16, 128], strides = [1, 1]} : vector<16x512xf32> to vector<16x128xf32>
    %703 = math.tanh %702 : vector<16x128xf32>
    %704 = vector.extract_strided_slice %684 {offsets = [0, 384], sizes = [16, 128], strides = [1, 1]} : vector<16x512xf32> to vector<16x128xf32>
    %cst_369 = arith.constant 5.000000e-01 : f32
    %705 = vector.broadcast %cst_369 : f32 to vector<16x128xf32>
    %706 = arith.mulf %705, %704 : vector<16x128xf32>
    %707 = math.tanh %706 : vector<16x128xf32>
    %cst_370 = arith.constant 1.000000e+00 : f32
    %708 = vector.broadcast %cst_370 : f32 to vector<16x128xf32>
    %709 = arith.addf %707, %708 : vector<16x128xf32>
    %cst_371 = arith.constant 5.000000e-01 : f32
    %710 = vector.broadcast %cst_371 : f32 to vector<16x128xf32>
    %711 = arith.mulf %710, %709 : vector<16x128xf32>
    %712 = arith.mulf %701, %685 : vector<16x128xf32>
    %713 = arith.mulf %693, %703 : vector<16x128xf32>
    %714 = arith.addf %712, %713 : vector<16x128xf32>
    %715 = math.tanh %714 : vector<16x128xf32>
    %716 = arith.mulf %711, %715 : vector<16x128xf32>
    %c0_372 = arith.constant 0 : index
    %c0_373 = arith.constant 0 : index
    %717 = vector.load %arg12[%c0_372, %c0_373] : memref<16x128xf32, #tpu.memory_space<vmem>>, vector<16x128xf32>
    tpu.vector_store %arg12[%c0_372, %c0_373], %714 {strides = array<i32>} : memref<16x128xf32, #tpu.memory_space<vmem>>, vector<16x128xf32>,
    %718 = arith.truncf %716 : vector<16x128xf32> to vector<16x128xbf16>
    %c0_374 = arith.constant 0 : index
    %c0_375 = arith.constant 0 : index
    %719 = vector.load %arg11[%c0_374, %c0_375] : memref<16x128xbf16, #tpu.memory_space<vmem>>, vector<16x128xbf16>
    tpu.vector_store %arg11[%c0_374, %c0_375], %718 {strides = array<i32>} : memref<16x128xbf16, #tpu.memory_space<vmem>>, vector<16x128xbf16>,
    %720 = arith.truncf %716 : vector<16x128xf32> to vector<16x128xbf16>
    %721 = arith.index_cast %678 : i32 to index
    %c0_376 = arith.constant 0 : index
    %722 = vector.load %arg8[%721, %c0_376] : memref<128x128xbf16, #tpu.memory_space<vmem>>, vector<16x128xbf16>
    tpu.vector_store %arg8[%721, %c0_376], %720 {strides = array<i32>} : memref<128x128xbf16, #tpu.memory_space<vmem>>, vector<16x128xbf16>,
    %c7_i32_377 = arith.constant 7 : i32
    %c16_i32_378 = arith.constant 16 : i32
    %723 = arith.muli %c7_i32_377, %c16_i32_378 : i32
    %724 = tpu.assume_multiple %723, 16 : i32
    %725 = arith.index_cast %724 : i32 to index
    %c0_379 = arith.constant 0 : index
    %726 = vector.load %arg15[%725, %c0_379] : memref<128x512xf32, #tpu.memory_space<vmem>>, vector<16x512xf32>
    %c0_380 = arith.constant 0 : index
    %c0_381 = arith.constant 0 : index
    %727 = vector.load %arg11[%c0_380, %c0_381] : memref<16x128xbf16, #tpu.memory_space<vmem>>, vector<16x128xbf16>
    %c0_382 = arith.constant 0 : index
    %c0_383 = arith.constant 0 : index
    %728 = vector.load %arg6[%c0_382, %c0_383] : memref<128x512xbf16, #tpu.memory_space<vmem>>, vector<128x512xbf16>
    %cst_384 = arith.constant dense<0.000000e+00> : vector<16x512xf32>
    %729 = tpu.matmul %727, %728, %cst_384 {dimension_numbers = #tpu.dot_dimension_numbers<[1], [0], [0], [1], [0, 0, 1, 1], [], []>} : vector<16x128xbf16>, vector<128x512xbf16>, vector<16x512xf32> -> vector<16x512xf32>
    %730 = arith.addf %726, %729 : vector<16x512xf32>
    %c0_385 = arith.constant 0 : index
    %c0_386 = arith.constant 0 : index
    %731 = vector.load %arg12[%c0_385, %c0_386] : memref<16x128xf32, #tpu.memory_space<vmem>>, vector<16x128xf32>
    %732 = vector.extract_strided_slice %730 {offsets = [0, 0], sizes = [16, 128], strides = [1, 1]} : vector<16x512xf32> to vector<16x128xf32>
    %cst_387 = arith.constant 5.000000e-01 : f32
    %733 = vector.broadcast %cst_387 : f32 to vector<16x128xf32>
    %734 = arith.mulf %733, %732 : vector<16x128xf32>
    %735 = math.tanh %734 : vector<16x128xf32>
    %cst_388 = arith.constant 1.000000e+00 : f32
    %736 = vector.broadcast %cst_388 : f32 to vector<16x128xf32>
    %737 = arith.addf %735, %736 : vector<16x128xf32>
    %cst_389 = arith.constant 5.000000e-01 : f32
    %738 = vector.broadcast %cst_389 : f32 to vector<16x128xf32>
    %739 = arith.mulf %738, %737 : vector<16x128xf32>
    %740 = vector.extract_strided_slice %730 {offsets = [0, 128], sizes = [16, 128], strides = [1, 1]} : vector<16x512xf32> to vector<16x128xf32>
    %cst_390 = arith.constant 5.000000e-01 : f32
    %741 = vector.broadcast %cst_390 : f32 to vector<16x128xf32>
    %742 = arith.mulf %741, %740 : vector<16x128xf32>
    %743 = math.tanh %742 : vector<16x128xf32>
    %cst_391 = arith.constant 1.000000e+00 : f32
    %744 = vector.broadcast %cst_391 : f32 to vector<16x128xf32>
    %745 = arith.addf %743, %744 : vector<16x128xf32>
    %cst_392 = arith.constant 5.000000e-01 : f32
    %746 = vector.broadcast %cst_392 : f32 to vector<16x128xf32>
    %747 = arith.mulf %746, %745 : vector<16x128xf32>
    %748 = vector.extract_strided_slice %730 {offsets = [0, 256], sizes = [16, 128], strides = [1, 1]} : vector<16x512xf32> to vector<16x128xf32>
    %749 = math.tanh %748 : vector<16x128xf32>
    %750 = vector.extract_strided_slice %730 {offsets = [0, 384], sizes = [16, 128], strides = [1, 1]} : vector<16x512xf32> to vector<16x128xf32>
    %cst_393 = arith.constant 5.000000e-01 : f32
    %751 = vector.broadcast %cst_393 : f32 to vector<16x128xf32>
    %752 = arith.mulf %751, %750 : vector<16x128xf32>
    %753 = math.tanh %752 : vector<16x128xf32>
    %cst_394 = arith.constant 1.000000e+00 : f32
    %754 = vector.broadcast %cst_394 : f32 to vector<16x128xf32>
    %755 = arith.addf %753, %754 : vector<16x128xf32>
    %cst_395 = arith.constant 5.000000e-01 : f32
    %756 = vector.broadcast %cst_395 : f32 to vector<16x128xf32>
    %757 = arith.mulf %756, %755 : vector<16x128xf32>
    %758 = arith.mulf %747, %731 : vector<16x128xf32>
    %759 = arith.mulf %739, %749 : vector<16x128xf32>
    %760 = arith.addf %758, %759 : vector<16x128xf32>
    %761 = math.tanh %760 : vector<16x128xf32>
    %762 = arith.mulf %757, %761 : vector<16x128xf32>
    %c0_396 = arith.constant 0 : index
    %c0_397 = arith.constant 0 : index
    %763 = vector.load %arg12[%c0_396, %c0_397] : memref<16x128xf32, #tpu.memory_space<vmem>>, vector<16x128xf32>
    tpu.vector_store %arg12[%c0_396, %c0_397], %760 {strides = array<i32>} : memref<16x128xf32, #tpu.memory_space<vmem>>, vector<16x128xf32>,
    %764 = arith.truncf %762 : vector<16x128xf32> to vector<16x128xbf16>
    %c0_398 = arith.constant 0 : index
    %c0_399 = arith.constant 0 : index
    %765 = vector.load %arg11[%c0_398, %c0_399] : memref<16x128xbf16, #tpu.memory_space<vmem>>, vector<16x128xbf16>
    tpu.vector_store %arg11[%c0_398, %c0_399], %764 {strides = array<i32>} : memref<16x128xbf16, #tpu.memory_space<vmem>>, vector<16x128xbf16>,
    %766 = arith.truncf %762 : vector<16x128xf32> to vector<16x128xbf16>
    %767 = arith.index_cast %724 : i32 to index
    %c0_400 = arith.constant 0 : index
    %768 = vector.load %arg8[%767, %c0_400] : memref<128x128xbf16, #tpu.memory_space<vmem>>, vector<16x128xbf16>
    tpu.vector_store %arg8[%767, %c0_400], %766 {strides = array<i32>} : memref<128x128xbf16, #tpu.memory_space<vmem>>, vector<16x128xbf16>,
    %c8_i32_401 = arith.constant 8 : i32
    return
  }
  func.func @transform_0(%arg0: i32) -> (i32, i32) {
    %c0_i32 = arith.constant 0 : i32
    %c0_i32_0 = arith.constant 0 : i32
    return %arg0, %c0_i32 : i32, i32
  }
  func.func @transform_1(%arg0: i32) -> (i32, i32) {
    %c0_i32 = arith.constant 0 : i32
    %c0_i32_0 = arith.constant 0 : i32
    %c0_i32_1 = arith.constant 0 : i32
    return %c0_i32, %c0_i32_0 : i32, i32
  }
  func.func @transform_2(%arg0: i32) -> (i32, i32) {
    %c0_i32 = arith.constant 0 : i32
    %c0_i32_0 = arith.constant 0 : i32
    %c0_i32_1 = arith.constant 0 : i32
    return %c0_i32, %c0_i32_0 : i32, i32
  }
  func.func @transform_3(%arg0: i32) -> (i32, i32) {
    %c0_i32 = arith.constant 0 : i32
    %c0_i32_0 = arith.constant 0 : i32
    %c0_i32_1 = arith.constant 0 : i32
    return %c0_i32, %c0_i32_0 : i32, i32
  }
  func.func @transform_4(%arg0: i32) -> (i32, i32) {
    %c0_i32 = arith.constant 0 : i32
    %c0_i32_0 = arith.constant 0 : i32
    %c0_i32_1 = arith.constant 0 : i32
    return %c0_i32, %c0_i32_0 : i32, i32
  }
  func.func @transform_5(%arg0: i32) -> (i32, i32) {
    %c0_i32 = arith.constant 0 : i32
    %c0_i32_0 = arith.constant 0 : i32
    %c0_i32_1 = arith.constant 0 : i32
    return %c0_i32, %c0_i32_0 : i32, i32
  }
  func.func @transform_6(%arg0: i32) -> (i32, i32) {
    %c0_i32 = arith.constant 0 : i32
    %c0_i32_0 = arith.constant 0 : i32
    %c0_i32_1 = arith.constant 0 : i32
    return %c0_i32, %c0_i32_0 : i32, i32
  }
  func.func @transform_7(%arg0: i32) -> (i32, i32) {
    %c0_i32 = arith.constant 0 : i32
    %c0_i32_0 = arith.constant 0 : i32
    return %arg0, %c0_i32 : i32, i32
  }
}

module attributes {stable_mosaic.version = 11 : i64} {
  func.func @_mlp4_kernel(%arg0: i32, %arg1: memref<16x128xbf16, #tpu.memory_space<vmem>>, %arg2: memref<128x128xbf16, #tpu.memory_space<vmem>>, %arg3: memref<1x128xf32, #tpu.memory_space<vmem>>, %arg4: memref<128x128xbf16, #tpu.memory_space<vmem>>, %arg5: memref<1x128xf32, #tpu.memory_space<vmem>>, %arg6: memref<128x128xbf16, #tpu.memory_space<vmem>>, %arg7: memref<1x128xf32, #tpu.memory_space<vmem>>, %arg8: memref<128x128xbf16, #tpu.memory_space<vmem>>, %arg9: memref<1x128xf32, #tpu.memory_space<vmem>>, %arg10: memref<16x128xf32, #tpu.memory_space<vmem>>, %arg11: memref<16x128xbf16, #tpu.memory_space<vmem>>) attributes {dimension_semantics = [#tpu.dimension_semantics<parallel>], iteration_bounds = array<i64: 1>, scalar_prefetch = 0 : i64, scratch_operands = 0 : i64, tpu.core_type = #tpu.core_type<tc>, window_params = [{transform_indices = @transform_0, window_bounds = array<i64: 16, 128>}, {pipeline_mode = #tpu.pipeline_mode<synchronous>, transform_indices = @transform_1, window_bounds = array<i64: 128, 128>}, {pipeline_mode = #tpu.pipeline_mode<synchronous>, transform_indices = @transform_2, window_bounds = array<i64: 1, 128>}, {pipeline_mode = #tpu.pipeline_mode<synchronous>, transform_indices = @transform_3, window_bounds = array<i64: 128, 128>}, {pipeline_mode = #tpu.pipeline_mode<synchronous>, transform_indices = @transform_4, window_bounds = array<i64: 1, 128>}, {pipeline_mode = #tpu.pipeline_mode<synchronous>, transform_indices = @transform_5, window_bounds = array<i64: 128, 128>}, {pipeline_mode = #tpu.pipeline_mode<synchronous>, transform_indices = @transform_6, window_bounds = array<i64: 1, 128>}, {pipeline_mode = #tpu.pipeline_mode<synchronous>, transform_indices = @transform_7, window_bounds = array<i64: 128, 128>}, {pipeline_mode = #tpu.pipeline_mode<synchronous>, transform_indices = @transform_8, window_bounds = array<i64: 1, 128>}, {transform_indices = @transform_9, window_bounds = array<i64: 16, 128>}, {transform_indices = @transform_10, window_bounds = array<i64: 16, 128>}]} {
    %c0 = arith.constant 0 : index
    %c0_0 = arith.constant 0 : index
    %0 = vector.load %arg1[%c0, %c0_0] : memref<16x128xbf16, #tpu.memory_space<vmem>>, vector<16x128xbf16>
    %c0_1 = arith.constant 0 : index
    %c0_2 = arith.constant 0 : index
    %1 = vector.load %arg2[%c0_1, %c0_2] : memref<128x128xbf16, #tpu.memory_space<vmem>>, vector<128x128xbf16>
    %cst = arith.constant dense<0.000000e+00> : vector<16x128xf32>
    %2 = tpu.matmul %0, %1, %cst {dimension_numbers = #tpu.dot_dimension_numbers<[1], [0], [0], [1], [0, 0, 1, 1], [], []>} : vector<16x128xbf16>, vector<128x128xbf16>, vector<16x128xf32> -> vector<16x128xf32>
    %c0_3 = arith.constant 0 : index
    %c0_4 = arith.constant 0 : index
    %3 = vector.load %arg3[%c0_3, %c0_4] : memref<1x128xf32, #tpu.memory_space<vmem>>, vector<1x128xf32>
    %4 = vector.broadcast %3 : vector<1x128xf32> to vector<16x128xf32>
    %5 = arith.addf %2, %4 : vector<16x128xf32>
    %cst_5 = arith.constant 0.000000e+00 : f32
    %6 = vector.broadcast %cst_5 : f32 to vector<16x128xf32>
    %7 = arith.maximumf %5, %6 : vector<16x128xf32>
    %8 = arith.truncf %7 : vector<16x128xf32> to vector<16x128xbf16>
    %c0_6 = arith.constant 0 : index
    %c0_7 = arith.constant 0 : index
    %9 = vector.load %arg4[%c0_6, %c0_7] : memref<128x128xbf16, #tpu.memory_space<vmem>>, vector<128x128xbf16>
    %cst_8 = arith.constant dense<0.000000e+00> : vector<16x128xf32>
    %10 = tpu.matmul %8, %9, %cst_8 {dimension_numbers = #tpu.dot_dimension_numbers<[1], [0], [0], [1], [0, 0, 1, 1], [], []>} : vector<16x128xbf16>, vector<128x128xbf16>, vector<16x128xf32> -> vector<16x128xf32>
    %c0_9 = arith.constant 0 : index
    %c0_10 = arith.constant 0 : index
    %11 = vector.load %arg5[%c0_9, %c0_10] : memref<1x128xf32, #tpu.memory_space<vmem>>, vector<1x128xf32>
    %12 = vector.broadcast %11 : vector<1x128xf32> to vector<16x128xf32>
    %13 = arith.addf %10, %12 : vector<16x128xf32>
    %cst_11 = arith.constant 0.000000e+00 : f32
    %14 = vector.broadcast %cst_11 : f32 to vector<16x128xf32>
    %15 = arith.maximumf %13, %14 : vector<16x128xf32>
    %cst_12 = arith.constant 5.000000e-01 : f32
    %16 = vector.broadcast %cst_12 : f32 to vector<16x128xf32>
    %17 = arith.mulf %16, %15 : vector<16x128xf32>
    %18 = math.tanh %17 : vector<16x128xf32>
    %cst_13 = arith.constant 1.000000e+00 : f32
    %19 = vector.broadcast %cst_13 : f32 to vector<16x128xf32>
    %20 = arith.addf %18, %19 : vector<16x128xf32>
    %cst_14 = arith.constant 5.000000e-01 : f32
    %21 = vector.broadcast %cst_14 : f32 to vector<16x128xf32>
    %22 = arith.mulf %21, %20 : vector<16x128xf32>
    %23 = tpu.iota {dimensions = array<i32: 1>} : vector<16x128xi32>
    %c16_i32 = arith.constant 16 : i32
    %24 = vector.broadcast %c16_i32 : i32 to vector<16x128xi32>
    %25 = arith.cmpi slt, %23, %24 : vector<16x128xi32>
    %cst_15 = arith.constant 0.000000e+00 : f32
    %26 = vector.broadcast %cst_15 : f32 to vector<16x128xf32>
    %27 = arith.select %25, %22, %26 : vector<16x128xi1>, vector<16x128xf32>
    %c0_16 = arith.constant 0 : index
    %c0_17 = arith.constant 0 : index
    %28 = vector.load %arg10[%c0_16, %c0_17] : memref<16x128xf32, #tpu.memory_space<vmem>>, vector<16x128xf32>
    tpu.vector_store %arg10[%c0_16, %c0_17], %27 {strides = array<i32>} : memref<16x128xf32, #tpu.memory_space<vmem>>, vector<16x128xf32>,
    %29 = arith.truncf %27 : vector<16x128xf32> to vector<16x128xbf16>
    %c0_18 = arith.constant 0 : index
    %c0_19 = arith.constant 0 : index
    %30 = vector.load %arg6[%c0_18, %c0_19] : memref<128x128xbf16, #tpu.memory_space<vmem>>, vector<128x128xbf16>
    %cst_20 = arith.constant dense<0.000000e+00> : vector<16x128xf32>
    %31 = tpu.matmul %29, %30, %cst_20 {dimension_numbers = #tpu.dot_dimension_numbers<[1], [0], [0], [1], [0, 0, 1, 1], [], []>} : vector<16x128xbf16>, vector<128x128xbf16>, vector<16x128xf32> -> vector<16x128xf32>
    %c0_21 = arith.constant 0 : index
    %c0_22 = arith.constant 0 : index
    %32 = vector.load %arg7[%c0_21, %c0_22] : memref<1x128xf32, #tpu.memory_space<vmem>>, vector<1x128xf32>
    %33 = vector.broadcast %32 : vector<1x128xf32> to vector<16x128xf32>
    %34 = arith.addf %31, %33 : vector<16x128xf32>
    %cst_23 = arith.constant 0.000000e+00 : f32
    %35 = vector.broadcast %cst_23 : f32 to vector<16x128xf32>
    %36 = arith.maximumf %34, %35 : vector<16x128xf32>
    %37 = arith.truncf %36 : vector<16x128xf32> to vector<16x128xbf16>
    %c0_24 = arith.constant 0 : index
    %c0_25 = arith.constant 0 : index
    %38 = vector.load %arg8[%c0_24, %c0_25] : memref<128x128xbf16, #tpu.memory_space<vmem>>, vector<128x128xbf16>
    %cst_26 = arith.constant dense<0.000000e+00> : vector<16x128xf32>
    %39 = tpu.matmul %37, %38, %cst_26 {dimension_numbers = #tpu.dot_dimension_numbers<[1], [0], [0], [1], [0, 0, 1, 1], [], []>} : vector<16x128xbf16>, vector<128x128xbf16>, vector<16x128xf32> -> vector<16x128xf32>
    %c0_27 = arith.constant 0 : index
    %c0_28 = arith.constant 0 : index
    %40 = vector.load %arg9[%c0_27, %c0_28] : memref<1x128xf32, #tpu.memory_space<vmem>>, vector<1x128xf32>
    %41 = vector.broadcast %40 : vector<1x128xf32> to vector<16x128xf32>
    %42 = arith.addf %39, %41 : vector<16x128xf32>
    %cst_29 = arith.constant 0.000000e+00 : f32
    %43 = vector.broadcast %cst_29 : f32 to vector<16x128xf32>
    %44 = arith.maximumf %42, %43 : vector<16x128xf32>
    %45 = arith.truncf %44 : vector<16x128xf32> to vector<16x128xbf16>
    %c0_30 = arith.constant 0 : index
    %c0_31 = arith.constant 0 : index
    %46 = vector.load %arg11[%c0_30, %c0_31] : memref<16x128xbf16, #tpu.memory_space<vmem>>, vector<16x128xbf16>
    tpu.vector_store %arg11[%c0_30, %c0_31], %45 {strides = array<i32>} : memref<16x128xbf16, #tpu.memory_space<vmem>>, vector<16x128xbf16>,
    return
  }
  func.func @transform_0(%arg0: i32) -> (i32, i32) {
    %c0_i32 = arith.constant 0 : i32
    %c0_i32_0 = arith.constant 0 : i32
    return %arg0, %c0_i32 : i32, i32
  }
  func.func @transform_1(%arg0: i32) -> (i32, i32) {
    %c0_i32 = arith.constant 0 : i32
    %c0_i32_0 = arith.constant 0 : i32
    %c0_i32_1 = arith.constant 0 : i32
    return %c0_i32, %c0_i32_0 : i32, i32
  }
  func.func @transform_2(%arg0: i32) -> (i32, i32) {
    %c0_i32 = arith.constant 0 : i32
    %c0_i32_0 = arith.constant 0 : i32
    %c0_i32_1 = arith.constant 0 : i32
    return %c0_i32, %c0_i32_0 : i32, i32
  }
  func.func @transform_3(%arg0: i32) -> (i32, i32) {
    %c0_i32 = arith.constant 0 : i32
    %c0_i32_0 = arith.constant 0 : i32
    %c0_i32_1 = arith.constant 0 : i32
    return %c0_i32, %c0_i32_0 : i32, i32
  }
  func.func @transform_4(%arg0: i32) -> (i32, i32) {
    %c0_i32 = arith.constant 0 : i32
    %c0_i32_0 = arith.constant 0 : i32
    %c0_i32_1 = arith.constant 0 : i32
    return %c0_i32, %c0_i32_0 : i32, i32
  }
  func.func @transform_5(%arg0: i32) -> (i32, i32) {
    %c0_i32 = arith.constant 0 : i32
    %c0_i32_0 = arith.constant 0 : i32
    %c0_i32_1 = arith.constant 0 : i32
    return %c0_i32, %c0_i32_0 : i32, i32
  }
  func.func @transform_6(%arg0: i32) -> (i32, i32) {
    %c0_i32 = arith.constant 0 : i32
    %c0_i32_0 = arith.constant 0 : i32
    %c0_i32_1 = arith.constant 0 : i32
    return %c0_i32, %c0_i32_0 : i32, i32
  }
  func.func @transform_7(%arg0: i32) -> (i32, i32) {
    %c0_i32 = arith.constant 0 : i32
    %c0_i32_0 = arith.constant 0 : i32
    %c0_i32_1 = arith.constant 0 : i32
    return %c0_i32, %c0_i32_0 : i32, i32
  }
  func.func @transform_8(%arg0: i32) -> (i32, i32) {
    %c0_i32 = arith.constant 0 : i32
    %c0_i32_0 = arith.constant 0 : i32
    %c0_i32_1 = arith.constant 0 : i32
    return %c0_i32, %c0_i32_0 : i32, i32
  }
  func.func @transform_9(%arg0: i32) -> (i32, i32) {
    %c0_i32 = arith.constant 0 : i32
    %c0_i32_0 = arith.constant 0 : i32
    return %arg0, %c0_i32 : i32, i32
  }
  func.func @transform_10(%arg0: i32) -> (i32, i32) {
    %c0_i32 = arith.constant 0 : i32
    %c0_i32_0 = arith.constant 0 : i32
    return %arg0, %c0_i32 : i32, i32
  }
}

</mosaic_0001>

<bundles_post_ra>
// kernel: svs_vae_forward.4
= control target key start
LH: loop header
LB: loop body
LE: loop exit
PB: predicated region body
PF: predicated region fallthrough
CT: control target
= control target key end

     0   :  { %v739_v0 = vmov 0.0   ;;  %vm740_vm0 = vmmov 0   ;;  %v280_v52 = vlaneseq  ;;  %s956_s1 = inlined_call_operand.vmem [shape: bf16[128,128], index: 1, kind: input, shape index: {}]   ;;  %s957_s3 = inlined_call_operand.vmem [shape: bf16[128,128], index: 3, kind: input, shape index: {}]   ;;  %s958_s0 = inlined_call_operand.vmem [shape: bf16[16,128], index: 0, kind: input, shape index: {}]   ;;  %s959_s2 = inlined_call_operand.vmem [shape: f32[1,128], index: 2, kind: input, shape index: {}]   ;;  %s960_s5 = inlined_call_operand.vmem [shape: bf16[128,128], index: 5, kind: input, shape index: {}]   ;;  %s961_s7 = inlined_call_operand.vmem [shape: bf16[128,128], index: 7, kind: input, shape index: {}]   ;;  %s962_s4 = inlined_call_operand.vmem [shape: f32[1,128], index: 4, kind: input, shape index: {}]   ;;  %s963_s9 = inlined_call_operand.vmem [shape: f32[16,128], index: 9, kind: output, shape index: {0}]   ;;  %s964_s6 = inlined_call_operand.vmem [shape: f32[1,128], index: 6, kind: input, shape index: {}]   ;;  %s965_s8 = inlined_call_operand.vmem [shape: f32[1,128], index: 8, kind: input, shape index: {}]   ;;  %s966_s10 = inlined_call_operand.vmem [shape: bf16[16,128], index: 10, kind: output, shape index: {1}]  }
   0x1   :  { %620 = vmatprep.subr.bf16.mxu0 %v739_v0  ;;  %v702_v1 = vld [vmem:[%s956_s1 + $0x38] sm:$0xff]   ;;  %636 = vmatprep.mubr.msk.bf16.mxu0 %vm740_vm0, %v739_v0  ;;  %v703_v2 = vld [vmem:[%s956_s1 + $0x30] sm:$0xff]   ;;  %v704_v3 = vld [vmem:[%s956_s1 + $0x28] sm:$0xff]  }
   0x2   :  { %640 = vmatprep.subr.bf16.mxu1 %v739_v0  ;;  %656 = vmatprep.mubr.msk.bf16.mxu1 %vm740_vm0, %v739_v0  ;;  %v711_v4 = vld [vmem:[%s957_s3 + $0x38] sm:$0xff]   ;;  %v705_v5 = vld [vmem:[%s956_s1 + $0x20] sm:$0xff]   ;;  %v712_v6 = vld [vmem:[%s957_s3 + $0x30] sm:$0xff]   ;;  %v281_v53 = vand.u32 127, %v280_v52 }
   0x3   :  { %621 = vmatpush3.bf16.msra.mxu0 %v702_v1  ;;  %641 = vmatpush3.bf16.msra.mxu1 %v711_v4  ;;  %v706_v7 = vld [vmem:[%s956_s1 + $0x18] sm:$0xff]   ;;  %v713_v8 = vld [vmem:[%s957_s3 + $0x28] sm:$0xff]   ;;  %v707_v9 = vld [vmem:[%s956_s1 + $0x10] sm:$0xff]  }
   0x4   :  { %622 = vmatprep.subr.bf16.mxu0 %v739_v0  ;;  %642 = vmatprep.subr.bf16.mxu1 %v739_v0  ;;  %v714_v10 = vld [vmem:[%s957_s3 + $0x20] sm:$0xff]   ;;  %v708_v11 = vld [vmem:[%s956_s1 + $0x8] sm:$0xff]   ;;  %v715_v12 = vld [vmem:[%s957_s3 + $0x18] sm:$0xff]   ;;  %vm282_vm1 = vcmp.lt.s32.totalorder %v281_v53, 16 }
   0x5   :  { %v709_v13 = vld [vmem:[%s956_s1] sm:$0xff]   ;;  %v716_v15 = vld [vmem:[%s957_s3 + $0x10] sm:$0xff]   ;;  %v717_v16 = vld [vmem:[%s957_s3 + $0x8] sm:$0xff]  }
   0x6   :  { %v710_v14 = vld [vmem:[%s958_s0] sm:$0xff]   ;;  %v719_v28 = vld [vmem:[%s960_s5 + $0x38] sm:$0xff]   ;;  %v720_v29 = vld [vmem:[%s960_s5 + $0x30] sm:$0xff]  }
   0x7   :  { %623 = vmatpush3.bf16.msra.mxu0 %v703_v2  ;;  %643 = vmatpush3.bf16.msra.mxu1 %v712_v6  ;;  %v718_v17 = vld [vmem:[%s957_s3] sm:$0xff]   ;;  %v721_v30 = vld [vmem:[%s960_s5 + $0x28] sm:$0xff]   ;;  %v723_v32 = vld [vmem:[%s960_s5 + $0x18] sm:$0xff]  }
   0x8   :  { %624 = vmatprep.subr.bf16.mxu0 %v739_v0  ;;  %644 = vmatprep.subr.bf16.mxu1 %v739_v0  ;;  %v535_v18 = vld [vmem:[%s959_s2] ss:$0 sm:$0xff]  ;;  %v724_v33 = vld [vmem:[%s960_s5 + $0x10] sm:$0xff]   ;;  %v725_v34 = vld [vmem:[%s960_s5 + $0x8] sm:$0xff]  }
   0x9   :  { %v722_v31 = vld [vmem:[%s960_s5 + $0x20] sm:$0xff]   ;;  %v727_v36 = vld [vmem:[%s961_s7 + $0x38] sm:$0xff]   ;;  %v728_v37 = vld [vmem:[%s961_s7 + $0x30] sm:$0xff]  }
   0xa   :  { %v726_v35 = vld [vmem:[%s960_s5] sm:$0xff]   ;;  %v729_v38 = vld [vmem:[%s961_s7 + $0x28] sm:$0xff]   ;;  %v731_v40 = vld [vmem:[%s961_s7 + $0x18] sm:$0xff]  }
   0xb   :  { %625 = vmatpush3.bf16.msra.mxu0 %v704_v3  ;;  %645 = vmatpush3.bf16.msra.mxu1 %v713_v8  ;;  %v730_v39 = vld [vmem:[%s961_s7 + $0x20] sm:$0xff]   ;;  %vm563_vm2 = vmpackc.low %vm282_vm1, %vm282_vm1  ;;  %v732_v63 = vld [vmem:[%s961_s7 + $0x10] sm:$0xff]  }
   0xc   :  { %626 = vmatprep.subr.bf16.mxu0 %v739_v0  ;;  %646 = vmatprep.subr.bf16.mxu1 %v739_v0  ;;  %v545_v41 = vld [vmem:[%s962_s4] ss:$0 sm:$0xff]  ;;  %v733_v1 = vld [vmem:[%s961_s7 + $0x8] sm:$0xff]  }
   0xd   :  { %v734_v2 = vld [vmem:[%s961_s7] sm:$0xff]  }
   0xe   :  { %v554_v3 = vld [vmem:[%s964_s6] ss:$0 sm:$0xff] }
   0xf   :  { %627 = vmatpush3.bf16.msra.mxu0 %v705_v5  ;;  %647 = vmatpush3.bf16.msra.mxu1 %v714_v10 }
  0x10   :  { %628 = vmatprep.subr.bf16.mxu0 %v739_v0  ;;  %648 = vmatprep.subr.bf16.mxu1 %v739_v0 }
  0x13   :  { %629 = vmatpush3.bf16.msra.mxu0 %v706_v7  ;;  %649 = vmatpush3.bf16.msra.mxu1 %v715_v12 }
  0x14   :  { %630 = vmatprep.subr.bf16.mxu0 %v739_v0  ;;  %650 = vmatprep.subr.bf16.mxu1 %v739_v0 }
  0x17   :  { %631 = vmatpush3.bf16.msra.mxu0 %v707_v9  ;;  %651 = vmatpush3.bf16.msra.mxu1 %v716_v15 }
  0x18   :  { %632 = vmatprep.subr.bf16.mxu0 %v739_v0  ;;  %652 = vmatprep.subr.bf16.mxu1 %v739_v0 }
  0x1b   :  { %633 = vmatpush3.bf16.msra.mxu0 %v708_v11  ;;  %653 = vmatpush3.bf16.msra.mxu1 %v717_v16 }
  0x1c   :  { %634 = vmatprep.subr.bf16.mxu0 %v739_v0  ;;  %654 = vmatprep.subr.bf16.mxu1 %v739_v0 }
  0x1f   :  { %635 = vmatpush3.bf16.msra.mxu0 %v709_v13  ;;  %655 = vmatpush3.bf16.msra.mxu1 %v718_v17 }
  0x20   :  { %660 = vmatprep.subr.bf16.mxu0 %v739_v0  ;;  %680 = vmatprep.subr.bf16.mxu1 %v739_v0 }
  0x22   :  { %637 = vmatmul.mubr.bf16.vlgmr.msra.gmra.mxu0 %v710_v14 }
  0x23   :  { %676 = vmatprep.mubr.msk.bf16.mxu0 %vm740_vm0, %v739_v0  ;;  %661 = vmatpush3.bf16.msra.mxu0 %v719_v28 }
  0x24   :  { %662 = vmatprep.subr.bf16.mxu0 %v739_v0 }
  0x27   :  { %663 = vmatpush3.bf16.msra.mxu0 %v720_v29 }
  0x28   :  { %664 = vmatprep.subr.bf16.mxu0 %v739_v0 }
  0x2b   :  { %665 = vmatpush3.bf16.msra.mxu0 %v721_v30 }
  0x2c   :  { %666 = vmatprep.subr.bf16.mxu0 %v739_v0 }
  0x2f   :  { %667 = vmatpush3.bf16.msra.mxu0 %v722_v31 }
  0x30   :  { %668 = vmatprep.subr.bf16.mxu0 %v739_v0 }
  0x33   :  { %669 = vmatpush3.bf16.msra.mxu0 %v723_v32 }
  0x34   :  { %670 = vmatprep.subr.bf16.mxu0 %v739_v0 }
  0x37   :  { %671 = vmatpush3.bf16.msra.mxu0 %v724_v33 }
  0x38   :  { %672 = vmatprep.subr.bf16.mxu0 %v739_v0 }
  0x3b   :  { %673 = vmatpush3.bf16.msra.mxu0 %v725_v34 }
  0x3c   :  { %674 = vmatprep.subr.bf16.mxu0 %v739_v0 }
  0x3f   :  { %675 = vmatpush3.bf16.msra.mxu0 %v726_v35 }
  0xe2   :  { %v148_v19 = vpop.f32.mrf.mxu0 }
  0xe3   :  { %v149_v21 = vadd.f32 %v535_v18, %v148_v19 }
  0xe4   :  { %v638_v20 = vpop.f32.mrf.mxu0 }
  0xe5   :  { %v155_v25 = vmax.f32 %v149_v21, 0.0 }
  0xe6   :  { %v151_v22 = vpop.f32.mrf.mxu0 }
  0xe7   :  { %v152_v23 = vadd.f32 %v535_v18, %v151_v22 }
  0xe8   :  { %v639_v24 = vpop.f32.mrf.mxu0 }
  0xe9   :  { %v156_v26 = vmax.f32 %v152_v23, 0.0 }
  0xeb   :  { %v157_v27 = vpack.c.bf16 %v156_v26, %v155_v25 }
  0xed   :  { %657 = vmatmul.mubr.bf16.vlgmr.msra.gmra.mxu1 %v157_v27 }
  0xee   :  { %696 = vmatprep.mubr.msk.bf16.mxu1 %vm740_vm0, %v739_v0  ;;  %681 = vmatpush3.bf16.msra.mxu1 %v727_v36 }
  0xef   :  { %682 = vmatprep.subr.bf16.mxu1 %v739_v0 }
  0xf2   :  { %683 = vmatpush3.bf16.msra.mxu1 %v728_v37 }
  0xf3   :  { %684 = vmatprep.subr.bf16.mxu1 %v739_v0 }
  0xf6   :  { %685 = vmatpush3.bf16.msra.mxu1 %v729_v38 }
  0xf7   :  { %686 = vmatprep.subr.bf16.mxu1 %v739_v0 }
  0xfa   :  { %687 = vmatpush3.bf16.msra.mxu1 %v730_v39 }
  0xfb   :  { %688 = vmatprep.subr.bf16.mxu1 %v739_v0 }
  0xfe   :  { %689 = vmatpush3.bf16.msra.mxu1 %v731_v40 }
  0xff   :  { %690 = vmatprep.subr.bf16.mxu1 %v739_v0 }
 0x102   :  { %691 = vmatpush3.bf16.msra.mxu1 %v732_v63 }
 0x103   :  { %692 = vmatprep.subr.bf16.mxu1 %v739_v0 }
 0x106   :  { %693 = vmatpush3.bf16.msra.mxu1 %v733_v1 }
 0x107   :  { %694 = vmatprep.subr.bf16.mxu1 %v739_v0  ;;  %v566_v0 = vld [vmem:[%s965_s8] ss:$0 sm:$0xff] }
 0x10a   :  { %695 = vmatpush3.bf16.msra.mxu1 %v734_v2 }
 0x1ad   :  { %v263_v42 = vpop.f32.mrf.mxu1 }
 0x1ae   :  { %v264_v43 = vadd.f32 %v545_v41, %v263_v42 }
 0x1af   :  { %v658_v44 = vpop.f32.mrf.mxu1 }
 0x1b0   :  { %v270_v45 = vmax.f32 %v264_v43, 0.0 }
 0x1b1   :  { %v266_v46 = vpop.f32.mrf.mxu1 }
 0x1b2   :  { %v272_v47 = vmul.f32 0.5, %v270_v45  ;;  %v267_v48 = vadd.f32 %v545_v41, %v266_v46 }
 0x1b3   :  { %v659_v49 = vpop.f32.mrf.mxu1 }
 0x1b4   :  { %735 = vtanh.f32 %v272_v47  ;;  %v271_v50 = vmax.f32 %v267_v48, 0.0 }
 0x1b6   :  { %v273_v51 = vmul.f32 0.5, %v271_v50 }
 0x1b8   :  { %737 = vtanh.f32 %v273_v51 }
 0x1c1   :  { %v736_v54 = vpop.eup %735 }
 0x1c2   :  { %v276_v55 = vadd.f32 1.0, %v736_v54 }
 0x1c4   :  { %v278_v56 = vmul.f32 0.5, %v276_v55 }
 0x1c5   :  { %v738_v57 = vpop.eup %737 }
 0x1c6   :  { %v283_v58 = vsel %vm282_vm1, %v278_v56, 0.0  ;;  %v277_v59 = vadd.f32 1.0, %v738_v57 }
 0x1c7   :  { %285 = vst [vmem:[%s963_s9] sm:$0xff] %v283_v58 }
 0x1c8   :  { %v279_v60 = vmul.f32 0.5, %v277_v59 }
 0x1ca   :  { %v284_v61 = vsel %vm282_vm1, %v279_v60, 0.0  ;;  %v564_v62 = vpack.c.bf16 %v279_v60, %v278_v56 }
 0x1cb   :  { %286 = vst [vmem:[%s963_s9 + $0x8] sm:$0xff] %v284_v61 }
 0x1cc   :  { %677 = vmatmul.mubr.msk.bf16.vlgmr.msra.gmra.mxu0 %vm563_vm2, %v564_v62 }
 0x28c   :  { %v393_v4 = vpop.f32.mrf.mxu0 }
 0x28d   :  { %v394_v6 = vadd.f32 %v554_v3, %v393_v4 }
 0x28e   :  { %v678_v5 = vpop.f32.mrf.mxu0 }
 0x28f   :  { %v400_v10 = vmax.f32 %v394_v6, 0.0 }
 0x290   :  { %v396_v7 = vpop.f32.mrf.mxu0 }
 0x291   :  { %v397_v8 = vadd.f32 %v554_v3, %v396_v7 }
 0x292   :  { %v679_v9 = vpop.f32.mrf.mxu0 }
 0x293   :  { %v401_v11 = vmax.f32 %v397_v8, 0.0 }
 0x295   :  { %v402_v12 = vpack.c.bf16 %v401_v11, %v400_v10 }
 0x297   :  { %697 = vmatmul.mubr.bf16.vlgmr.msra.gmra.mxu1 %v402_v12 }
 0x357   :  { %v508_v13 = vpop.f32.mrf.mxu1 }
 0x358   :  { %v509_v15 = vadd.f32 %v566_v0, %v508_v13 }
 0x359   :  { %v698_v14 = vpop.f32.mrf.mxu1 }
 0x35a   :  { %v515_v19 = vmax.f32 %v509_v15, 0.0 }
 0x35b   :  { %v511_v16 = vpop.f32.mrf.mxu1 }
 0x35c   :  { %v512_v17 = vadd.f32 %v566_v0, %v511_v16 }
 0x35d   :  { %v699_v18 = vpop.f32.mrf.mxu1 }
 0x35e   :  { %v516_v20 = vmax.f32 %v512_v17, 0.0 }
 0x360   :  { %v582_v21 = vpack.c.bf16 %v516_v20, %v515_v19 }
 0x362   :  { %583 = vst [vmem:[%s966_s10] sm:$0xff] %v582_v21  }

// kernel: svs_vae_forward.3
= control target key start
LH: loop header
LB: loop body
LE: loop exit
PB: predicated region body
PF: predicated region fallthrough
CT: control target
= control target key end

     0   :  { %v10922_v1 = vmov 0   ;;  %s10910_s1 = inlined_call_operand.vmem [shape: bf16[128,512], index: 1, kind: input, shape index: {}]   ;;  %s10911_s0 = inlined_call_operand.vmem [shape: bf16[128,128], index: 0, kind: input, shape index: {}]   ;;  %s10912_s2 = inlined_call_operand.vmem [shape: bf16[128,512], index: 2, kind: input, shape index: {}]   ;;  %s10913_s3 = inlined_call_operand.vmem [shape: f32[1,512], index: 3, kind: input, shape index: {}]   ;;  %s10914_s4 = inlined_call_operand.vmem [shape: bf16[128,512], index: 4, kind: input, shape index: {}]   ;;  %s10915_s5 = inlined_call_operand.vmem [shape: bf16[128,512], index: 5, kind: input, shape index: {}]   ;;  %s10916_s6 = inlined_call_operand.vmem [shape: f32[1,512], index: 6, kind: input, shape index: {}]   ;;  %s10917_s7 = inlined_call_operand.vmem [shape: bf16[128,128], index: 7, kind: output, shape index: {}]  }
   0x1   :  { %v7877_v0 = vld [vmem:[%s10910_s1 + $0xe4] ss:$16 sps:$4 sm:$0xff]   ;;  %349 = vmatprep.mubr.bf16.mxu0 %v10922_v1  ;;  %31 = vst [vmem:[#allocation2] sm:$0xf] %v10922_v1  ;;  %32 = vst [vmem:[#allocation2 + $0x4] sm:$0xf] %v10922_v1  ;;  %462 = vmatprep.mubr.bf16.mxu1 %v10922_v1 }
   0x2   :  { %35 = vst [vmem:[#allocation4] sm:$0xf] %v10922_v1  ;;  %36 = vst [vmem:[#allocation4 + $0x4] sm:$0xf] %v10922_v1  ;;  %v7879_v2 = vld [vmem:[%s10910_s1 + $0xec] ss:$16 sps:$4 sm:$0xff]   ;;  %317 = vmatprep.subr.bf16.mxu0 %v7877_v0 }
   0x3   :  { %v7881_v3 = vld [vmem:[%s10910_s1 + $0xe0] ss:$16 sps:$4 sm:$0xff]   ;;  %v7882_v4 = vld [vmem:[%s10910_s1 + $0xe8] ss:$16 sps:$4 sm:$0xff]   ;;  %430 = vmatprep.subr.bf16.mxu1 %v7879_v2  ;;  %v7883_v5 = vld [vmem:[%s10910_s1 + $0xc4] ss:$16 sps:$4 sm:$0xff]  }
   0x4   :  { %318 = vmatpush1.bf16.msra.mxu0 %v7881_v3  ;;  %431 = vmatpush1.bf16.msra.mxu1 %v7882_v4  ;;  %v7885_v6 = vld [vmem:[%s10910_s1 + $0xcc] ss:$16 sps:$4 sm:$0xff]   ;;  %v7887_v7 = vld [vmem:[%s10910_s1 + $0xc0] ss:$16 sps:$4 sm:$0xff]   ;;  %v7888_v8 = vld [vmem:[%s10910_s1 + $0xc8] ss:$16 sps:$4 sm:$0xff]  }
   0x5   :  { %319 = vmatprep.subr.bf16.mxu0 %v7883_v5  ;;  %432 = vmatprep.subr.bf16.mxu1 %v7885_v6  ;;  %v7889_v9 = vld [vmem:[%s10910_s1 + $0xa4] ss:$16 sps:$4 sm:$0xff]   ;;  %v7891_v10 = vld [vmem:[%s10910_s1 + $0xac] ss:$16 sps:$4 sm:$0xff]   ;;  %v7893_v11 = vld [vmem:[%s10910_s1 + $0xa0] ss:$16 sps:$4 sm:$0xff]  }
   0x6   :  { %v7894_v12 = vld [vmem:[%s10910_s1 + $0xa8] ss:$16 sps:$4 sm:$0xff]   ;;  %v7895_v13 = vld [vmem:[%s10910_s1 + $0x84] ss:$16 sps:$4 sm:$0xff]   ;;  %v7897_v14 = vld [vmem:[%s10910_s1 + $0x8c] ss:$16 sps:$4 sm:$0xff]  }
   0x7   :  { %v7899_v15 = vld [vmem:[%s10910_s1 + $0x80] ss:$16 sps:$4 sm:$0xff]   ;;  %v7900_v16 = vld [vmem:[%s10910_s1 + $0x88] ss:$16 sps:$4 sm:$0xff]   ;;  %v7901_v17 = vld [vmem:[%s10910_s1 + $0x64] ss:$16 sps:$4 sm:$0xff]  }
   0x8   :  { %320 = vmatpush1.bf16.msra.mxu0 %v7887_v7  ;;  %433 = vmatpush1.bf16.msra.mxu1 %v7888_v8  ;;  %v7903_v18 = vld [vmem:[%s10910_s1 + $0x6c] ss:$16 sps:$4 sm:$0xff]   ;;  %v7905_v19 = vld [vmem:[%s10910_s1 + $0x60] ss:$16 sps:$4 sm:$0xff]   ;;  %v7906_v20 = vld [vmem:[%s10910_s1 + $0x68] ss:$16 sps:$4 sm:$0xff]  }
   0x9   :  { %321 = vmatprep.subr.bf16.mxu0 %v7889_v9  ;;  %434 = vmatprep.subr.bf16.mxu1 %v7891_v10  ;;  %v7907_v21 = vld [vmem:[%s10910_s1 + $0x44] ss:$16 sps:$4 sm:$0xff]   ;;  %v7909_v22 = vld [vmem:[%s10910_s1 + $0x4c] ss:$16 sps:$4 sm:$0xff]   ;;  %v7911_v23 = vld [vmem:[%s10910_s1 + $0x40] ss:$16 sps:$4 sm:$0xff]  }
   0xa   :  { %v7912_v24 = vld [vmem:[%s10910_s1 + $0x48] ss:$16 sps:$4 sm:$0xff]   ;;  %v7913_v25 = vld [vmem:[%s10910_s1 + $0x24] ss:$16 sps:$4 sm:$0xff]   ;;  %v7915_v26 = vld [vmem:[%s10910_s1 + $0x2c] ss:$16 sps:$4 sm:$0xff]  }
   0xb   :  { %v7917_v27 = vld [vmem:[%s10910_s1 + $0x20] ss:$16 sps:$4 sm:$0xff]   ;;  %v7918_v28 = vld [vmem:[%s10910_s1 + $0x28] ss:$16 sps:$4 sm:$0xff]   ;;  %v7919_v29 = vld [vmem:[%s10910_s1 + $0x4] ss:$16 sps:$4 sm:$0xff]  }
   0xc   :  { %322 = vmatpush1.bf16.msra.mxu0 %v7893_v11  ;;  %435 = vmatpush1.bf16.msra.mxu1 %v7894_v12  ;;  %v7921_v30 = vld [vmem:[%s10910_s1 + $0xc] ss:$16 sps:$4 sm:$0xff]   ;;  %v7923_v31 = vld [vmem:[%s10910_s1] ss:$16 sps:$4 sm:$0xff]   ;;  %v7924_v32 = vld [vmem:[%s10910_s1 + $0x8] ss:$16 sps:$4 sm:$0xff]   ;;  %v89_v11 = vlaneseq }
   0xd   :  { %323 = vmatprep.subr.bf16.mxu0 %v7895_v13  ;;  %436 = vmatprep.subr.bf16.mxu1 %v7897_v14  ;;  %v8759_v33 = vld [vmem:[%s10912_s2 + $0xe4] ss:$16 sps:$4 sm:$0xff]   ;;  %v8764_v34 = vld [vmem:[%s10912_s2 + $0xec] ss:$16 sps:$4 sm:$0xff]   ;;  %v8772_v36 = vld [vmem:[%s10912_s2 + $0xe0] ss:$16 sps:$4 sm:$0xff]  }
   0xe   :  { %v7925_v35 = vld [vmem:[%s10911_s0] sm:$0xff]   ;;  %v8784_v38 = vld [vmem:[%s10912_s2 + $0xe8] ss:$16 sps:$4 sm:$0xff]   ;;  %v8789_v39 = vld [vmem:[%s10912_s2 + $0xcc] ss:$16 sps:$4 sm:$0xff]   ;;  %v9024_v12 = vshrl.u32 %v89_v11, 7 }
   0xf   :  { %v8778_v37 = vld [vmem:[%s10912_s2 + $0xc4] ss:$16 sps:$4 sm:$0xff]   ;;  %v8796_v40 = vld [vmem:[%s10912_s2 + $0xc0] ss:$16 sps:$4 sm:$0xff]   ;;  %v8809_v42 = vld [vmem:[%s10912_s2 + $0xc8] ss:$16 sps:$4 sm:$0xff]  }
  0x10   :  { %324 = vmatpush1.bf16.msra.mxu0 %v7899_v15  ;;  %437 = vmatpush1.bf16.msra.mxu1 %v7900_v16  ;;  %v8803_v41 = vld [vmem:[%s10912_s2 + $0xa4] ss:$16 sps:$4 sm:$0xff]   ;;  %v7929_v43 = vld [vmem:[%s10911_s0 + $0x8] sm:$0xff]   ;;  %v8819_v44 = vld [vmem:[%s10912_s2 + $0xa0] ss:$16 sps:$4 sm:$0xff]   ;;  %10926 = vst [vmem:[#allocation9_spill] sm:$0xff] %v9024_v12 }
  0x11   :  { %325 = vmatprep.subr.bf16.mxu0 %v7901_v17  ;;  %438 = vmatprep.subr.bf16.mxu1 %v7903_v18  ;;  %v8825_v45 = vld [vmem:[%s10912_s2 + $0x84] ss:$16 sps:$4 sm:$0xff]   ;;  %v8830_v46 = vld [vmem:[%s10912_s2 + $0xac] ss:$16 sps:$4 sm:$0xff]   ;;  %v8836_v47 = vld [vmem:[%s10912_s2 + $0xa8] ss:$16 sps:$4 sm:$0xff]  }
  0x12   :  { %v8841_v48 = vld [vmem:[%s10912_s2 + $0x8c] ss:$16 sps:$4 sm:$0xff]   ;;  %v8849_v49 = vld [vmem:[%s10912_s2 + $0x80] ss:$16 sps:$4 sm:$0xff]   ;;  %v8855_v50 = vld [vmem:[%s10912_s2 + $0x64] ss:$16 sps:$4 sm:$0xff]  }
  0x13   :  { %v8862_v51 = vld [vmem:[%s10912_s2 + $0x88] ss:$16 sps:$4 sm:$0xff]   ;;  %v7936_v52 = vld [vmem:[%s10911_s0 + $0x10] sm:$0xff]   ;;  %v8877_v54 = vld [vmem:[%s10912_s2 + $0x6c] ss:$16 sps:$4 sm:$0xff]   ;;  %v10921_v17 = vsub.s32 0, %v9024_v12 }
  0x14   :  { %326 = vmatpush1.bf16.msra.mxu0 %v7905_v19  ;;  %439 = vmatpush1.bf16.msra.mxu1 %v7906_v20  ;;  %v8871_v53 = vld [vmem:[%s10912_s2 + $0x60] ss:$16 sps:$4 sm:$0xff]   ;;  %v8884_v55 = vld [vmem:[%s10912_s2 + $0x44] ss:$16 sps:$4 sm:$0xff]   ;;  %v8889_v56 = vld [vmem:[%s10912_s2 + $0x68] ss:$16 sps:$4 sm:$0xff]  }
  0x15   :  { %327 = vmatprep.subr.bf16.mxu0 %v7907_v21  ;;  %440 = vmatprep.subr.bf16.mxu1 %v7909_v22  ;;  %v8894_v57 = vld [vmem:[%s10912_s2 + $0x40] ss:$16 sps:$4 sm:$0xff]   ;;  %v8899_v58 = vld [vmem:[%s10912_s2 + $0x4c] ss:$16 sps:$4 sm:$0xff]   ;;  %v8906_v59 = vld [vmem:[%s10912_s2 + $0x24] ss:$16 sps:$4 sm:$0xff]  }
  0x16   :  { %v8911_v60 = vld [vmem:[%s10912_s2 + $0x48] ss:$16 sps:$4 sm:$0xff]   ;;  %v8923_v62 = vld [vmem:[%s10912_s2 + $0x20] ss:$16 sps:$4 sm:$0xff]   ;;  %v8929_v63 = vld [vmem:[%s10912_s2 + $0x2c] ss:$16 sps:$4 sm:$0xff]  }
  0x17   :  { %v7943_v61 = vld [vmem:[%s10911_s0 + $0x18] sm:$0xff]   ;;  %v8934_v0 = vld [vmem:[%s10912_s2 + $0x4] ss:$16 sps:$4 sm:$0xff]   ;;  %v8952_v4 = vld [vmem:[%s10912_s2] ss:$16 sps:$4 sm:$0xff]   ;;  %v10919_v18 = vsub.s32 2, %v9024_v12 }
  0x18   :  { %328 = vmatpush1.bf16.msra.mxu0 %v7911_v23  ;;  %441 = vmatpush1.bf16.msra.mxu1 %v7912_v24  ;;  %v8939_v2 = vld [vmem:[%s10912_s2 + $0x28] ss:$16 sps:$4 sm:$0xff]   ;;  %v8945_v3 = vld [vmem:[%s10912_s2 + $0xc] ss:$16 sps:$4 sm:$0xff]   ;;  %v7950_v6 = vld [vmem:[%s10911_s0 + $0x20] sm:$0xff]   ;;  %v10920_v22 = vsub.s32 1, %v9024_v12 }
  0x19   :  { %329 = vmatprep.subr.bf16.mxu0 %v7913_v25  ;;  %442 = vmatprep.subr.bf16.mxu1 %v7915_v26  ;;  %v8959_v5 = vld [vmem:[%s10912_s2 + $0x8] ss:$16 sps:$4 sm:$0xff]   ;;  %v7964_v8 = vld [vmem:[%s10911_s0 + $0x30] sm:$0xff]   ;;  %v7981_v10 = vld [vmem:[#allocation2] sm:$0xff]   ;;  %v10918_v23 = vsub.s32 3, %v9024_v12 }
  0x1a   :  { %v7957_v7 = vld [vmem:[%s10911_s0 + $0x28] sm:$0xff]   ;;  %v7971_v9 = vld [vmem:[%s10911_s0 + $0x38] sm:$0xff]   ;;  %v87_v19 = vld [vmem:[%s10913_s3] sm:$0xf] }
  0x1b   :  { %v9051_v26 = vrot.slane %v87_v19, %v10921_v17 }
  0x1c   :  { %330 = vmatpush1.bf16.msra.mxu0 %v7917_v27  ;;  %443 = vmatpush1.bf16.msra.mxu1 %v7918_v28  ;;  %v9055_v27 = vrot.slane %v87_v19, %v10919_v18 }
  0x1d   :  { %331 = vmatprep.subr.bf16.mxu0 %v7919_v29  ;;  %444 = vmatprep.subr.bf16.mxu1 %v7921_v30  ;;  %v9059_v30 = vrot.slane %v87_v19, %v10920_v22 }
  0x20   :  { %332 = vmatpush1.bf16.msra.mxu0 %v7923_v31  ;;  %445 = vmatpush1.bf16.msra.mxu1 %v7924_v32  ;;  %v9063_v31 = vrot.slane %v87_v19, %v10918_v23 }
  0x21   :  { %818 = vmatprep.subr.bf16.mxu0 %v8759_v33  ;;  %861 = vmatprep.subr.bf16.mxu1 %v8764_v34 }
  0x23   :  { %350 = vmatmul.mubr.bf16.vlgmr.msra.gmra.mxu0 %v7925_v35  ;;  %463 = vmatmul.mubr.bf16.vlgmr.msra.gmra.mxu1 %v7925_v35 }
  0x24   :  { %819 = vmatpush1.bf16.msra.mxu0 %v8772_v36  ;;  %359 = vmatprep.mubr.bf16.mxu0 %v10922_v1 }
  0x25   :  { %472 = vmatprep.mubr.bf16.mxu1 %v10922_v1  ;;  %820 = vmatprep.subr.bf16.mxu0 %v8778_v37 }
  0x26   :  { %862 = vmatpush1.bf16.msra.mxu1 %v8784_v38 }
  0x27   :  { %863 = vmatprep.subr.bf16.mxu1 %v8789_v39 }
  0x28   :  { %821 = vmatpush1.bf16.msra.mxu0 %v8796_v40 }
  0x29   :  { %822 = vmatprep.subr.bf16.mxu0 %v8803_v41 }
  0x2a   :  { %864 = vmatpush1.bf16.msra.mxu1 %v8809_v42 }
  0x2b   :  { %360 = vmatmul.mubr.bf16.gmra.mxu0 %v7929_v43  ;;  %473 = vmatmul.mubr.bf16.gmra.mxu1 %v7929_v43 }
  0x2c   :  { %369 = vmatprep.mubr.bf16.mxu0 %v10922_v1  ;;  %482 = vmatprep.mubr.bf16.mxu1 %v10922_v1 }
  0x2d   :  { %823 = vmatpush1.bf16.msra.mxu0 %v8819_v44  ;;  %865 = vmatprep.subr.bf16.mxu1 %v8830_v46 }
  0x2e   :  { %824 = vmatprep.subr.bf16.mxu0 %v8825_v45  ;;  %866 = vmatpush1.bf16.msra.mxu1 %v8836_v47 }
  0x2f   :  { %867 = vmatprep.subr.bf16.mxu1 %v8841_v48 }
  0x31   :  { %825 = vmatpush1.bf16.msra.mxu0 %v8849_v49 }
  0x32   :  { %826 = vmatprep.subr.bf16.mxu0 %v8855_v50  ;;  %868 = vmatpush1.bf16.msra.mxu1 %v8862_v51 }
  0x33   :  { %370 = vmatmul.mubr.bf16.gmra.mxu0 %v7936_v52  ;;  %483 = vmatmul.mubr.bf16.gmra.mxu1 %v7936_v52 }
  0x34   :  { %379 = vmatprep.mubr.bf16.mxu0 %v10922_v1  ;;  %492 = vmatprep.mubr.bf16.mxu1 %v10922_v1 }
  0x35   :  { %827 = vmatpush1.bf16.msra.mxu0 %v8871_v53  ;;  %869 = vmatprep.subr.bf16.mxu1 %v8877_v54 }
  0x36   :  { %828 = vmatprep.subr.bf16.mxu0 %v8884_v55  ;;  %870 = vmatpush1.bf16.msra.mxu1 %v8889_v56 }
  0x37   :  { %871 = vmatprep.subr.bf16.mxu1 %v8899_v58 }
  0x39   :  { %829 = vmatpush1.bf16.msra.mxu0 %v8894_v57 }
  0x3a   :  { %830 = vmatprep.subr.bf16.mxu0 %v8906_v59  ;;  %872 = vmatpush1.bf16.msra.mxu1 %v8911_v60 }
  0x3b   :  { %380 = vmatmul.mubr.bf16.gmra.mxu0 %v7943_v61  ;;  %493 = vmatmul.mubr.bf16.gmra.mxu1 %v7943_v61 }
  0x3c   :  { %389 = vmatprep.mubr.bf16.mxu0 %v10922_v1  ;;  %502 = vmatprep.mubr.bf16.mxu1 %v10922_v1 }
  0x3d   :  { %831 = vmatpush1.bf16.msra.mxu0 %v8923_v62  ;;  %873 = vmatprep.subr.bf16.mxu1 %v8929_v63 }
  0x3e   :  { %832 = vmatprep.subr.bf16.mxu0 %v8934_v0  ;;  %874 = vmatpush1.bf16.msra.mxu1 %v8939_v2 }
  0x3f   :  { %875 = vmatprep.subr.bf16.mxu1 %v8945_v3 }
  0x41   :  { %833 = vmatpush1.bf16.msra.mxu0 %v8952_v4 }
  0x42   :  { %876 = vmatpush1.bf16.msra.mxu1 %v8959_v5  ;;  %1185 = vmatprep.subr.bf16.mxu0 %v8759_v33 }
  0x43   :  { %390 = vmatmul.mubr.bf16.gmra.mxu0 %v7950_v6  ;;  %503 = vmatmul.mubr.bf16.gmra.mxu1 %v7950_v6 }
  0x44   :  { %399 = vmatprep.mubr.bf16.mxu0 %v10922_v1  ;;  %512 = vmatprep.mubr.bf16.mxu1 %v10922_v1 }
  0x45   :  { %1228 = vmatprep.subr.bf16.mxu1 %v8764_v34 }
  0x4b   :  { %400 = vmatmul.mubr.bf16.gmra.mxu0 %v7957_v7  ;;  %513 = vmatmul.mubr.bf16.gmra.mxu1 %v7957_v7 }
  0x4c   :  { %409 = vmatprep.mubr.bf16.mxu0 %v10922_v1  ;;  %522 = vmatprep.mubr.bf16.mxu1 %v10922_v1 }
  0x53   :  { %410 = vmatmul.mubr.bf16.gmra.mxu0 %v7964_v8  ;;  %523 = vmatmul.mubr.bf16.gmra.mxu1 %v7964_v8 }
  0x54   :  { %419 = vmatprep.mubr.bf16.mxu0 %v10922_v1  ;;  %532 = vmatprep.mubr.bf16.mxu1 %v10922_v1 }
  0x5b   :  { %420 = vmatmul.mubr.bf16.gmra.mxu0 %v7971_v9  ;;  %533 = vmatmul.mubr.bf16.gmra.mxu1 %v7971_v9 }
  0x5c   :  { %850 = vmatprep.mubr.bf16.mxu0 %v10922_v1  ;;  %893 = vmatprep.mubr.bf16.mxu1 %v10922_v1 }
  0x63   :  { %851 = vmatmul.mubr.bf16.vlgmr.msra.gmra.mxu0 %v7981_v10  ;;  %894 = vmatmul.mubr.bf16.vlgmr.msra.gmra.mxu1 %v7981_v10 }
  0x64   :  { %1186 = vmatpush1.bf16.msra.mxu0 %v8772_v36  ;;  %1229 = vmatpush1.bf16.msra.mxu1 %v8784_v38 }
  0x65   :  { %1187 = vmatprep.subr.bf16.mxu0 %v8778_v37  ;;  %1230 = vmatprep.subr.bf16.mxu1 %v8789_v39 }
  0x66   :  { %1217 = vmatprep.mubr.bf16.mxu0 %v10922_v1  ;;  %1260 = vmatprep.mubr.bf16.mxu1 %v10922_v1 }
  0x68   :  { %1188 = vmatpush1.bf16.msra.mxu0 %v8796_v40  ;;  %1231 = vmatpush1.bf16.msra.mxu1 %v8809_v42 }
  0x69   :  { %1189 = vmatprep.subr.bf16.mxu0 %v8803_v41  ;;  %1232 = vmatprep.subr.bf16.mxu1 %v8830_v46 }
  0x6c   :  { %1190 = vmatpush1.bf16.msra.mxu0 %v8819_v44  ;;  %1233 = vmatpush1.bf16.msra.mxu1 %v8836_v47 }
  0x6d   :  { %1191 = vmatprep.subr.bf16.mxu0 %v8825_v45  ;;  %1234 = vmatprep.subr.bf16.mxu1 %v8841_v48 }
  0x70   :  { %1192 = vmatpush1.bf16.msra.mxu0 %v8849_v49  ;;  %1235 = vmatpush1.bf16.msra.mxu1 %v8862_v51 }
  0x71   :  { %1193 = vmatprep.subr.bf16.mxu0 %v8855_v50  ;;  %1236 = vmatprep.subr.bf16.mxu1 %v8877_v54 }
  0x74   :  { %1194 = vmatpush1.bf16.msra.mxu0 %v8871_v53  ;;  %1237 = vmatpush1.bf16.msra.mxu1 %v8889_v56 }
  0x75   :  { %1195 = vmatprep.subr.bf16.mxu0 %v8884_v55  ;;  %1238 = vmatprep.subr.bf16.mxu1 %v8899_v58 }
  0x78   :  { %1196 = vmatpush1.bf16.msra.mxu0 %v8894_v57  ;;  %1239 = vmatpush1.bf16.msra.mxu1 %v8911_v60 }
  0x79   :  { %1197 = vmatprep.subr.bf16.mxu0 %v8906_v59  ;;  %1240 = vmatprep.subr.bf16.mxu1 %v8929_v63 }
  0x7c   :  { %1198 = vmatpush1.bf16.msra.mxu0 %v8923_v62  ;;  %1241 = vmatpush1.bf16.msra.mxu1 %v8939_v2 }
  0x7d   :  { %1199 = vmatprep.subr.bf16.mxu0 %v8934_v0  ;;  %1242 = vmatprep.subr.bf16.mxu1 %v8945_v3 }
  0x80   :  { %1200 = vmatpush1.bf16.msra.mxu0 %v8952_v4  ;;  %1243 = vmatpush1.bf16.msra.mxu1 %v8959_v5 }
  0x81   :  { %1553 = vmatprep.subr.bf16.mxu0 %v8759_v33  ;;  %1596 = vmatprep.subr.bf16.mxu1 %v8764_v34 }
  0xe3   :  { %v9026_v13 = vpop.f32.mrf.mxu0  ;;  %v9028_v14 = vpop.f32.mrf.mxu1 }
  0xe5   :  { %v9030_v15 = vpop.f32.mrf.mxu0  ;;  %v9032_v16 = vpop.f32.mrf.mxu1 }
  0xe7   :  { %v9039_v20 = vpop.f32.mrf.mxu0  ;;  %v9041_v21 = vpop.f32.mrf.mxu1 }
  0xe9   :  { %v9045_v24 = vpop.f32.mrf.mxu0  ;;  %v9047_v25 = vpop.f32.mrf.mxu1 }
  0xeb   :  { %v361_v28 = vpop.f32.mrf.mxu0  ;;  %v474_v29 = vpop.f32.mrf.mxu1 }
  0xec   :  { %v9066_v32 = vadd.f32 %v361_v28, %v9051_v26  ;;  %v9069_v33 = vadd.f32 %v474_v29, %v9055_v27 }
  0xed   :  { %v363_v34 = vpop.f32.mrf.mxu0  ;;  %v476_v35 = vpop.f32.mrf.mxu1 }
  0xee   :  { %v9072_v43 = vadd.f32 %v363_v34, %v9059_v30  ;;  %v9075_v52 = vadd.f32 %v476_v35, %v9063_v31 }
  0xef   :  { %v365_v61 = vpop.f32.mrf.mxu0  ;;  %v478_v6 = vpop.f32.mrf.mxu1 }
  0xf0   :  { %10927 = vst [vmem:[#allocation10_spill] sm:$0xff] %v9075_v52  ;;  %v9078_v7 = vadd.f32 %v365_v61, %v9051_v26  ;;  %v9081_v8 = vadd.f32 %v478_v6, %v9055_v27 }
  0xf1   :  { %v9083_v9 = vpop.f32.mrf.mxu0  ;;  %v9085_v10 = vpop.f32.mrf.mxu1 }
  0xf3   :  { %v371_v11 = vpop.f32.mrf.mxu0  ;;  %v484_v19 = vpop.f32.mrf.mxu1 }
  0xf4   :  { %v9088_v28 = vadd.f32 %v371_v11, %v9051_v26  ;;  %v9091_v29 = vadd.f32 %v484_v19, %v9055_v27 }
  0xf5   :  { %v373_v34 = vpop.f32.mrf.mxu0  ;;  %v486_v35 = vpop.f32.mrf.mxu1 }
  0xf6   :  { %10928 = vst [vmem:[#allocation11_spill] sm:$0xff] %v9088_v28  ;;  %10929 = vst [vmem:[#allocation12_spill] sm:$0xff] %v9091_v29  ;;  %v9094_v61 = vadd.f32 %v373_v34, %v9059_v30  ;;  %v9097_v6 = vadd.f32 %v486_v35, %v9063_v31 }
  0xf7   :  { %v375_v23 = vpop.f32.mrf.mxu0  ;;  %v488_v18 = vpop.f32.mrf.mxu1 }
  0xf8   :  { %10930 = vst [vmem:[#allocation13_spill] sm:$0xff] %v9094_v61  ;;  %10931 = vst [vmem:[#allocation14_spill] sm:$0xff] %v9097_v6  ;;  %v9100_v22 = vadd.f32 %v375_v23, %v9051_v26  ;;  %v9103_v17 = vadd.f32 %v488_v18, %v9055_v27 }
  0xf9   :  { %v9105_v11 = vpop.f32.mrf.mxu0  ;;  %v9107_v19 = vpop.f32.mrf.mxu1 }
  0xfa   :  { %10932 = vst [vmem:[#allocation15_spill] sm:$0xff] %v9100_v22  ;;  %10933 = vst [vmem:[#allocation16_spill] sm:$0xff] %v9103_v17 }
  0xfb   :  { %10934 = vst [vmem:[#allocation17_spill] sm:$0xff] %v9105_v11  ;;  %10935 = vst [vmem:[#allocation18_spill] sm:$0xff] %v9107_v19  ;;  %v381_v1 = vpop.f32.mrf.mxu0  ;;  %v494_v12 = vpop.f32.mrf.mxu1 }
  0xfc   :  { %v9110_v34 = vadd.f32 %v381_v1, %v9051_v26  ;;  %v9113_v35 = vadd.f32 %v494_v12, %v9055_v27 }
  0xfd   :  { %v383_v6 = vpop.f32.mrf.mxu0  ;;  %v496_v29 = vpop.f32.mrf.mxu1 }
  0xfe   :  { %10936 = vst [vmem:[#allocation19_spill] sm:$0xff] %v9110_v34  ;;  %10937 = vst [vmem:[#allocation20_spill] sm:$0xff] %v9113_v35  ;;  %v9116_v23 = vadd.f32 %v383_v6, %v9059_v30  ;;  %v9119_v18 = vadd.f32 %v496_v29, %v9063_v31 }
  0xff   :  { %v385_v17 = vpop.f32.mrf.mxu0  ;;  %v498_v22 = vpop.f32.mrf.mxu1 }
 0x100   :  { %10938 = vst [vmem:[#allocation21_spill] sm:$0xff] %v9116_v23  ;;  %10939 = vst [vmem:[#allocation22_spill] sm:$0xff] %v9119_v18  ;;  %v9122_v19 = vadd.f32 %v385_v17, %v9051_v26  ;;  %v9125_v11 = vadd.f32 %v498_v22, %v9055_v27 }
 0x101   :  { %v9127_v1 = vpop.f32.mrf.mxu0  ;;  %v9129_v12 = vpop.f32.mrf.mxu1 }
 0x102   :  { %10940 = vst [vmem:[#allocation23_spill] sm:$0xff] %v9122_v19  ;;  %10941 = vst [vmem:[#allocation24_spill] sm:$0xff] %v9125_v11 }
 0x103   :  { %10942 = vst [vmem:[#allocation25_spill] sm:$0xff] %v9127_v1  ;;  %10943 = vst [vmem:[#allocation26_spill] sm:$0xff] %v9129_v12  ;;  %v391_v35 = vpop.f32.mrf.mxu0  ;;  %v504_v34 = vpop.f32.mrf.mxu1 }
 0x104   :  { %v9132_v6 = vadd.f32 %v391_v35, %v9051_v26  ;;  %v9135_v29 = vadd.f32 %v504_v34, %v9055_v27 }
 0x105   :  { %v393_v18 = vpop.f32.mrf.mxu0  ;;  %v506_v23 = vpop.f32.mrf.mxu1 }
 0x106   :  { %10944 = vst [vmem:[#allocation27_spill] sm:$0xff] %v9132_v6  ;;  %10945 = vst [vmem:[#allocation28_spill] sm:$0xff] %v9135_v29  ;;  %v9138_v17 = vadd.f32 %v393_v18, %v9059_v30  ;;  %v9141_v22 = vadd.f32 %v506_v23, %v9063_v31 }
 0x107   :  { %v395_v11 = vpop.f32.mrf.mxu0  ;;  %v508_v19 = vpop.f32.mrf.mxu1 }
 0x108   :  { %10946 = vst [vmem:[#allocation29_spill] sm:$0xff] %v9138_v17  ;;  %10947 = vst [vmem:[#allocation30_spill] sm:$0xff] %v9141_v22  ;;  %v9144_v12 = vadd.f32 %v395_v11, %v9051_v26  ;;  %v9147_v1 = vadd.f32 %v508_v19, %v9055_v27 }
 0x109   :  { %v397_v35 = vpop.f32.mrf.mxu0  ;;  %v510_v6 = vpop.f32.mrf.mxu1 }
 0x10a   :  { %10948 = vst [vmem:[#allocation31_spill] sm:$0xff] %v9144_v12  ;;  %10949 = vst [vmem:[#allocation32_spill] sm:$0xff] %v9147_v1  ;;  %v9150_v34 = vadd.f32 %v397_v35, %v9059_v30  ;;  %v9153_v29 = vadd.f32 %v510_v6, %v9063_v31 }
 0x10b   :  { %v401_v18 = vpop.f32.mrf.mxu0  ;;  %v514_v17 = vpop.f32.mrf.mxu1 }
 0x10c   :  { %10950 = vst [vmem:[#allocation33_spill] sm:$0xff] %v9150_v34  ;;  %10951 = vst [vmem:[#allocation34_spill] sm:$0xff] %v9153_v29  ;;  %v9156_v23 = vadd.f32 %v401_v18, %v9051_v26  ;;  %v9159_v22 = vadd.f32 %v514_v17, %v9055_v27 }
 0x10d   :  { %v403_v11 = vpop.f32.mrf.mxu0  ;;  %v516_v12 = vpop.f32.mrf.mxu1 }
 0x10e   :  { %10952 = vst [vmem:[#allocation35_spill] sm:$0xff] %v9156_v23  ;;  %10953 = vst [vmem:[#allocation36_spill] sm:$0xff] %v9159_v22  ;;  %v9162_v19 = vadd.f32 %v403_v11, %v9059_v30  ;;  %v9165_v1 = vadd.f32 %v516_v12, %v9063_v31 }
 0x10f   :  { %v405_v35 = vpop.f32.mrf.mxu0  ;;  %v518_v34 = vpop.f32.mrf.mxu1 }
 0x110   :  { %10954 = vst [vmem:[#allocation37_spill] sm:$0xff] %v9162_v19  ;;  %10955 = vst [vmem:[#allocation38_spill] sm:$0xff] %v9165_v1  ;;  %v9168_v6 = vadd.f32 %v405_v35, %v9051_v26  ;;  %v9171_v29 = vadd.f32 %v518_v34, %v9055_v27 }
 0x111   :  { %v407_v18 = vpop.f32.mrf.mxu0  ;;  %v520_v23 = vpop.f32.mrf.mxu1 }
 0x112   :  { %10956 = vst [vmem:[#allocation39_spill] sm:$0xff] %v9168_v6  ;;  %10957 = vst [vmem:[#allocation40_spill] sm:$0xff] %v9171_v29  ;;  %v9174_v17 = vadd.f32 %v407_v18, %v9059_v30  ;;  %v9177_v22 = vadd.f32 %v520_v23, %v9063_v31 }
 0x113   :  { %v411_v11 = vpop.f32.mrf.mxu0  ;;  %v524_v19 = vpop.f32.mrf.mxu1 }
 0x114   :  { %10958 = vst [vmem:[#allocation41_spill] sm:$0xff] %v9174_v17  ;;  %10959 = vst [vmem:[#allocation42_spill] sm:$0xff] %v9177_v22  ;;  %v9180_v12 = vadd.f32 %v411_v11, %v9051_v26  ;;  %v9183_v1 = vadd.f32 %v524_v19, %v9055_v27 }
 0x115   :  { %v413_v35 = vpop.f32.mrf.mxu0  ;;  %v526_v6 = vpop.f32.mrf.mxu1 }
 0x116   :  { %10960 = vst [vmem:[#allocation43_spill] sm:$0xff] %v9180_v12  ;;  %10961 = vst [vmem:[#allocation44_spill] sm:$0xff] %v9183_v1  ;;  %v9186_v34 = vadd.f32 %v413_v35, %v9059_v30  ;;  %v9189_v29 = vadd.f32 %v526_v6, %v9063_v31 }
 0x117   :  { %v415_v18 = vpop.f32.mrf.mxu0  ;;  %v528_v17 = vpop.f32.mrf.mxu1 }
 0x118   :  { %10962 = vst [vmem:[#allocation45_spill] sm:$0xff] %v9186_v34  ;;  %10963 = vst [vmem:[#allocation46_spill] sm:$0xff] %v9189_v29  ;;  %v9192_v23 = vadd.f32 %v415_v18, %v9051_v26  ;;  %v9195_v22 = vadd.f32 %v528_v17, %v9055_v27 }
 0x119   :  { %v417_v11 = vpop.f32.mrf.mxu0  ;;  %v530_v12 = vpop.f32.mrf.mxu1 }
 0x11a   :  { %10964 = vst [vmem:[#allocation47_spill] sm:$0xff] %v9192_v23  ;;  %10965 = vst [vmem:[#allocation48_spill] sm:$0xff] %v9195_v22  ;;  %v9198_v19 = vadd.f32 %v417_v11, %v9059_v30  ;;  %v9201_v1 = vadd.f32 %v530_v12, %v9063_v31 }
 0x11b   :  { %v421_v35 = vpop.f32.mrf.mxu0  ;;  %v534_v34 = vpop.f32.mrf.mxu1 }
 0x11c   :  { %10966 = vst [vmem:[#allocation49_spill] sm:$0xff] %v9198_v19  ;;  %10967 = vst [vmem:[#allocation50_spill] sm:$0xff] %v9201_v1  ;;  %v9204_v6 = vadd.f32 %v421_v35, %v9051_v26  ;;  %v9207_v29 = vadd.f32 %v534_v34, %v9055_v27  ;;  %v352_v34 = vadd.f32 %v9026_v13, %v9051_v26 }
 0x11d   :  { %v423_v18 = vpop.f32.mrf.mxu0  ;;  %v536_v23 = vpop.f32.mrf.mxu1 }
 0x11e   :  { %10968 = vst [vmem:[#allocation51_spill] sm:$0xff] %v9204_v6  ;;  %10969 = vst [vmem:[#allocation52_spill] sm:$0xff] %v9207_v29  ;;  %v9210_v17 = vadd.f32 %v423_v18, %v9059_v30  ;;  %v9213_v22 = vadd.f32 %v536_v23, %v9063_v31 }
 0x11f   :  { %v425_v11 = vpop.f32.mrf.mxu0  ;;  %v538_v19 = vpop.f32.mrf.mxu1 }
 0x120   :  { %10970 = vst [vmem:[#allocation53_spill] sm:$0xff] %v9210_v17  ;;  %10971 = vst [vmem:[#allocation54_spill] sm:$0xff] %v9213_v22  ;;  %v9216_v12 = vadd.f32 %v425_v11, %v9051_v26  ;;  %v9219_v1 = vadd.f32 %v538_v19, %v9055_v27  ;;  %v354_v11 = vadd.f32 %v9030_v15, %v9059_v30 }
 0x121   :  { %v427_v35 = vpop.f32.mrf.mxu0  ;;  %v540_v6 = vpop.f32.mrf.mxu1  ;;  %v465_v19 = vadd.f32 %v9028_v14, %v9055_v27  ;;  %v356_v17 = vadd.f32 %v9039_v20, %v9051_v26  ;;  %v469_v20 = vadd.f32 %v9041_v21, %v9055_v27 }
 0x122   :  { %10972 = vst [vmem:[#allocation55_spill] sm:$0xff] %v9216_v12  ;;  %10973 = vst [vmem:[#allocation56_spill] sm:$0xff] %v9219_v1  ;;  %v9224_v29 = vadd.f32 %v427_v35, %v9059_v30  ;;  %v9227_v18 = vadd.f32 %v540_v6, %v9063_v31  ;;  %v358_v6 = vadd.f32 %v9045_v24, %v9059_v30 }
 0x123   :  { %v852_v23 = vpop.f32.mrf.mxu0  ;;  %v895_v22 = vpop.f32.mrf.mxu1 }
 0x124   :  { %10974 = vst [vmem:[#allocation57_spill] sm:$0xff] %v9224_v29  ;;  %10975 = vst [vmem:[#allocation58_spill] sm:$0xff] %v9227_v18  ;;  %v904_v12 = vadd.f32 %v852_v23, %v352_v34  ;;  %v906_v35 = vadd.f32 %v895_v22, %v465_v19  ;;  %v467_v22 = vadd.f32 %v9032_v16, %v9063_v31 }
 0x125   :  { %v854_v1 = vpop.f32.mrf.mxu0  ;;  %v897_v29 = vpop.f32.mrf.mxu1 }
 0x126   :  { %v914_v13 = vmul.f32 0.5, %v904_v12  ;;  %v905_v61 = vadd.f32 %v854_v1, %v354_v11 }
 0x127   :  { %v856_v28 = vpop.f32.mrf.mxu0  ;;  %v899_v14 = vpop.f32.mrf.mxu1 }
 0x128   :  { %8293 = vtanh.f32 %v914_v13  ;;  %v922_v18 = vmul.f32 0.5, %v905_v61  ;;  %v908_v52 = vadd.f32 %v856_v28, %v356_v17  ;;  %v910_v1 = vadd.f32 %v899_v14, %v469_v20 }
 0x129   :  { %v858_v15 = vpop.f32.mrf.mxu0  ;;  %v901_v24 = vpop.f32.mrf.mxu1  ;;  %v471_v28 = vadd.f32 %v9047_v25, %v9063_v31  ;;  %v907_v61 = vadd.f32 %v897_v29, %v467_v22 }
 0x12a   :  { %8295 = vtanh.f32 %v922_v18  ;;  %v915_v34 = vmul.f32 0.5, %v908_v52  ;;  %v909_v23 = vadd.f32 %v858_v15, %v358_v6 }
 0x12b   :  { %8297 = vtanh.f32 %v906_v35  ;;  %v911_v52 = vadd.f32 %v901_v24, %v471_v28  ;;  %v932_v18 = vmul.f32 0.5, %v907_v61 }
 0x12c   :  { %8299 = vtanh.f32 %v915_v34  ;;  %v923_v26 = vmul.f32 0.5, %v909_v23 }
 0x12d   :  { %v933_v13 = vmul.f32 0.5, %v911_v52 }
 0x12e   :  { %8301 = vtanh.f32 %v923_v26 }
 0x12f   :  { %8303 = vtanh.f32 %v910_v1 }
 0x130   :  { %8305 = vtanh.f32 %v932_v18 }
 0x131   :  { %8307 = vtanh.f32 %v933_v13 }
 0x135   :  { %v8294_v17 = vpop.eup %8293 }
 0x136   :  { %v918_v12 = vadd.f32 1.0, %v8294_v17 }
 0x137   :  { %v8296_v11 = vpop.eup %8295 }
 0x138   :  { %v8298_v19 = vpop.eup %8297  ;;  %v920_v21 = vmul.f32 0.5, %v918_v12  ;;  %v926_v27 = vadd.f32 1.0, %v8296_v11 }
 0x139   :  { %v8300_v35 = vpop.eup %8299 }
 0x13a   :  { %v928_v6 = vmul.f32 0.5, %v926_v27  ;;  %v942_v15 = vmul.f32 %v8298_v19, %v920_v21  ;;  %v919_v16 = vadd.f32 1.0, %v8300_v35 }
 0x13b   :  { %v8302_v34 = vpop.eup %8301 }
 0x13c   :  { %v940_v23 = vmul.f32 0.0, %v928_v6  ;;  %v921_v14 = vmul.f32 0.5, %v919_v16  ;;  %v927_v25 = vadd.f32 1.0, %v8302_v34  ;;  %v8304_v26 = vpop.eup %8303  ;;  %v10976_v34 = vmov 0  }
 0x13d   :  { %v8306_v28 = vpop.eup %8305 }
 0x13e   :  { %v9243_v29 = vadd.f32 %v942_v15, %v940_v23  ;;  %v929_v20 = vmul.f32 0.5, %v927_v25  ;;  %v943_v22 = vmul.f32 %v8304_v26, %v921_v14  ;;  %v8308_v61 = vpop.eup %8307  ;;  %v936_v52 = vadd.f32 1.0, %v8306_v28 }
 0x13f   :  { %v937_v17 = vadd.f32 1.0, %v8308_v61 }
 0x140   :  { %8309 = vtanh.f32 %v9243_v29  ;;  %v941_v1 = vmul.f32 0.0, %v929_v20  ;;  %v938_v18 = vmul.f32 0.5, %v936_v52 }
 0x141   :  { %v939_v19 = vmul.f32 0.5, %v937_v17 }
 0x142   :  { %v9246_v24 = vadd.f32 %v943_v22, %v941_v1 }
 0x144   :  { %8311 = vtanh.f32 %v9246_v24 }
 0x14d   :  { %v8310_v12 = vpop.eup %8309 }
 0x14e   :  { %v948_v11 = vmul.f32 %v8310_v12, %v938_v18 }
 0x150   :  { %v962_v13 = vmax.f32 %v948_v11, 0.0 }
 0x151   :  { %v8312_v21 = vpop.eup %8311 }
 0x152   :  { %v949_v27 = vmul.f32 %v8312_v21, %v939_v19 }
 0x154   :  { %v7712_v35 = vpack.c.bf16 %v949_v27, %v948_v11  ;;  %v963_v6 = vmax.f32 %v949_v27, 0.0 }
 0x156   :  { %7713 = vst [vmem:[#allocation2] sm:$0xff] %v7712_v35   ;;  %v7717_v15 = vpack.c.bf16 %v963_v6, %v962_v13 }
 0x158   :  { %7718 = vst [vmem:[#allocation7] sm:$0xff] %v7717_v15  }
 0x15d   :  { %v7982_v16 = vld [vmem:[#allocation2] sm:$0xff]  }
 0x15e   :  { %1218 = vmatmul.mubr.bf16.vlgmr.msra.gmra.mxu0 %v7982_v16  ;;  %1261 = vmatmul.mubr.bf16.vlgmr.msra.gmra.mxu1 %v7982_v16  ;;  %v9304_v16 = vld [vmem:[%s10912_s2 + $0xe4] ss:$16 sps:$4 sm:$0xff]  }
 0x15f   :  { %1554 = vmatpush1.bf16.msra.mxu0 %v8772_v36  ;;  %1597 = vmatpush1.bf16.msra.mxu1 %v8784_v38 }
 0x160   :  { %1555 = vmatprep.subr.bf16.mxu0 %v8778_v37  ;;  %1598 = vmatprep.subr.bf16.mxu1 %v8789_v39 }
 0x161   :  { %1585 = vmatprep.mubr.bf16.mxu0 %v10976_v34  ;;  %1628 = vmatprep.mubr.bf16.mxu1 %v10976_v34 }
 0x163   :  { %1556 = vmatpush1.bf16.msra.mxu0 %v8796_v40  ;;  %1599 = vmatpush1.bf16.msra.mxu1 %v8809_v42 }
 0x164   :  { %1557 = vmatprep.subr.bf16.mxu0 %v8803_v41  ;;  %1600 = vmatprep.subr.bf16.mxu1 %v8830_v46  ;;  %v368_v46 = vadd.f32 %v9083_v9, %v9059_v30 }
 0x167   :  { %1558 = vmatpush1.bf16.msra.mxu0 %v8819_v44  ;;  %1601 = vmatpush1.bf16.msra.mxu1 %v8836_v47 }
 0x168   :  { %1559 = vmatprep.subr.bf16.mxu0 %v8825_v45  ;;  %1602 = vmatprep.subr.bf16.mxu1 %v8841_v48 }
 0x16b   :  { %1560 = vmatpush1.bf16.msra.mxu0 %v8849_v49  ;;  %1603 = vmatpush1.bf16.msra.mxu1 %v8862_v51 }
 0x16c   :  { %1561 = vmatprep.subr.bf16.mxu0 %v8855_v50  ;;  %1604 = vmatprep.subr.bf16.mxu1 %v8877_v54 }
 0x16f   :  { %1562 = vmatpush1.bf16.msra.mxu0 %v8871_v53  ;;  %1605 = vmatpush1.bf16.msra.mxu1 %v8889_v56 }
 0x170   :  { %1563 = vmatprep.subr.bf16.mxu0 %v8884_v55  ;;  %1606 = vmatprep.subr.bf16.mxu1 %v8899_v58  ;;  %v10977_v58 = vld [vmem:[#allocation10_spill] sm:$0xff] }
 0x173   :  { %1564 = vmatpush1.bf16.msra.mxu0 %v8894_v57  ;;  %1607 = vmatpush1.bf16.msra.mxu1 %v8911_v60  ;;  %v481_v57 = vadd.f32 %v9085_v10, %v9063_v31 }
 0x174   :  { %1565 = vmatprep.subr.bf16.mxu0 %v8906_v59  ;;  %1608 = vmatprep.subr.bf16.mxu1 %v8929_v63 }
 0x177   :  { %1566 = vmatpush1.bf16.msra.mxu0 %v8923_v62  ;;  %1609 = vmatpush1.bf16.msra.mxu1 %v8939_v2 }
 0x178   :  { %1567 = vmatprep.subr.bf16.mxu0 %v8934_v0  ;;  %1610 = vmatprep.subr.bf16.mxu1 %v8945_v3 }
 0x17b   :  { %1568 = vmatpush1.bf16.msra.mxu0 %v8952_v4  ;;  %1611 = vmatpush1.bf16.msra.mxu1 %v8959_v5 }
 0x17c   :  { %1921 = vmatprep.subr.bf16.mxu0 %v9304_v16 }
 0x21e   :  { %v1219_v36 = vpop.f32.mrf.mxu0  ;;  %v1262_v37 = vpop.f32.mrf.mxu1 }
 0x21f   :  { %v1271_v38 = vadd.f32 %v1219_v36, %v9066_v32  ;;  %v1273_v44 = vadd.f32 %v1262_v37, %v9069_v33  ;;  %v9309_v36 = vld [vmem:[%s10912_s2 + $0xec] ss:$16 sps:$4 sm:$0xff]   ;;  %v9314_v37 = vld [vmem:[%s10912_s2 + $0xe0] ss:$16 sps:$4 sm:$0xff]  }
 0x220   :  { %v1221_v39 = vpop.f32.mrf.mxu0  ;;  %v1264_v40 = vpop.f32.mrf.mxu1  ;;  %1964 = vmatprep.subr.bf16.mxu1 %v9309_v36 }
 0x221   :  { %v1281_v41 = vmul.f32 0.5, %v1271_v38  ;;  %v1272_v42 = vadd.f32 %v1221_v39, %v9072_v43  ;;  %v1274_v59 = vadd.f32 %v1264_v40, %v10977_v58  ;;  %v9319_v38 = vld [vmem:[%s10912_s2 + $0xe8] ss:$16 sps:$4 sm:$0xff]   ;;  %v9328_v39 = vld [vmem:[%s10912_s2 + $0xc4] ss:$16 sps:$4 sm:$0xff]  }
 0x222   :  { %v1223_v45 = vpop.f32.mrf.mxu0  ;;  %v1266_v49 = vpop.f32.mrf.mxu1  ;;  %v9333_v40 = vld [vmem:[%s10912_s2 + $0xcc] ss:$16 sps:$4 sm:$0xff]  }
 0x223   :  { %8313 = vtanh.f32 %v1281_v41  ;;  %v1289_v47 = vmul.f32 0.5, %v1272_v42  ;;  %v1275_v48 = vadd.f32 %v1223_v45, %v9078_v7  ;;  %v1277_v54 = vadd.f32 %v1266_v49, %v9081_v8  ;;  %v9338_v41 = vld [vmem:[%s10912_s2 + $0xc0] ss:$16 sps:$4 sm:$0xff]   ;;  %v9343_v42 = vld [vmem:[%s10912_s2 + $0xc8] ss:$16 sps:$4 sm:$0xff]  }
 0x224   :  { %v1225_v50 = vpop.f32.mrf.mxu0  ;;  %v1268_v56 = vpop.f32.mrf.mxu1  ;;  %v1299_v0 = vmul.f32 0.5, %v1274_v59  ;;  %v9357_v45 = vld [vmem:[%s10912_s2 + $0xac] ss:$16 sps:$4 sm:$0xff]   ;;  %v9434_v59 = vld [vmem:[%s10912_s2 + $0x40] ss:$16 sps:$4 sm:$0xff]  }
 0x225   :  { %8315 = vtanh.f32 %v1289_v47  ;;  %v1282_v51 = vmul.f32 0.5, %v1275_v48  ;;  %v1276_v53 = vadd.f32 %v1225_v50, %v368_v46  ;;  %v1278_v60 = vadd.f32 %v1268_v56, %v481_v57  ;;  %v9362_v46 = vld [vmem:[%s10912_s2 + $0xa0] ss:$16 sps:$4 sm:$0xff]   ;;  %v9367_v47 = vld [vmem:[%s10912_s2 + $0xa8] ss:$16 sps:$4 sm:$0xff]  }
 0x226   :  { %8317 = vtanh.f32 %v1273_v44  ;;  %v9352_v44 = vld [vmem:[%s10912_s2 + $0xa4] ss:$16 sps:$4 sm:$0xff]   ;;  %v9381_v49 = vld [vmem:[%s10912_s2 + $0x8c] ss:$16 sps:$4 sm:$0xff]   ;;  %v9386_v50 = vld [vmem:[%s10912_s2 + $0x80] ss:$16 sps:$4 sm:$0xff]  }
 0x227   :  { %8319 = vtanh.f32 %v1282_v51  ;;  %v1290_v55 = vmul.f32 0.5, %v1276_v53  ;;  %v1300_v32 = vmul.f32 0.5, %v1278_v60  ;;  %v9376_v48 = vld [vmem:[%s10912_s2 + $0x84] ss:$16 sps:$4 sm:$0xff]   ;;  %v9391_v51 = vld [vmem:[%s10912_s2 + $0x88] ss:$16 sps:$4 sm:$0xff]  }
 0x228   :  { %v9400_v53 = vld [vmem:[%s10912_s2 + $0x64] ss:$16 sps:$4 sm:$0xff]   ;;  %v9415_v56 = vld [vmem:[%s10912_s2 + $0x68] ss:$16 sps:$4 sm:$0xff]   ;;  %v9429_v58 = vld [vmem:[%s10912_s2 + $0x4c] ss:$16 sps:$4 sm:$0xff]  }
 0x229   :  { %8321 = vtanh.f32 %v1290_v55  ;;  %v9410_v55 = vld [vmem:[%s10912_s2 + $0x60] ss:$16 sps:$4 sm:$0xff]   ;;  %v9424_v57 = vld [vmem:[%s10912_s2 + $0x44] ss:$16 sps:$4 sm:$0xff]   ;;  %v9439_v60 = vld [vmem:[%s10912_s2 + $0x48] ss:$16 sps:$4 sm:$0xff]  }
 0x22a   :  { %8323 = vtanh.f32 %v1277_v54  ;;  %v9405_v54 = vld [vmem:[%s10912_s2 + $0x6c] ss:$16 sps:$4 sm:$0xff]  }
 0x22b   :  { %8325 = vtanh.f32 %v1299_v0  ;;  %v9458_v0 = vld [vmem:[%s10912_s2 + $0x28] ss:$16 sps:$4 sm:$0xff]  }
 0x22c   :  { %8327 = vtanh.f32 %v1300_v32  ;;  %v9488_v32 = vld [vmem:[%s10912_s2 + $0x8] ss:$16 sps:$4 sm:$0xff]  }
 0x230   :  { %v8314_v62 = vpop.eup %8313 }
 0x231   :  { %v1285_v63 = vadd.f32 1.0, %v8314_v62  ;;  %v9448_v62 = vld [vmem:[%s10912_s2 + $0x20] ss:$16 sps:$4 sm:$0xff]  }
 0x232   :  { %v8316_v2 = vpop.eup %8315 }
 0x233   :  { %v8318_v3 = vpop.eup %8317  ;;  %v1287_v4 = vmul.f32 0.5, %v1285_v63  ;;  %v1293_v5 = vadd.f32 1.0, %v8316_v2  ;;  %v9453_v63 = vld [vmem:[%s10912_s2 + $0x24] ss:$16 sps:$4 sm:$0xff]   ;;  %v9463_v2 = vld [vmem:[%s10912_s2 + $0x2c] ss:$16 sps:$4 sm:$0xff]  }
 0x234   :  { %v8320_v33 = vpop.eup %8319 }
 0x235   :  { %v1295_v43 = vmul.f32 0.5, %v1293_v5  ;;  %v1309_v7 = vmul.f32 %v8318_v3, %v1287_v4  ;;  %v1286_v8 = vadd.f32 1.0, %v8320_v33  ;;  %v9468_v3 = vld [vmem:[%s10912_s2 + $0x4] ss:$16 sps:$4 sm:$0xff]   ;;  %v9474_v4 = vld [vmem:[%s10912_s2 + $0xc] ss:$16 sps:$4 sm:$0xff]  }
 0x236   :  { %v8322_v9 = vpop.eup %8321  ;;  %v9481_v5 = vld [vmem:[%s10912_s2] ss:$16 sps:$4 sm:$0xff]  }
 0x237   :  { %v1307_v23 = vmul.f32 %v1295_v43, %v9243_v29  ;;  %v1288_v10 = vmul.f32 0.5, %v1286_v8  ;;  %v1294_v14 = vadd.f32 1.0, %v8322_v9  ;;  %v8324_v25 = vpop.eup %8323 }
 0x238   :  { %v8326_v61 = vpop.eup %8325 }
 0x239   :  { %v9292_v20 = vadd.f32 %v1309_v7, %v1307_v23  ;;  %v1296_v26 = vmul.f32 0.5, %v1294_v14  ;;  %v1310_v1 = vmul.f32 %v8324_v25, %v1288_v10  ;;  %v8328_v52 = vpop.eup %8327  ;;  %v1303_v17 = vadd.f32 1.0, %v8326_v61  ;;  %v10978_v7 = vld [vmem:[#allocation11_spill] sm:$0xff]  ;;  %v10979_v14 = vld [vmem:[#allocation13_spill] sm:$0xff] }
 0x23a   :  { %v1304_v29 = vadd.f32 1.0, %v8328_v52  ;;  %v10981_v61 = vld [vmem:[#allocation17_spill] sm:$0xff] }
 0x23b   :  { %8329 = vtanh.f32 %v9292_v20  ;;  %v1308_v22 = vmul.f32 %v1296_v26, %v9246_v24  ;;  %v1305_v18 = vmul.f32 0.5, %v1303_v17  ;;  %v10980_v26 = vld [vmem:[#allocation12_spill] sm:$0xff]  ;;  %v378_v52 = vadd.f32 %v10981_v61, %v9059_v30 }
 0x23c   :  { %v1306_v19 = vmul.f32 0.5, %v1304_v29  ;;  %v10982_v29 = vld [vmem:[#allocation15_spill] sm:$0xff] }
 0x23d   :  { %v9296_v28 = vadd.f32 %v1310_v1, %v1308_v22 }
 0x23f   :  { %8331 = vtanh.f32 %v9296_v28 }
 0x248   :  { %v8330_v12 = vpop.eup %8329 }
 0x249   :  { %v1315_v11 = vmul.f32 %v8330_v12, %v1305_v18 }
 0x24b   :  { %v1329_v13 = vmax.f32 %v1315_v11, 0.0 }
 0x24c   :  { %v8332_v21 = vpop.eup %8331 }
 0x24d   :  { %v1316_v27 = vmul.f32 %v8332_v21, %v1306_v19 }
 0x24f   :  { %v7722_v35 = vpack.c.bf16 %v1316_v27, %v1315_v11  ;;  %v1330_v6 = vmax.f32 %v1316_v27, 0.0  ;;  %v10983_v27 = vld [vmem:[#allocation16_spill] sm:$0xff] }
 0x251   :  { %7723 = vst [vmem:[#allocation2] sm:$0xff] %v7722_v35   ;;  %v7727_v15 = vpack.c.bf16 %v1330_v6, %v1329_v13 }
 0x253   :  { %7728 = vst [vmem:[#allocation7 + $0x8] sm:$0xff] %v7727_v15   ;;  %v10984_v15 = vld [vmem:[#allocation18_spill] sm:$0xff] }
 0x258   :  { %v7983_v24 = vld [vmem:[#allocation2] sm:$0xff]  }
 0x259   :  { %1586 = vmatmul.mubr.bf16.vlgmr.msra.gmra.mxu0 %v7983_v24  ;;  %1629 = vmatmul.mubr.bf16.vlgmr.msra.gmra.mxu1 %v7983_v24  ;;  %v491_v24 = vadd.f32 %v10984_v15, %v9063_v31 }
 0x25a   :  { %1953 = vmatprep.mubr.bf16.mxu0 %v10976_v34  ;;  %1996 = vmatprep.mubr.bf16.mxu1 %v10976_v34 }
 0x25b   :  { %1922 = vmatpush1.bf16.msra.mxu0 %v9314_v37  ;;  %1965 = vmatpush1.bf16.msra.mxu1 %v9319_v38 }
 0x25c   :  { %1923 = vmatprep.subr.bf16.mxu0 %v9328_v39  ;;  %1966 = vmatprep.subr.bf16.mxu1 %v9333_v40 }
 0x25f   :  { %1924 = vmatpush1.bf16.msra.mxu0 %v9338_v41  ;;  %1967 = vmatpush1.bf16.msra.mxu1 %v9343_v42 }
 0x260   :  { %1925 = vmatprep.subr.bf16.mxu0 %v9352_v44  ;;  %1968 = vmatprep.subr.bf16.mxu1 %v9357_v45 }
 0x263   :  { %1926 = vmatpush1.bf16.msra.mxu0 %v9362_v46  ;;  %1969 = vmatpush1.bf16.msra.mxu1 %v9367_v47 }
 0x264   :  { %1927 = vmatprep.subr.bf16.mxu0 %v9376_v48  ;;  %1970 = vmatprep.subr.bf16.mxu1 %v9381_v49 }
 0x267   :  { %1928 = vmatpush1.bf16.msra.mxu0 %v9386_v50  ;;  %1971 = vmatpush1.bf16.msra.mxu1 %v9391_v51 }
 0x268   :  { %1929 = vmatprep.subr.bf16.mxu0 %v9400_v53  ;;  %1972 = vmatprep.subr.bf16.mxu1 %v9405_v54 }
 0x26b   :  { %1930 = vmatpush1.bf16.msra.mxu0 %v9410_v55  ;;  %1973 = vmatpush1.bf16.msra.mxu1 %v9415_v56 }
 0x26c   :  { %1931 = vmatprep.subr.bf16.mxu0 %v9424_v57  ;;  %1974 = vmatprep.subr.bf16.mxu1 %v9429_v58 }
 0x26f   :  { %1932 = vmatpush1.bf16.msra.mxu0 %v9434_v59  ;;  %1975 = vmatpush1.bf16.msra.mxu1 %v9439_v60 }
 0x270   :  { %1933 = vmatprep.subr.bf16.mxu0 %v9453_v63  ;;  %1976 = vmatprep.subr.bf16.mxu1 %v9463_v2 }
 0x273   :  { %1934 = vmatpush1.bf16.msra.mxu0 %v9448_v62  ;;  %1977 = vmatpush1.bf16.msra.mxu1 %v9458_v0 }
 0x274   :  { %1935 = vmatprep.subr.bf16.mxu0 %v9468_v3  ;;  %1978 = vmatprep.subr.bf16.mxu1 %v9474_v4 }
 0x277   :  { %1936 = vmatpush1.bf16.msra.mxu0 %v9481_v5  ;;  %1979 = vmatpush1.bf16.msra.mxu1 %v9488_v32 }
 0x278   :  { %2289 = vmatprep.subr.bf16.mxu0 %v9304_v16  ;;  %2332 = vmatprep.subr.bf16.mxu1 %v9309_v36 }
 0x319   :  { %v1587_v33 = vpop.f32.mrf.mxu0  ;;  %v1630_v43 = vpop.f32.mrf.mxu1 }
 0x31a   :  { %v1639_v8 = vadd.f32 %v1587_v33, %v10978_v7  ;;  %v1641_v1 = vadd.f32 %v1630_v43, %v10980_v26  ;;  %v10985_v33 = vld [vmem:[#allocation14_spill] sm:$0xff] }
 0x31b   :  { %v1589_v9 = vpop.f32.mrf.mxu0  ;;  %v1632_v23 = vpop.f32.mrf.mxu1 }
 0x31c   :  { %v1649_v10 = vmul.f32 0.5, %v1639_v8  ;;  %v1640_v25 = vadd.f32 %v1589_v9, %v10979_v14  ;;  %v1642_v43 = vadd.f32 %v1632_v23, %v10985_v33 }
 0x31d   :  { %v1591_v22 = vpop.f32.mrf.mxu0  ;;  %v1634_v18 = vpop.f32.mrf.mxu1 }
 0x31e   :  { %8333 = vtanh.f32 %v1649_v10  ;;  %v1657_v17 = vmul.f32 0.5, %v1640_v25  ;;  %v1643_v12 = vadd.f32 %v1591_v22, %v10982_v29  ;;  %v1645_v13 = vadd.f32 %v1634_v18, %v10983_v27 }
 0x31f   :  { %v1593_v11 = vpop.f32.mrf.mxu0  ;;  %v1636_v6 = vpop.f32.mrf.mxu1  ;;  %v1667_v10 = vmul.f32 0.5, %v1642_v43 }
 0x320   :  { %8335 = vtanh.f32 %v1657_v17  ;;  %v1650_v19 = vmul.f32 0.5, %v1643_v12  ;;  %v1644_v21 = vadd.f32 %v1593_v11, %v378_v52  ;;  %v1646_v7 = vadd.f32 %v1636_v6, %v491_v24 }
 0x321   :  { %8337 = vtanh.f32 %v1641_v1 }
 0x322   :  { %8339 = vtanh.f32 %v1650_v19  ;;  %v1658_v35 = vmul.f32 0.5, %v1644_v21  ;;  %v1668_v22 = vmul.f32 0.5, %v1646_v7 }
 0x324   :  { %8341 = vtanh.f32 %v1658_v35 }
 0x325   :  { %8343 = vtanh.f32 %v1645_v13 }
 0x326   :  { %8345 = vtanh.f32 %v1667_v10 }
 0x327   :  { %8347 = vtanh.f32 %v1668_v22 }
 0x32b   :  { %v8334_v8 = vpop.eup %8333 }
 0x32c   :  { %v1653_v9 = vadd.f32 1.0, %v8334_v8 }
 0x32d   :  { %v8336_v14 = vpop.eup %8335 }
 0x32e   :  { %v8338_v25 = vpop.eup %8337  ;;  %v1655_v26 = vmul.f32 0.5, %v1653_v9  ;;  %v1661_v1 = vadd.f32 1.0, %v8336_v14 }
 0x32f   :  { %v8340_v61 = vpop.eup %8339 }
 0x330   :  { %v1663_v52 = vmul.f32 0.5, %v1661_v1  ;;  %v1677_v17 = vmul.f32 %v8338_v25, %v1655_v26  ;;  %v1654_v29 = vadd.f32 1.0, %v8340_v61 }
 0x331   :  { %v8342_v12 = vpop.eup %8341 }
 0x332   :  { %v1675_v18 = vmul.f32 %v1663_v52, %v9292_v20  ;;  %v1656_v11 = vmul.f32 0.5, %v1654_v29  ;;  %v1662_v19 = vadd.f32 1.0, %v8342_v12  ;;  %v8344_v23 = vpop.eup %8343 }
 0x333   :  { %v8346_v15 = vpop.eup %8345 }
 0x334   :  { %v9506_v21 = vadd.f32 %v1677_v17, %v1675_v18  ;;  %v1664_v27 = vmul.f32 0.5, %v1662_v19  ;;  %v1678_v13 = vmul.f32 %v8344_v23, %v1656_v11  ;;  %v8348_v24 = vpop.eup %8347  ;;  %v1671_v33 = vadd.f32 1.0, %v8346_v15  ;;  %v10986_v17 = vld [vmem:[#allocation19_spill] sm:$0xff]  ;;  %v10987_v19 = vld [vmem:[#allocation21_spill] sm:$0xff] }
 0x335   :  { %v1672_v20 = vadd.f32 1.0, %v8348_v24  ;;  %v10989_v15 = vld [vmem:[#allocation25_spill] sm:$0xff] }
 0x336   :  { %8349 = vtanh.f32 %v9506_v21  ;;  %v1676_v35 = vmul.f32 %v1664_v27, %v9296_v28  ;;  %v1673_v7 = vmul.f32 0.5, %v1671_v33  ;;  %v10988_v27 = vld [vmem:[#allocation20_spill] sm:$0xff]  ;;  %v388_v24 = vadd.f32 %v10989_v15, %v9059_v30 }
 0x337   :  { %v1674_v9 = vmul.f32 0.5, %v1672_v20  ;;  %v10990_v20 = vld [vmem:[#allocation23_spill] sm:$0xff] }
 0x338   :  { %v9510_v6 = vadd.f32 %v1678_v13, %v1676_v35 }
 0x33a   :  { %8351 = vtanh.f32 %v9510_v6 }
 0x343   :  { %v8350_v43 = vpop.eup %8349 }
 0x344   :  { %v1683_v8 = vmul.f32 %v8350_v43, %v1673_v7 }
 0x346   :  { %v1697_v25 = vmax.f32 %v1683_v8, 0.0 }
 0x347   :  { %v8352_v10 = vpop.eup %8351 }
 0x348   :  { %v1684_v14 = vmul.f32 %v8352_v10, %v1674_v9 }
 0x34a   :  { %v7732_v26 = vpack.c.bf16 %v1684_v14, %v1683_v8  ;;  %v1698_v1 = vmax.f32 %v1684_v14, 0.0  ;;  %v10991_v14 = vld [vmem:[#allocation24_spill] sm:$0xff] }
 0x34c   :  { %7733 = vst [vmem:[#allocation2] sm:$0xff] %v7732_v26   ;;  %v7737_v22 = vpack.c.bf16 %v1698_v1, %v1697_v25 }
 0x34e   :  { %7738 = vst [vmem:[#allocation7 + $0x10] sm:$0xff] %v7737_v22   ;;  %v10992_v22 = vld [vmem:[#allocation26_spill] sm:$0xff] }
 0x34f   :  { %v501_v30 = vadd.f32 %v10992_v22, %v9063_v31 }
 0x353   :  { %v8032_v28 = vld [vmem:[#allocation2] sm:$0xff]  }
 0x354   :  { %1954 = vmatmul.mubr.bf16.vlgmr.msra.gmra.mxu0 %v8032_v28  ;;  %1997 = vmatmul.mubr.bf16.vlgmr.msra.gmra.mxu1 %v8032_v28  ;;  %v10993_v28 = vld [vmem:[#allocation22_spill] sm:$0xff] }
 0x355   :  { %2290 = vmatpush1.bf16.msra.mxu0 %v9314_v37  ;;  %2333 = vmatpush1.bf16.msra.mxu1 %v9319_v38 }
 0x356   :  { %2291 = vmatprep.subr.bf16.mxu0 %v9328_v39  ;;  %2334 = vmatprep.subr.bf16.mxu1 %v9333_v40 }
 0x357   :  { %2321 = vmatprep.mubr.bf16.mxu0 %v10976_v34  ;;  %2364 = vmatprep.mubr.bf16.mxu1 %v10976_v34 }
 0x359   :  { %2292 = vmatpush1.bf16.msra.mxu0 %v9338_v41  ;;  %2335 = vmatpush1.bf16.msra.mxu1 %v9343_v42 }
 0x35a   :  { %2293 = vmatprep.subr.bf16.mxu0 %v9352_v44  ;;  %2336 = vmatprep.subr.bf16.mxu1 %v9357_v45 }
 0x35d   :  { %2294 = vmatpush1.bf16.msra.mxu0 %v9362_v46  ;;  %2337 = vmatpush1.bf16.msra.mxu1 %v9367_v47 }
 0x35e   :  { %2295 = vmatprep.subr.bf16.mxu0 %v9376_v48  ;;  %2338 = vmatprep.subr.bf16.mxu1 %v9381_v49 }
 0x361   :  { %2296 = vmatpush1.bf16.msra.mxu0 %v9386_v50  ;;  %2339 = vmatpush1.bf16.msra.mxu1 %v9391_v51 }
 0x362   :  { %2297 = vmatprep.subr.bf16.mxu0 %v9400_v53  ;;  %2340 = vmatprep.subr.bf16.mxu1 %v9405_v54 }
 0x365   :  { %2298 = vmatpush1.bf16.msra.mxu0 %v9410_v55  ;;  %2341 = vmatpush1.bf16.msra.mxu1 %v9415_v56 }
 0x366   :  { %2299 = vmatprep.subr.bf16.mxu0 %v9424_v57  ;;  %2342 = vmatprep.subr.bf16.mxu1 %v9429_v58 }
 0x369   :  { %2300 = vmatpush1.bf16.msra.mxu0 %v9434_v59  ;;  %2343 = vmatpush1.bf16.msra.mxu1 %v9439_v60 }
 0x36a   :  { %2301 = vmatprep.subr.bf16.mxu0 %v9453_v63  ;;  %2344 = vmatprep.subr.bf16.mxu1 %v9463_v2 }
 0x36d   :  { %2302 = vmatpush1.bf16.msra.mxu0 %v9448_v62  ;;  %2345 = vmatpush1.bf16.msra.mxu1 %v9458_v0 }
 0x36e   :  { %2303 = vmatprep.subr.bf16.mxu0 %v9468_v3  ;;  %2346 = vmatprep.subr.bf16.mxu1 %v9474_v4 }
 0x371   :  { %2304 = vmatpush1.bf16.msra.mxu0 %v9481_v5  ;;  %2347 = vmatpush1.bf16.msra.mxu1 %v9488_v32 }
 0x372   :  { %2657 = vmatprep.subr.bf16.mxu0 %v9304_v16  ;;  %2700 = vmatprep.subr.bf16.mxu1 %v9309_v36 }
 0x414   :  { %v1955_v61 = vpop.f32.mrf.mxu0  ;;  %v1998_v52 = vpop.f32.mrf.mxu1 }
 0x415   :  { %v2007_v29 = vadd.f32 %v1955_v61, %v10986_v17  ;;  %v2009_v13 = vadd.f32 %v1998_v52, %v10988_v27 }
 0x416   :  { %v1957_v12 = vpop.f32.mrf.mxu0  ;;  %v2000_v18 = vpop.f32.mrf.mxu1 }
 0x417   :  { %v2017_v11 = vmul.f32 0.5, %v2007_v29  ;;  %v2008_v23 = vadd.f32 %v1957_v12, %v10987_v19  ;;  %v2010_v61 = vadd.f32 %v2000_v18, %v10993_v28 }
 0x418   :  { %v1959_v35 = vpop.f32.mrf.mxu0  ;;  %v2002_v7 = vpop.f32.mrf.mxu1 }
 0x419   :  { %8353 = vtanh.f32 %v2017_v11  ;;  %v2025_v33 = vmul.f32 0.5, %v2008_v23  ;;  %v2011_v43 = vadd.f32 %v1959_v35, %v10990_v20  ;;  %v2013_v25 = vadd.f32 %v2002_v7, %v10991_v14 }
 0x41a   :  { %v1961_v8 = vpop.f32.mrf.mxu0  ;;  %v2004_v1 = vpop.f32.mrf.mxu1  ;;  %v2035_v12 = vmul.f32 0.5, %v2010_v61 }
 0x41b   :  { %8355 = vtanh.f32 %v2025_v33  ;;  %v2018_v9 = vmul.f32 0.5, %v2011_v43  ;;  %v2012_v10 = vadd.f32 %v1961_v8, %v388_v24  ;;  %v2014_v52 = vadd.f32 %v2004_v1, %v501_v30 }
 0x41c   :  { %8357 = vtanh.f32 %v2009_v13 }
 0x41d   :  { %8359 = vtanh.f32 %v2018_v9  ;;  %v2026_v26 = vmul.f32 0.5, %v2012_v10  ;;  %v2036_v13 = vmul.f32 0.5, %v2014_v52 }
 0x41f   :  { %8361 = vtanh.f32 %v2026_v26 }
 0x420   :  { %8363 = vtanh.f32 %v2013_v25 }
 0x421   :  { %8365 = vtanh.f32 %v2035_v12 }
 0x422   :  { %8367 = vtanh.f32 %v2036_v13 }
 0x426   :  { %v8354_v17 = vpop.eup %8353 }
 0x427   :  { %v2021_v29 = vadd.f32 1.0, %v8354_v17 }
 0x428   :  { %v8356_v11 = vpop.eup %8355 }
 0x429   :  { %v8358_v19 = vpop.eup %8357  ;;  %v2023_v23 = vmul.f32 0.5, %v2021_v29  ;;  %v2029_v27 = vadd.f32 1.0, %v8356_v11 }
 0x42a   :  { %v8360_v35 = vpop.eup %8359 }
 0x42b   :  { %v2031_v15 = vmul.f32 0.5, %v2029_v27  ;;  %v2045_v24 = vmul.f32 %v8358_v19, %v2023_v23  ;;  %v2022_v33 = vadd.f32 1.0, %v8360_v35  ;;  %v10994_v35 = vld [vmem:[#allocation27_spill] sm:$0xff] }
 0x42c   :  { %v8362_v20 = vpop.eup %8361 }
 0x42d   :  { %v2043_v43 = vmul.f32 %v2031_v15, %v9506_v21  ;;  %v2024_v31 = vmul.f32 0.5, %v2022_v33  ;;  %v2030_v7 = vadd.f32 1.0, %v8362_v20  ;;  %v8364_v18 = vpop.eup %8363 }
 0x42e   :  { %v8366_v26 = vpop.eup %8365 }
 0x42f   :  { %v9558_v8 = vadd.f32 %v2045_v24, %v2043_v43  ;;  %v2032_v9 = vmul.f32 0.5, %v2030_v7  ;;  %v2046_v10 = vmul.f32 %v8364_v18, %v2024_v31  ;;  %v8368_v1 = vpop.eup %8367  ;;  %v2039_v22 = vadd.f32 1.0, %v8366_v26  ;;  %v10995_v43 = vld [vmem:[#allocation29_spill] sm:$0xff]  ;;  %v10996_v7 = vld [vmem:[#allocation28_spill] sm:$0xff] }
 0x430   :  { %v2040_v21 = vadd.f32 1.0, %v8368_v1 }
 0x431   :  { %8369 = vtanh.f32 %v9558_v8  ;;  %v2044_v14 = vmul.f32 %v2032_v9, %v9510_v6  ;;  %v2041_v28 = vmul.f32 0.5, %v2039_v22  ;;  %v10998_v22 = vld [vmem:[#allocation33_spill] sm:$0xff] }
 0x432   :  { %v2042_v52 = vmul.f32 0.5, %v2040_v21 }
 0x433   :  { %v9562_v25 = vadd.f32 %v2046_v10, %v2044_v14  ;;  %v10997_v14 = vld [vmem:[#allocation31_spill] sm:$0xff] }
 0x435   :  { %8371 = vtanh.f32 %v9562_v25 }
 0x43e   :  { %v8370_v30 = vpop.eup %8369 }
 0x43f   :  { %v2051_v61 = vmul.f32 %v8370_v30, %v2041_v28  ;;  %v10999_v30 = vld [vmem:[#allocation32_spill] sm:$0xff] }
 0x441   :  { %v2065_v12 = vmax.f32 %v2051_v61, 0.0 }
 0x442   :  { %v8372_v17 = vpop.eup %8371 }
 0x443   :  { %v2052_v29 = vmul.f32 %v8372_v17, %v2042_v52  ;;  %v11000_v17 = vld [vmem:[#allocation30_spill] sm:$0xff] }
 0x445   :  { %v7742_v11 = vpack.c.bf16 %v2052_v29, %v2051_v61  ;;  %v2066_v19 = vmax.f32 %v2052_v29, 0.0 }
 0x447   :  { %7743 = vst [vmem:[#allocation2] sm:$0xff] %v7742_v11   ;;  %v7747_v23 = vpack.c.bf16 %v2066_v19, %v2065_v12  ;;  %v11001_v12 = vld [vmem:[#allocation34_spill] sm:$0xff] }
 0x449   :  { %7748 = vst [vmem:[#allocation7 + $0x18] sm:$0xff] %v7747_v23  }
 0x44e   :  { %v8033_v6 = vld [vmem:[#allocation2] sm:$0xff]  }
 0x44f   :  { %2322 = vmatmul.mubr.bf16.vlgmr.msra.gmra.mxu0 %v8033_v6  ;;  %2365 = vmatmul.mubr.bf16.vlgmr.msra.gmra.mxu1 %v8033_v6 }
 0x450   :  { %2658 = vmatpush1.bf16.msra.mxu0 %v9314_v37  ;;  %2701 = vmatpush1.bf16.msra.mxu1 %v9319_v38 }
 0x451   :  { %2659 = vmatprep.subr.bf16.mxu0 %v9328_v39  ;;  %2702 = vmatprep.subr.bf16.mxu1 %v9333_v40 }
 0x452   :  { %2689 = vmatprep.mubr.bf16.mxu0 %v10976_v34  ;;  %2732 = vmatprep.mubr.bf16.mxu1 %v10976_v34 }
 0x454   :  { %2660 = vmatpush1.bf16.msra.mxu0 %v9338_v41  ;;  %2703 = vmatpush1.bf16.msra.mxu1 %v9343_v42 }
 0x455   :  { %2661 = vmatprep.subr.bf16.mxu0 %v9352_v44  ;;  %2704 = vmatprep.subr.bf16.mxu1 %v9357_v45 }
 0x458   :  { %2662 = vmatpush1.bf16.msra.mxu0 %v9362_v46  ;;  %2705 = vmatpush1.bf16.msra.mxu1 %v9367_v47 }
 0x459   :  { %2663 = vmatprep.subr.bf16.mxu0 %v9376_v48  ;;  %2706 = vmatprep.subr.bf16.mxu1 %v9381_v49 }
 0x45c   :  { %2664 = vmatpush1.bf16.msra.mxu0 %v9386_v50  ;;  %2707 = vmatpush1.bf16.msra.mxu1 %v9391_v51 }
 0x45d   :  { %2665 = vmatprep.subr.bf16.mxu0 %v9400_v53  ;;  %2708 = vmatprep.subr.bf16.mxu1 %v9405_v54 }
 0x460   :  { %2666 = vmatpush1.bf16.msra.mxu0 %v9410_v55  ;;  %2709 = vmatpush1.bf16.msra.mxu1 %v9415_v56 }
 0x461   :  { %2667 = vmatprep.subr.bf16.mxu0 %v9424_v57  ;;  %2710 = vmatprep.subr.bf16.mxu1 %v9429_v58 }
 0x464   :  { %2668 = vmatpush1.bf16.msra.mxu0 %v9434_v59  ;;  %2711 = vmatpush1.bf16.msra.mxu1 %v9439_v60 }
 0x465   :  { %2669 = vmatprep.subr.bf16.mxu0 %v9453_v63  ;;  %2712 = vmatprep.subr.bf16.mxu1 %v9463_v2 }
 0x468   :  { %2670 = vmatpush1.bf16.msra.mxu0 %v9448_v62  ;;  %2713 = vmatpush1.bf16.msra.mxu1 %v9458_v0 }
 0x469   :  { %2671 = vmatprep.subr.bf16.mxu0 %v9468_v3  ;;  %2714 = vmatprep.subr.bf16.mxu1 %v9474_v4 }
 0x46c   :  { %2672 = vmatpush1.bf16.msra.mxu0 %v9481_v5  ;;  %2715 = vmatpush1.bf16.msra.mxu1 %v9488_v32 }
 0x46d   :  { %3025 = vmatprep.subr.bf16.mxu0 %v9304_v16  ;;  %3068 = vmatprep.subr.bf16.mxu1 %v9309_v36 }
 0x50f   :  { %v2323_v27 = vpop.f32.mrf.mxu0  ;;  %v2366_v13 = vpop.f32.mrf.mxu1 }
 0x510   :  { %v2375_v15 = vadd.f32 %v2323_v27, %v10994_v35  ;;  %v2377_v18 = vadd.f32 %v2366_v13, %v10996_v7 }
 0x511   :  { %v2325_v24 = vpop.f32.mrf.mxu0  ;;  %v2368_v33 = vpop.f32.mrf.mxu1 }
 0x512   :  { %v2385_v20 = vmul.f32 0.5, %v2375_v15  ;;  %v2376_v31 = vadd.f32 %v2325_v24, %v10995_v43  ;;  %v2378_v29 = vadd.f32 %v2368_v33, %v11000_v17 }
 0x513   :  { %v2327_v9 = vpop.f32.mrf.mxu0  ;;  %v2370_v1 = vpop.f32.mrf.mxu1 }
 0x514   :  { %8373 = vtanh.f32 %v2385_v20  ;;  %v2393_v10 = vmul.f32 0.5, %v2376_v31  ;;  %v2379_v26 = vadd.f32 %v2327_v9, %v10997_v14  ;;  %v2381_v28 = vadd.f32 %v2370_v1, %v10999_v30 }
 0x515   :  { %v2329_v16 = vpop.f32.mrf.mxu0  ;;  %v2372_v52 = vpop.f32.mrf.mxu1  ;;  %v2403_v6 = vmul.f32 0.5, %v2378_v29 }
 0x516   :  { %8375 = vtanh.f32 %v2393_v10  ;;  %v2386_v36 = vmul.f32 0.5, %v2379_v26  ;;  %v2380_v21 = vadd.f32 %v2329_v16, %v10998_v22  ;;  %v2382_v11 = vadd.f32 %v2372_v52, %v11001_v12 }
 0x517   :  { %8377 = vtanh.f32 %v2377_v18 }
 0x518   :  { %8379 = vtanh.f32 %v2386_v36  ;;  %v2394_v61 = vmul.f32 0.5, %v2380_v21  ;;  %v2404_v24 = vmul.f32 0.5, %v2382_v11 }
 0x51a   :  { %8381 = vtanh.f32 %v2394_v61 }
 0x51b   :  { %8383 = vtanh.f32 %v2381_v28 }
 0x51c   :  { %8385 = vtanh.f32 %v2403_v6 }
 0x51d   :  { %8387 = vtanh.f32 %v2404_v24 }
 0x521   :  { %v8374_v19 = vpop.eup %8373 }
 0x522   :  { %v2389_v23 = vadd.f32 1.0, %v8374_v19 }
 0x523   :  { %v8376_v27 = vpop.eup %8375 }
 0x524   :  { %v8378_v13 = vpop.eup %8377  ;;  %v2391_v35 = vmul.f32 0.5, %v2389_v23  ;;  %v2397_v15 = vadd.f32 1.0, %v8376_v27 }
 0x525   :  { %v8380_v20 = vpop.eup %8379 }
 0x526   :  { %v2399_v43 = vmul.f32 0.5, %v2397_v15  ;;  %v2413_v31 = vmul.f32 %v8378_v13, %v2391_v35  ;;  %v2390_v7 = vadd.f32 1.0, %v8380_v20 }
 0x527   :  { %v8382_v18 = vpop.eup %8381 }
 0x528   :  { %v2411_v9 = vmul.f32 %v2399_v43, %v9558_v8  ;;  %v2392_v10 = vmul.f32 0.5, %v2390_v7  ;;  %v2398_v33 = vadd.f32 1.0, %v8382_v18  ;;  %v8384_v14 = vpop.eup %8383 }
 0x529   :  { %v8386_v21 = vpop.eup %8385 }
 0x52a   :  { %v9608_v26 = vadd.f32 %v2413_v31, %v2411_v9  ;;  %v2400_v1 = vmul.f32 0.5, %v2398_v33  ;;  %v2414_v16 = vmul.f32 %v8384_v14, %v2392_v10  ;;  %v8388_v30 = vpop.eup %8387  ;;  %v2407_v28 = vadd.f32 1.0, %v8386_v21 }
 0x52b   :  { %v2408_v8 = vadd.f32 1.0, %v8388_v30 }
 0x52c   :  { %8389 = vtanh.f32 %v9608_v26  ;;  %v2412_v36 = vmul.f32 %v2400_v1, %v9562_v25  ;;  %v2409_v52 = vmul.f32 0.5, %v2407_v28 }
 0x52d   :  { %v2410_v29 = vmul.f32 0.5, %v2408_v8 }
 0x52e   :  { %v9612_v22 = vadd.f32 %v2414_v16, %v2412_v36 }
 0x530   :  { %8391 = vtanh.f32 %v9612_v22 }
 0x539   :  { %v8390_v61 = vpop.eup %8389 }
 0x53a   :  { %v2419_v17 = vmul.f32 %v8390_v61, %v2409_v52 }
 0x53c   :  { %v2433_v19 = vmax.f32 %v2419_v17, 0.0 }
 0x53d   :  { %v8392_v12 = vpop.eup %8391 }
 0x53e   :  { %v2420_v11 = vmul.f32 %v8392_v12, %v2410_v29 }
 0x540   :  { %v7752_v23 = vpack.c.bf16 %v2420_v11, %v2419_v17  ;;  %v2434_v6 = vmax.f32 %v2420_v11, 0.0 }
 0x542   :  { %v7757_v27 = vpack.c.bf16 %v2434_v6, %v2433_v19  ;;  %7753 = vst [vmem:[#allocation2] sm:$0xff] %v7752_v23  }
 0x544   :  { %7758 = vst [vmem:[#allocation7 + $0x20] sm:$0xff] %v7757_v27  }
 0x549   :  { %v8034_v25 = vld [vmem:[#allocation2] sm:$0xff]  }
 0x54a   :  { %2690 = vmatmul.mubr.bf16.vlgmr.msra.gmra.mxu0 %v8034_v25  ;;  %2733 = vmatmul.mubr.bf16.vlgmr.msra.gmra.mxu1 %v8034_v25 }
 0x54b   :  { %3026 = vmatpush1.bf16.msra.mxu0 %v9314_v37  ;;  %3069 = vmatpush1.bf16.msra.mxu1 %v9319_v38 }
 0x54c   :  { %3027 = vmatprep.subr.bf16.mxu0 %v9328_v39  ;;  %3070 = vmatprep.subr.bf16.mxu1 %v9333_v40  ;;  %v11002_v39 = vld [vmem:[#allocation35_spill] sm:$0xff] }
 0x54d   :  { %3057 = vmatprep.mubr.bf16.mxu0 %v10976_v34  ;;  %3100 = vmatprep.mubr.bf16.mxu1 %v10976_v34 }
 0x54f   :  { %3028 = vmatpush1.bf16.msra.mxu0 %v9338_v41  ;;  %3071 = vmatpush1.bf16.msra.mxu1 %v9343_v42 }
 0x550   :  { %3029 = vmatprep.subr.bf16.mxu0 %v9352_v44  ;;  %3072 = vmatprep.subr.bf16.mxu1 %v9357_v45  ;;  %v11003_v45 = vld [vmem:[#allocation37_spill] sm:$0xff] }
 0x553   :  { %3030 = vmatpush1.bf16.msra.mxu0 %v9362_v46  ;;  %3073 = vmatpush1.bf16.msra.mxu1 %v9367_v47  ;;  %v11004_v47 = vld [vmem:[#allocation36_spill] sm:$0xff] }
 0x554   :  { %3031 = vmatprep.subr.bf16.mxu0 %v9376_v48  ;;  %3074 = vmatprep.subr.bf16.mxu1 %v9381_v49 }
 0x557   :  { %3032 = vmatpush1.bf16.msra.mxu0 %v9386_v50  ;;  %3075 = vmatpush1.bf16.msra.mxu1 %v9391_v51  ;;  %v11005_v51 = vld [vmem:[#allocation39_spill] sm:$0xff] }
 0x558   :  { %3033 = vmatprep.subr.bf16.mxu0 %v9400_v53  ;;  %3076 = vmatprep.subr.bf16.mxu1 %v9405_v54 }
 0x55b   :  { %3034 = vmatpush1.bf16.msra.mxu0 %v9410_v55  ;;  %3077 = vmatpush1.bf16.msra.mxu1 %v9415_v56 }
 0x55c   :  { %3035 = vmatprep.subr.bf16.mxu0 %v9424_v57  ;;  %3078 = vmatprep.subr.bf16.mxu1 %v9429_v58  ;;  %v11006_v57 = vld [vmem:[#allocation41_spill] sm:$0xff] }
 0x55f   :  { %3036 = vmatpush1.bf16.msra.mxu0 %v9434_v59  ;;  %3079 = vmatpush1.bf16.msra.mxu1 %v9439_v60  ;;  %v11007_v59 = vld [vmem:[#allocation40_spill] sm:$0xff] }
 0x560   :  { %3037 = vmatprep.subr.bf16.mxu0 %v9453_v63  ;;  %3080 = vmatprep.subr.bf16.mxu1 %v9463_v2 }
 0x563   :  { %3038 = vmatpush1.bf16.msra.mxu0 %v9448_v62  ;;  %3081 = vmatpush1.bf16.msra.mxu1 %v9458_v0  ;;  %v11008_v0 = vld [vmem:[#allocation38_spill] sm:$0xff] }
 0x564   :  { %3039 = vmatprep.subr.bf16.mxu0 %v9468_v3  ;;  %3082 = vmatprep.subr.bf16.mxu1 %v9474_v4  ;;  %v11009_v3 = vld [vmem:[#allocation42_spill] sm:$0xff] }
 0x567   :  { %3040 = vmatpush1.bf16.msra.mxu0 %v9481_v5  ;;  %3083 = vmatpush1.bf16.msra.mxu1 %v9488_v32 }
 0x60a   :  { %v2691_v37 = vpop.f32.mrf.mxu0  ;;  %v2734_v38 = vpop.f32.mrf.mxu1 }
 0x60b   :  { %v2743_v40 = vadd.f32 %v2691_v37, %v11002_v39  ;;  %v2745_v48 = vadd.f32 %v2734_v38, %v11004_v47  ;;  %v8038_v39 = vld [vmem:[%s10912_s2 + $0xe4] ss:$16 sps:$4 sm:$0xff]   ;;  %v8045_v47 = vld [vmem:[%s10912_s2 + $0xc8] ss:$16 sps:$4 sm:$0xff]  }
 0x60c   :  { %v2693_v41 = vpop.f32.mrf.mxu0  ;;  %v2736_v42 = vpop.f32.mrf.mxu1  ;;  %3393 = vmatprep.subr.bf16.mxu0 %v8038_v39 }
 0x60d   :  { %v2753_v44 = vmul.f32 0.5, %v2743_v40  ;;  %v2744_v46 = vadd.f32 %v2693_v41, %v11003_v45  ;;  %v2746_v2 = vadd.f32 %v2736_v42, %v11008_v0  ;;  %v8041_v40 = vld [vmem:[%s10912_s2 + $0xec] ss:$16 sps:$4 sm:$0xff]   ;;  %v8036_v41 = vld [vmem:[%s10912_s2 + $0xe0] ss:$16 sps:$4 sm:$0xff]  }
 0x60e   :  { %v2695_v49 = vpop.f32.mrf.mxu0  ;;  %v2738_v54 = vpop.f32.mrf.mxu1  ;;  %v8039_v42 = vld [vmem:[%s10912_s2 + $0xe8] ss:$16 sps:$4 sm:$0xff]   ;;  %3436 = vmatprep.subr.bf16.mxu1 %v8041_v40  ;;  %v8047_v45 = vld [vmem:[%s10912_s2 + $0xcc] ss:$16 sps:$4 sm:$0xff]   ;;  %v8066_v0 = vld [vmem:[%s10912_s2 + $0x40] ss:$16 sps:$4 sm:$0xff]  }
 0x60f   :  { %8393 = vtanh.f32 %v2753_v44  ;;  %v2761_v50 = vmul.f32 0.5, %v2744_v46  ;;  %v2747_v53 = vadd.f32 %v2695_v49, %v11005_v51  ;;  %v2749_v60 = vadd.f32 %v2738_v54, %v11007_v59  ;;  %v8044_v44 = vld [vmem:[%s10912_s2 + $0xc4] ss:$16 sps:$4 sm:$0xff]   ;;  %v8042_v46 = vld [vmem:[%s10912_s2 + $0xc0] ss:$16 sps:$4 sm:$0xff]  }
 0x610   :  { %v2697_v55 = vpop.f32.mrf.mxu0  ;;  %v2740_v63 = vpop.f32.mrf.mxu1  ;;  %v2771_v13 = vmul.f32 0.5, %v2746_v2  ;;  %v8053_v49 = vld [vmem:[%s10912_s2 + $0xac] ss:$16 sps:$4 sm:$0xff]   ;;  %v8051_v51 = vld [vmem:[%s10912_s2 + $0xa8] ss:$16 sps:$4 sm:$0xff]  }
 0x611   :  { %8395 = vtanh.f32 %v2761_v50  ;;  %v2754_v56 = vmul.f32 0.5, %v2747_v53  ;;  %v2748_v58 = vadd.f32 %v2697_v55, %v11006_v57  ;;  %v2750_v4 = vadd.f32 %v2740_v63, %v11009_v3  ;;  %v8048_v50 = vld [vmem:[%s10912_s2 + $0xa0] ss:$16 sps:$4 sm:$0xff]   ;;  %v8056_v53 = vld [vmem:[%s10912_s2 + $0x84] ss:$16 sps:$4 sm:$0xff]  }
 0x612   :  { %8397 = vtanh.f32 %v2745_v48  ;;  %v8050_v48 = vld [vmem:[%s10912_s2 + $0xa4] ss:$16 sps:$4 sm:$0xff]   ;;  %v8059_v54 = vld [vmem:[%s10912_s2 + $0x8c] ss:$16 sps:$4 sm:$0xff]   ;;  %v8054_v55 = vld [vmem:[%s10912_s2 + $0x80] ss:$16 sps:$4 sm:$0xff]  }
 0x613   :  { %8399 = vtanh.f32 %v2754_v56  ;;  %v2762_v62 = vmul.f32 0.5, %v2748_v58  ;;  %v2772_v43 = vmul.f32 0.5, %v2750_v4  ;;  %v8057_v56 = vld [vmem:[%s10912_s2 + $0x88] ss:$16 sps:$4 sm:$0xff]   ;;  %v8062_v57 = vld [vmem:[%s10912_s2 + $0x64] ss:$16 sps:$4 sm:$0xff]  }
 0x614   :  { %v8065_v58 = vld [vmem:[%s10912_s2 + $0x6c] ss:$16 sps:$4 sm:$0xff]   ;;  %v8060_v59 = vld [vmem:[%s10912_s2 + $0x60] ss:$16 sps:$4 sm:$0xff]   ;;  %v8069_v2 = vld [vmem:[%s10912_s2 + $0x48] ss:$16 sps:$4 sm:$0xff]  }
 0x615   :  { %8401 = vtanh.f32 %v2762_v62  ;;  %v8068_v62 = vld [vmem:[%s10912_s2 + $0x44] ss:$16 sps:$4 sm:$0xff]   ;;  %v8071_v63 = vld [vmem:[%s10912_s2 + $0x4c] ss:$16 sps:$4 sm:$0xff]  }
 0x616   :  { %8403 = vtanh.f32 %v2749_v60  ;;  %v8063_v60 = vld [vmem:[%s10912_s2 + $0x68] ss:$16 sps:$4 sm:$0xff]   ;;  %v8074_v3 = vld [vmem:[%s10912_s2 + $0x24] ss:$16 sps:$4 sm:$0xff]   ;;  %v8077_v4 = vld [vmem:[%s10912_s2 + $0x2c] ss:$16 sps:$4 sm:$0xff]  }
 0x617   :  { %8405 = vtanh.f32 %v2771_v13  ;;  %v8078_v13 = vld [vmem:[%s10912_s2] ss:$16 sps:$4 sm:$0xff]  }
 0x618   :  { %8407 = vtanh.f32 %v2772_v43  ;;  %v8089_v43 = vld [vmem:[%s10914_s4 + $0xec] ss:$16 sps:$4 sm:$0xff]  }
 0x61c   :  { %v8394_v5 = vpop.eup %8393 }
 0x61d   :  { %v2757_v32 = vadd.f32 1.0, %v8394_v5  ;;  %v8072_v5 = vld [vmem:[%s10912_s2 + $0x20] ss:$16 sps:$4 sm:$0xff]  }
 0x61e   :  { %v8396_v35 = vpop.eup %8395 }
 0x61f   :  { %v8398_v15 = vpop.eup %8397  ;;  %v2759_v24 = vmul.f32 0.5, %v2757_v32  ;;  %v2765_v20 = vadd.f32 1.0, %v8396_v35  ;;  %v8075_v32 = vld [vmem:[%s10912_s2 + $0x28] ss:$16 sps:$4 sm:$0xff]   ;;  %v8080_v35 = vld [vmem:[%s10912_s2 + $0x4] ss:$16 sps:$4 sm:$0xff]  }
 0x620   :  { %v8400_v31 = vpop.eup %8399 }
 0x621   :  { %v2767_v7 = vmul.f32 0.5, %v2765_v20  ;;  %v2781_v18 = vmul.f32 %v8398_v15, %v2759_v24  ;;  %v2758_v9 = vadd.f32 1.0, %v8400_v31  ;;  %v8083_v15 = vld [vmem:[%s10912_s2 + $0xc] ss:$16 sps:$4 sm:$0xff]   ;;  %v8081_v24 = vld [vmem:[%s10912_s2 + $0x8] ss:$16 sps:$4 sm:$0xff]  }
 0x622   :  { %v8402_v10 = vpop.eup %8401  ;;  %v8086_v20 = vld [vmem:[%s10914_s4 + $0xe4] ss:$16 sps:$4 sm:$0xff]  }
 0x623   :  { %v2779_v33 = vmul.f32 %v2767_v7, %v9608_v26  ;;  %v2760_v14 = vmul.f32 0.5, %v2758_v9  ;;  %v2766_v1 = vadd.f32 1.0, %v8402_v10  ;;  %v8404_v16 = vpop.eup %8403 }
 0x624   :  { %v8406_v61 = vpop.eup %8405 }
 0x625   :  { %v9656_v36 = vadd.f32 %v2781_v18, %v2779_v33  ;;  %v2768_v21 = vmul.f32 0.5, %v2766_v1  ;;  %v2782_v30 = vmul.f32 %v8404_v16, %v2760_v14  ;;  %v8408_v52 = vpop.eup %8407  ;;  %v2775_v17 = vadd.f32 1.0, %v8406_v61  ;;  %v11010_v18 = vld [vmem:[#allocation43_spill] sm:$0xff]  ;;  %v11011_v1 = vld [vmem:[#allocation45_spill] sm:$0xff] }
 0x626   :  { %v2776_v26 = vadd.f32 1.0, %v8408_v52  ;;  %v11013_v52 = vld [vmem:[#allocation47_spill] sm:$0xff] }
 0x627   :  { %8409 = vtanh.f32 %v9656_v36  ;;  %v2780_v28 = vmul.f32 %v2768_v21, %v9612_v22  ;;  %v2777_v12 = vmul.f32 0.5, %v2775_v17  ;;  %v11012_v21 = vld [vmem:[#allocation44_spill] sm:$0xff] }
 0x628   :  { %v2778_v19 = vmul.f32 0.5, %v2776_v26 }
 0x629   :  { %v9660_v8 = vadd.f32 %v2782_v30, %v2780_v28 }
 0x62b   :  { %8411 = vtanh.f32 %v9660_v8 }
 0x634   :  { %v8410_v29 = vpop.eup %8409 }
 0x635   :  { %v2787_v11 = vmul.f32 %v8410_v29, %v2777_v12 }
 0x637   :  { %v2801_v27 = vmax.f32 %v2787_v11, 0.0 }
 0x638   :  { %v8412_v23 = vpop.eup %8411 }
 0x639   :  { %v2788_v6 = vmul.f32 %v8412_v23, %v2778_v19  ;;  %v11015_v23 = vld [vmem:[#allocation48_spill] sm:$0xff] }
 0x63b   :  { %v7762_v25 = vpack.c.bf16 %v2788_v6, %v2787_v11  ;;  %v2802_v37 = vmax.f32 %v2788_v6, 0.0  ;;  %v11014_v11 = vld [vmem:[#allocation49_spill] sm:$0xff] }
 0x63d   :  { %v7767_v38 = vpack.c.bf16 %v2802_v37, %v2801_v27  ;;  %7763 = vst [vmem:[#allocation2] sm:$0xff] %v7762_v25   ;;  %v11016_v37 = vld [vmem:[#allocation46_spill] sm:$0xff] }
 0x63f   :  { %7768 = vst [vmem:[#allocation7 + $0x28] sm:$0xff] %v7767_v38  }
 0x644   :  { %v8035_v22 = vld [vmem:[#allocation2] sm:$0xff]  }
 0x645   :  { %3058 = vmatmul.mubr.bf16.vlgmr.msra.gmra.mxu0 %v8035_v22  ;;  %3101 = vmatmul.mubr.bf16.vlgmr.msra.gmra.mxu1 %v8035_v22  ;;  %v11017_v22 = vld [vmem:[#allocation50_spill] sm:$0xff] }
 0x646   :  { %3425 = vmatprep.mubr.bf16.mxu0 %v10976_v34  ;;  %3468 = vmatprep.mubr.bf16.mxu1 %v10976_v34 }
 0x647   :  { %3394 = vmatpush1.bf16.msra.mxu0 %v8036_v41  ;;  %3437 = vmatpush1.bf16.msra.mxu1 %v8039_v42 }
 0x648   :  { %3395 = vmatprep.subr.bf16.mxu0 %v8044_v44  ;;  %3438 = vmatprep.subr.bf16.mxu1 %v8047_v45 }
 0x64b   :  { %3396 = vmatpush1.bf16.msra.mxu0 %v8042_v46  ;;  %3439 = vmatpush1.bf16.msra.mxu1 %v8045_v47 }
 0x64c   :  { %3397 = vmatprep.subr.bf16.mxu0 %v8050_v48  ;;  %3440 = vmatprep.subr.bf16.mxu1 %v8053_v49 }
 0x64f   :  { %3398 = vmatpush1.bf16.msra.mxu0 %v8048_v50  ;;  %3441 = vmatpush1.bf16.msra.mxu1 %v8051_v51 }
 0x650   :  { %3399 = vmatprep.subr.bf16.mxu0 %v8056_v53  ;;  %3442 = vmatprep.subr.bf16.mxu1 %v8059_v54 }
 0x653   :  { %3400 = vmatpush1.bf16.msra.mxu0 %v8054_v55  ;;  %3443 = vmatpush1.bf16.msra.mxu1 %v8057_v56 }
 0x654   :  { %3401 = vmatprep.subr.bf16.mxu0 %v8062_v57  ;;  %3444 = vmatprep.subr.bf16.mxu1 %v8065_v58 }
 0x657   :  { %3402 = vmatpush1.bf16.msra.mxu0 %v8060_v59  ;;  %3445 = vmatpush1.bf16.msra.mxu1 %v8063_v60 }
 0x658   :  { %3403 = vmatprep.subr.bf16.mxu0 %v8068_v62  ;;  %3446 = vmatprep.subr.bf16.mxu1 %v8071_v63 }
 0x65b   :  { %3404 = vmatpush1.bf16.msra.mxu0 %v8066_v0  ;;  %3447 = vmatpush1.bf16.msra.mxu1 %v8069_v2 }
 0x65c   :  { %3405 = vmatprep.subr.bf16.mxu0 %v8074_v3  ;;  %3448 = vmatprep.subr.bf16.mxu1 %v8077_v4 }
 0x65f   :  { %3406 = vmatpush1.bf16.msra.mxu0 %v8072_v5  ;;  %3449 = vmatpush1.bf16.msra.mxu1 %v8075_v32 }
 0x660   :  { %3407 = vmatprep.subr.bf16.mxu0 %v8080_v35  ;;  %3450 = vmatprep.subr.bf16.mxu1 %v8083_v15 }
 0x663   :  { %3408 = vmatpush1.bf16.msra.mxu0 %v8078_v13  ;;  %3451 = vmatpush1.bf16.msra.mxu1 %v8081_v24 }
 0x664   :  { %3828 = vmatprep.subr.bf16.mxu0 %v8086_v20  ;;  %3941 = vmatprep.subr.bf16.mxu1 %v8089_v43 }
 0x705   :  { %v3059_v31 = vpop.f32.mrf.mxu0  ;;  %v3102_v7 = vpop.f32.mrf.mxu1 }
 0x706   :  { %v3111_v9 = vadd.f32 %v3059_v31, %v11010_v18  ;;  %v3113_v30 = vadd.f32 %v3102_v7, %v11012_v21  ;;  %v8087_v18 = vld [vmem:[%s10914_s4 + $0xe8] ss:$16 sps:$4 sm:$0xff]   ;;  %v8102_v21 = vld [vmem:[%s10914_s4 + $0xac] ss:$16 sps:$4 sm:$0xff]  }
 0x707   :  { %v3061_v10 = vpop.f32.mrf.mxu0  ;;  %v3104_v33 = vpop.f32.mrf.mxu1 }
 0x708   :  { %v3121_v14 = vmul.f32 0.5, %v3111_v9  ;;  %v3112_v16 = vadd.f32 %v3061_v10, %v11011_v1  ;;  %v3114_v38 = vadd.f32 %v3104_v33, %v11016_v37  ;;  %v8093_v9 = vld [vmem:[%s10914_s4 + $0xc4] ss:$16 sps:$4 sm:$0xff]   ;;  %v8096_v10 = vld [vmem:[%s10914_s4 + $0xcc] ss:$16 sps:$4 sm:$0xff]  }
 0x709   :  { %v3063_v28 = vpop.f32.mrf.mxu0  ;;  %v3106_v26 = vpop.f32.mrf.mxu1  ;;  %v8094_v1 = vld [vmem:[%s10914_s4 + $0xc8] ss:$16 sps:$4 sm:$0xff]   ;;  %v8123_v37 = vld [vmem:[%s10914_s4 + $0x24] ss:$16 sps:$4 sm:$0xff]  }
 0x70a   :  { %8413 = vtanh.f32 %v3121_v14  ;;  %v3129_v61 = vmul.f32 0.5, %v3112_v16  ;;  %v3115_v17 = vadd.f32 %v3063_v28, %v11013_v52  ;;  %v3117_v6 = vadd.f32 %v3106_v26, %v11015_v23  ;;  %v8091_v14 = vld [vmem:[%s10914_s4 + $0xc0] ss:$16 sps:$4 sm:$0xff]   ;;  %v8099_v16 = vld [vmem:[%s10914_s4 + $0xa4] ss:$16 sps:$4 sm:$0xff]  }
 0x70b   :  { %v3065_v29 = vpop.f32.mrf.mxu0  ;;  %v3108_v25 = vpop.f32.mrf.mxu1  ;;  %v3139_v42 = vmul.f32 0.5, %v3114_v38  ;;  %v8100_v28 = vld [vmem:[%s10914_s4 + $0xa8] ss:$16 sps:$4 sm:$0xff]   ;;  %v8108_v52 = vld [vmem:[%s10914_s4 + $0x8c] ss:$16 sps:$4 sm:$0xff]  }
 0x70c   :  { %8415 = vtanh.f32 %v3129_v61  ;;  %v3122_v12 = vmul.f32 0.5, %v3115_v17  ;;  %v3116_v19 = vadd.f32 %v3065_v29, %v11014_v11  ;;  %v3118_v39 = vadd.f32 %v3108_v25, %v11017_v22  ;;  %v8105_v61 = vld [vmem:[%s10914_s4 + $0x84] ss:$16 sps:$4 sm:$0xff]   ;;  %v8103_v17 = vld [vmem:[%s10914_s4 + $0x80] ss:$16 sps:$4 sm:$0xff]  }
 0x70d   :  { %8417 = vtanh.f32 %v3113_v30  ;;  %v8097_v30 = vld [vmem:[%s10914_s4 + $0xa0] ss:$16 sps:$4 sm:$0xff]   ;;  %v8106_v26 = vld [vmem:[%s10914_s4 + $0x88] ss:$16 sps:$4 sm:$0xff]   ;;  %v8111_v29 = vld [vmem:[%s10914_s4 + $0x64] ss:$16 sps:$4 sm:$0xff]  }
 0x70e   :  { %8419 = vtanh.f32 %v3122_v12  ;;  %v3130_v27 = vmul.f32 0.5, %v3116_v19  ;;  %v3140_v48 = vmul.f32 0.5, %v3118_v39  ;;  %v8114_v12 = vld [vmem:[%s10914_s4 + $0x6c] ss:$16 sps:$4 sm:$0xff]   ;;  %v8109_v11 = vld [vmem:[%s10914_s4 + $0x60] ss:$16 sps:$4 sm:$0xff]  }
 0x70f   :  { %v8112_v19 = vld [vmem:[%s10914_s4 + $0x68] ss:$16 sps:$4 sm:$0xff]   ;;  %v8117_v23 = vld [vmem:[%s10914_s4 + $0x44] ss:$16 sps:$4 sm:$0xff]   ;;  %v8126_v38 = vld [vmem:[%s10914_s4 + $0x2c] ss:$16 sps:$4 sm:$0xff]  }
 0x710   :  { %8421 = vtanh.f32 %v3130_v27  ;;  %v8115_v27 = vld [vmem:[%s10914_s4 + $0x40] ss:$16 sps:$4 sm:$0xff]   ;;  %v8118_v25 = vld [vmem:[%s10914_s4 + $0x48] ss:$16 sps:$4 sm:$0xff]  }
 0x711   :  { %8423 = vtanh.f32 %v3117_v6  ;;  %v8120_v6 = vld [vmem:[%s10914_s4 + $0x4c] ss:$16 sps:$4 sm:$0xff]   ;;  %v8121_v22 = vld [vmem:[%s10914_s4 + $0x20] ss:$16 sps:$4 sm:$0xff]   ;;  %v8124_v39 = vld [vmem:[%s10914_s4 + $0x28] ss:$16 sps:$4 sm:$0xff]  }
 0x712   :  { %8425 = vtanh.f32 %v3139_v42  ;;  %v8127_v42 = vld [vmem:[%s10914_s4] ss:$16 sps:$4 sm:$0xff]  }
 0x713   :  { %8427 = vtanh.f32 %v3140_v48  ;;  %v8136_v48 = vld [vmem:[#allocation7 + $0x18] sm:$0xff]  }
 0x717   :  { %v8414_v40 = vpop.eup %8413 }
 0x718   :  { %v3125_v41 = vadd.f32 1.0, %v8414_v40  ;;  %v8129_v40 = vld [vmem:[%s10914_s4 + $0x4] ss:$16 sps:$4 sm:$0xff]  }
 0x719   :  { %v8416_v44 = vpop.eup %8415 }
 0x71a   :  { %v8418_v45 = vpop.eup %8417  ;;  %v3127_v46 = vmul.f32 0.5, %v3125_v41  ;;  %v3133_v47 = vadd.f32 1.0, %v8416_v44  ;;  %v8132_v41 = vld [vmem:[%s10914_s4 + $0xc] ss:$16 sps:$4 sm:$0xff]   ;;  %v8130_v44 = vld [vmem:[%s10914_s4 + $0x8] ss:$16 sps:$4 sm:$0xff]  }
 0x71b   :  { %v8420_v49 = vpop.eup %8419 }
 0x71c   :  { %v3135_v50 = vmul.f32 0.5, %v3133_v47  ;;  %v3149_v51 = vmul.f32 %v8418_v45, %v3127_v46  ;;  %v3126_v53 = vadd.f32 1.0, %v8420_v49  ;;  %v8133_v45 = vld [vmem:[#allocation7] sm:$0xff]   ;;  %v8134_v46 = vld [vmem:[#allocation7 + $0x8] sm:$0xff]   ;;  %v8135_v47 = vld [vmem:[#allocation7 + $0x10] sm:$0xff]  }
 0x71d   :  { %v8422_v54 = vpop.eup %8421  ;;  %v8137_v49 = vld [vmem:[#allocation7 + $0x20] sm:$0xff]  }
 0x71e   :  { %v3147_v55 = vmul.f32 %v3135_v50, %v9656_v36  ;;  %v3128_v56 = vmul.f32 0.5, %v3126_v53  ;;  %v3134_v57 = vadd.f32 1.0, %v8422_v54  ;;  %v8424_v58 = vpop.eup %8423  ;;  %v8138_v50 = vld [vmem:[#allocation7 + $0x28] sm:$0xff]   ;;  %v9892_v53 = vld [vmem:[%s10915_s5 + $0xe4] ss:$16 sps:$4 sm:$0xff]  }
 0x71f   :  { %v8426_v2 = vpop.eup %8425  ;;  %v9897_v54 = vld [vmem:[%s10915_s5 + $0xe0] ss:$16 sps:$4 sm:$0xff]  }
 0x720   :  { %v9776_v59 = vadd.f32 %v3149_v51, %v3147_v55  ;;  %v3136_v60 = vmul.f32 0.5, %v3134_v57  ;;  %v3150_v62 = vmul.f32 %v8424_v58, %v3128_v56  ;;  %v8428_v3 = vpop.eup %8427  ;;  %v3143_v4 = vadd.f32 1.0, %v8426_v2  ;;  %v9903_v55 = vld [vmem:[%s10915_s5 + $0xe8] ss:$16 sps:$4 sm:$0xff]   ;;  %v9909_v56 = vld [vmem:[%s10915_s5 + $0xec] ss:$16 sps:$4 sm:$0xff]  }
 0x721   :  { %v3144_v36 = vadd.f32 1.0, %v8428_v3  ;;  %v9914_v57 = vld [vmem:[%s10915_s5 + $0xc4] ss:$16 sps:$4 sm:$0xff]   ;;  %v9919_v58 = vld [vmem:[%s10915_s5 + $0xc0] ss:$16 sps:$4 sm:$0xff]  }
 0x722   :  { %8429 = vtanh.f32 %v9776_v59  ;;  %v3148_v63 = vmul.f32 %v3136_v60, %v9660_v8  ;;  %v3145_v32 = vmul.f32 0.5, %v3143_v4  ;;  %v8084_v8 = vld [vmem:[%s10914_s4 + $0xe0] ss:$16 sps:$4 sm:$0xff]   ;;  %v9925_v60 = vld [vmem:[%s10915_s5 + $0xc8] ss:$16 sps:$4 sm:$0xff]  }
 0x723   :  { %v3146_v35 = vmul.f32 0.5, %v3144_v36  ;;  %v9944_v2 = vld [vmem:[%s10915_s5 + $0xac] ss:$16 sps:$4 sm:$0xff]   ;;  %v9949_v3 = vld [vmem:[%s10915_s5 + $0xa0] ss:$16 sps:$4 sm:$0xff]  }
 0x724   :  { %v9780_v0 = vadd.f32 %v3150_v62, %v3148_v63  ;;  %v9930_v62 = vld [vmem:[%s10915_s5 + $0xcc] ss:$16 sps:$4 sm:$0xff]   ;;  %v9939_v63 = vld [vmem:[%s10915_s5 + $0xa4] ss:$16 sps:$4 sm:$0xff]   ;;  %v9954_v4 = vld [vmem:[%s10915_s5 + $0xa8] ss:$16 sps:$4 sm:$0xff]  }
 0x725   :  { %v9963_v36 = vld [vmem:[%s10915_s5 + $0x84] ss:$16 sps:$4 sm:$0xff]  }
 0x726   :  { %8431 = vtanh.f32 %v9780_v0 }
 0x72f   :  { %v8430_v5 = vpop.eup %8429 }
 0x730   :  { %v3155_v13 = vmul.f32 %v8430_v5, %v3145_v32  ;;  %v9968_v5 = vld [vmem:[%s10915_s5 + $0x8c] ss:$16 sps:$4 sm:$0xff]   ;;  %v9973_v32 = vld [vmem:[%s10915_s5 + $0x80] ss:$16 sps:$4 sm:$0xff]  }
 0x732   :  { %v3169_v20 = vmax.f32 %v3155_v13, 0.0 }
 0x733   :  { %v8432_v15 = vpop.eup %8431 }
 0x734   :  { %v3156_v24 = vmul.f32 %v8432_v15, %v3146_v35  ;;  %v9985_v35 = vld [vmem:[%s10915_s5 + $0x88] ss:$16 sps:$4 sm:$0xff]   ;;  %v9991_v15 = vld [vmem:[%s10915_s5 + $0x60] ss:$16 sps:$4 sm:$0xff]  }
 0x736   :  { %v7772_v43 = vpack.c.bf16 %v3156_v24, %v3155_v13  ;;  %v3170_v31 = vmax.f32 %v3156_v24, 0.0  ;;  %v9980_v13 = vld [vmem:[%s10915_s5 + $0x64] ss:$16 sps:$4 sm:$0xff]  }
 0x737   :  { %v9997_v24 = vld [vmem:[%s10915_s5 + $0x44] ss:$16 sps:$4 sm:$0xff]  }
 0x738   :  { %v7777_v7 = vpack.c.bf16 %v3170_v31, %v3169_v20  ;;  %7773 = vst [vmem:[#allocation2] sm:$0xff] %v7772_v43   ;;  %v10002_v20 = vld [vmem:[%s10915_s5 + $0x6c] ss:$16 sps:$4 sm:$0xff]   ;;  %v10009_v43 = vld [vmem:[%s10915_s5 + $0x40] ss:$16 sps:$4 sm:$0xff]  }
 0x739   :  { %v10014_v31 = vld [vmem:[%s10915_s5 + $0x68] ss:$16 sps:$4 sm:$0xff]  }
 0x73a   :  { %7778 = vst [vmem:[#allocation7 + $0x30] sm:$0xff] %v7777_v7   ;;  %v10019_v7 = vld [vmem:[%s10915_s5 + $0x24] ss:$16 sps:$4 sm:$0xff]  }
 0x73f   :  { %v8090_v33 = vld [vmem:[#allocation2] sm:$0xff]  }
 0x740   :  { %3426 = vmatmul.mubr.bf16.vlgmr.msra.gmra.mxu0 %v8090_v33  ;;  %3469 = vmatmul.mubr.bf16.vlgmr.msra.gmra.mxu1 %v8090_v33  ;;  %v10051_v33 = vld [vmem:[%s10915_s5 + $0x28] ss:$16 sps:$4 sm:$0xff]  }
 0x741   :  { %3829 = vmatpush1.bf16.msra.mxu0 %v8084_v8  ;;  %3942 = vmatpush1.bf16.msra.mxu1 %v8087_v18  ;;  %v8139_v51 = vld [vmem:[#allocation7 + $0x30] sm:$0xff]   ;;  %v10026_v8 = vld [vmem:[%s10915_s5 + $0x4c] ss:$16 sps:$4 sm:$0xff]   ;;  %v10032_v18 = vld [vmem:[%s10915_s5 + $0x48] ss:$16 sps:$4 sm:$0xff]  }
 0x742   :  { %3830 = vmatprep.subr.bf16.mxu0 %v8093_v9  ;;  %3943 = vmatprep.subr.bf16.mxu1 %v8096_v10  ;;  %v10037_v9 = vld [vmem:[%s10915_s5 + $0x20] ss:$16 sps:$4 sm:$0xff]   ;;  %v10046_v10 = vld [vmem:[%s10915_s5 + $0x2c] ss:$16 sps:$4 sm:$0xff]  }
 0x743   :  { %3860 = vmatprep.mubr.bf16.mxu0 %v10976_v34  ;;  %3973 = vmatprep.mubr.bf16.mxu1 %v10976_v34 }
 0x745   :  { %3831 = vmatpush1.bf16.msra.mxu0 %v8091_v14  ;;  %3944 = vmatpush1.bf16.msra.mxu1 %v8094_v1  ;;  %v10057_v14 = vld [vmem:[%s10915_s5] ss:$16 sps:$4 sm:$0xff]   ;;  %v10062_v1 = vld [vmem:[%s10915_s5 + $0x4] ss:$16 sps:$4 sm:$0xff]  }
 0x746   :  { %3832 = vmatprep.subr.bf16.mxu0 %v8099_v16  ;;  %3945 = vmatprep.subr.bf16.mxu1 %v8102_v21  ;;  %v10070_v16 = vld [vmem:[%s10915_s5 + $0xc] ss:$16 sps:$4 sm:$0xff]   ;;  %v10075_v21 = vld [vmem:[%s10915_s5 + $0x8] ss:$16 sps:$4 sm:$0xff]  }
 0x749   :  { %3833 = vmatpush1.bf16.msra.mxu0 %v8097_v30  ;;  %3946 = vmatpush1.bf16.msra.mxu1 %v8100_v28 }
 0x74a   :  { %3834 = vmatprep.subr.bf16.mxu0 %v8105_v61  ;;  %3947 = vmatprep.subr.bf16.mxu1 %v8108_v52  ;;  %v11018_v61 = vld [vmem:[#allocation51_spill] sm:$0xff] }
 0x74d   :  { %3835 = vmatpush1.bf16.msra.mxu0 %v8103_v17  ;;  %3948 = vmatpush1.bf16.msra.mxu1 %v8106_v26 }
 0x74e   :  { %3836 = vmatprep.subr.bf16.mxu0 %v8111_v29  ;;  %3949 = vmatprep.subr.bf16.mxu1 %v8114_v12  ;;  %v11019_v12 = vld [vmem:[#allocation53_spill] sm:$0xff] }
 0x751   :  { %3837 = vmatpush1.bf16.msra.mxu0 %v8109_v11  ;;  %3950 = vmatpush1.bf16.msra.mxu1 %v8112_v19  ;;  %v11020_v19 = vld [vmem:[#allocation52_spill] sm:$0xff] }
 0x752   :  { %3838 = vmatprep.subr.bf16.mxu0 %v8117_v23  ;;  %3951 = vmatprep.subr.bf16.mxu1 %v8120_v6 }
 0x755   :  { %3839 = vmatpush1.bf16.msra.mxu0 %v8115_v27  ;;  %3952 = vmatpush1.bf16.msra.mxu1 %v8118_v25  ;;  %v11021_v25 = vld [vmem:[#allocation55_spill] sm:$0xff] }
 0x756   :  { %3840 = vmatprep.subr.bf16.mxu0 %v8123_v37  ;;  %3953 = vmatprep.subr.bf16.mxu1 %v8126_v38 }
 0x759   :  { %3841 = vmatpush1.bf16.msra.mxu0 %v8121_v22  ;;  %3954 = vmatpush1.bf16.msra.mxu1 %v8124_v39 }
 0x75a   :  { %3842 = vmatprep.subr.bf16.mxu0 %v8129_v40  ;;  %3955 = vmatprep.subr.bf16.mxu1 %v8132_v41  ;;  %v11022_v40 = vld [vmem:[#allocation57_spill] sm:$0xff] }
 0x75d   :  { %3843 = vmatpush1.bf16.msra.mxu0 %v8127_v42  ;;  %3956 = vmatpush1.bf16.msra.mxu1 %v8130_v44  ;;  %v11023_v42 = vld [vmem:[#allocation56_spill] sm:$0xff] }
 0x75e   :  { %4328 = vmatprep.subr.bf16.mxu0 %v9892_v53  ;;  %4371 = vmatprep.subr.bf16.mxu1 %v9909_v56 }
 0x760   :  { %3861 = vmatmul.mubr.bf16.vlgmr.msra.gmra.mxu0 %v8133_v45  ;;  %3974 = vmatmul.mubr.bf16.vlgmr.msra.gmra.mxu1 %v8133_v45 }
 0x761   :  { %3870 = vmatprep.mubr.bf16.mxu0 %v10976_v34  ;;  %3983 = vmatprep.mubr.bf16.mxu1 %v10976_v34 }
 0x762   :  { %4329 = vmatpush1.bf16.msra.mxu0 %v9897_v54  ;;  %4372 = vmatpush1.bf16.msra.mxu1 %v9903_v55 }
 0x763   :  { %4330 = vmatprep.subr.bf16.mxu0 %v9914_v57  ;;  %4373 = vmatprep.subr.bf16.mxu1 %v9930_v62 }
 0x766   :  { %4331 = vmatpush1.bf16.msra.mxu0 %v9919_v58  ;;  %4374 = vmatpush1.bf16.msra.mxu1 %v9925_v60 }
 0x767   :  { %4332 = vmatprep.subr.bf16.mxu0 %v9939_v63  ;;  %4375 = vmatprep.subr.bf16.mxu1 %v9944_v2 }
 0x768   :  { %3871 = vmatmul.mubr.bf16.gmra.mxu0 %v8134_v46  ;;  %3984 = vmatmul.mubr.bf16.gmra.mxu1 %v8134_v46  ;;  %v11024_v46 = vld [vmem:[#allocation54_spill] sm:$0xff] }
 0x769   :  { %3880 = vmatprep.mubr.bf16.mxu0 %v10976_v34  ;;  %3993 = vmatprep.mubr.bf16.mxu1 %v10976_v34 }
 0x76a   :  { %4333 = vmatpush1.bf16.msra.mxu0 %v9949_v3  ;;  %4376 = vmatpush1.bf16.msra.mxu1 %v9954_v4 }
 0x76b   :  { %4334 = vmatprep.subr.bf16.mxu0 %v9963_v36  ;;  %4377 = vmatprep.subr.bf16.mxu1 %v9968_v5 }
 0x76e   :  { %4335 = vmatpush1.bf16.msra.mxu0 %v9973_v32  ;;  %4378 = vmatpush1.bf16.msra.mxu1 %v9985_v35 }
 0x76f   :  { %4336 = vmatprep.subr.bf16.mxu0 %v9980_v13  ;;  %4379 = vmatprep.subr.bf16.mxu1 %v10002_v20 }
 0x770   :  { %3881 = vmatmul.mubr.bf16.gmra.mxu0 %v8135_v47  ;;  %3994 = vmatmul.mubr.bf16.gmra.mxu1 %v8135_v47 }
 0x771   :  { %3890 = vmatprep.mubr.bf16.mxu0 %v10976_v34  ;;  %4003 = vmatprep.mubr.bf16.mxu1 %v10976_v34 }
 0x772   :  { %4337 = vmatpush1.bf16.msra.mxu0 %v9991_v15  ;;  %4380 = vmatpush1.bf16.msra.mxu1 %v10014_v31 }
 0x773   :  { %4338 = vmatprep.subr.bf16.mxu0 %v9997_v24  ;;  %4381 = vmatprep.subr.bf16.mxu1 %v10026_v8 }
 0x776   :  { %4339 = vmatpush1.bf16.msra.mxu0 %v10009_v43  ;;  %4382 = vmatpush1.bf16.msra.mxu1 %v10032_v18 }
 0x777   :  { %4340 = vmatprep.subr.bf16.mxu0 %v10019_v7  ;;  %4383 = vmatprep.subr.bf16.mxu1 %v10046_v10 }
 0x778   :  { %3891 = vmatmul.mubr.bf16.gmra.mxu0 %v8136_v48  ;;  %4004 = vmatmul.mubr.bf16.gmra.mxu1 %v8136_v48 }
 0x779   :  { %3900 = vmatprep.mubr.bf16.mxu0 %v10976_v34  ;;  %4013 = vmatprep.mubr.bf16.mxu1 %v10976_v34 }
 0x77a   :  { %4341 = vmatpush1.bf16.msra.mxu0 %v10037_v9  ;;  %4384 = vmatpush1.bf16.msra.mxu1 %v10051_v33 }
 0x77b   :  { %4342 = vmatprep.subr.bf16.mxu0 %v10062_v1  ;;  %4385 = vmatprep.subr.bf16.mxu1 %v10070_v16 }
 0x77e   :  { %4343 = vmatpush1.bf16.msra.mxu0 %v10057_v14  ;;  %4386 = vmatpush1.bf16.msra.mxu1 %v10075_v21 }
 0x77f   :  { %4684 = vmatprep.subr.bf16.mxu0 %v9892_v53  ;;  %4727 = vmatprep.subr.bf16.mxu1 %v9909_v56 }
 0x780   :  { %3901 = vmatmul.mubr.bf16.gmra.mxu0 %v8137_v49  ;;  %4014 = vmatmul.mubr.bf16.gmra.mxu1 %v8137_v49 }
 0x781   :  { %3910 = vmatprep.mubr.bf16.mxu0 %v10976_v34  ;;  %4023 = vmatprep.mubr.bf16.mxu1 %v10976_v34 }
 0x788   :  { %3911 = vmatmul.mubr.bf16.gmra.mxu0 %v8138_v50  ;;  %4024 = vmatmul.mubr.bf16.gmra.mxu1 %v8138_v50  ;;  %v11025_v50 = vld [vmem:[#allocation58_spill] sm:$0xff] }
 0x789   :  { %3920 = vmatprep.mubr.bf16.mxu0 %v10976_v34  ;;  %4033 = vmatprep.mubr.bf16.mxu1 %v10976_v34 }
 0x790   :  { %3921 = vmatmul.mubr.bf16.gmra.mxu0 %v8139_v51  ;;  %4034 = vmatmul.mubr.bf16.gmra.mxu1 %v8139_v51 }
 0x791   :  { %3930 = vmatprep.mubr.bf16.mxu0 %v10976_v34  ;;  %4043 = vmatprep.mubr.bf16.mxu1 %v10976_v34 }
 0x800   :  { %v3427_v30 = vpop.f32.mrf.mxu0  ;;  %v3470_v28 = vpop.f32.mrf.mxu1 }
 0x801   :  { %v3479_v52 = vadd.f32 %v3427_v30, %v11018_v61  ;;  %v3481_v23 = vadd.f32 %v3470_v28, %v11020_v19 }
 0x802   :  { %v3429_v17 = vpop.f32.mrf.mxu0  ;;  %v3472_v26 = vpop.f32.mrf.mxu1 }
 0x803   :  { %v3489_v29 = vmul.f32 0.5, %v3479_v52  ;;  %v3480_v11 = vadd.f32 %v3429_v17, %v11019_v12  ;;  %v3482_v47 = vadd.f32 %v3472_v26, %v11024_v46 }
 0x804   :  { %v3431_v6 = vpop.f32.mrf.mxu0  ;;  %v3474_v38 = vpop.f32.mrf.mxu1 }
 0x805   :  { %8433 = vtanh.f32 %v3489_v29  ;;  %v3497_v27 = vmul.f32 0.5, %v3480_v11  ;;  %v3483_v37 = vadd.f32 %v3431_v6, %v11021_v25  ;;  %v3485_v44 = vadd.f32 %v3474_v38, %v11023_v42 }
 0x806   :  { %v3433_v22 = vpop.f32.mrf.mxu0  ;;  %v3476_v48 = vpop.f32.mrf.mxu1  ;;  %v3507_v49 = vmul.f32 0.5, %v3482_v47 }
 0x807   :  { %8435 = vtanh.f32 %v3497_v27  ;;  %v3490_v39 = vmul.f32 0.5, %v3483_v37  ;;  %v3484_v41 = vadd.f32 %v3433_v22, %v11022_v40  ;;  %v3486_v51 = vadd.f32 %v3476_v48, %v11025_v50 }
 0x808   :  { %8437 = vtanh.f32 %v3481_v23 }
 0x809   :  { %8439 = vtanh.f32 %v3490_v39  ;;  %v3498_v45 = vmul.f32 0.5, %v3484_v41  ;;  %v3508_v12 = vmul.f32 0.5, %v3486_v51 }
 0x80b   :  { %8441 = vtanh.f32 %v3498_v45 }
 0x80c   :  { %8443 = vtanh.f32 %v3485_v44 }
 0x80d   :  { %8445 = vtanh.f32 %v3507_v49 }
 0x80e   :  { %8447 = vtanh.f32 %v3508_v12 }
 0x812   :  { %v8434_v30 = vpop.eup %8433 }
 0x813   :  { %v3493_v28 = vadd.f32 1.0, %v8434_v30 }
 0x814   :  { %v8436_v61 = vpop.eup %8435 }
 0x815   :  { %v8438_v52 = vpop.eup %8437  ;;  %v3495_v17 = vmul.f32 0.5, %v3493_v28  ;;  %v3501_v29 = vadd.f32 1.0, %v8436_v61 }
 0x816   :  { %v8440_v11 = vpop.eup %8439 }
 0x817   :  { %v3503_v19 = vmul.f32 0.5, %v3501_v29  ;;  %v3517_v23 = vmul.f32 %v8438_v52, %v3495_v17  ;;  %v3494_v6 = vadd.f32 1.0, %v8440_v11 }
 0x818   :  { %v8442_v27 = vpop.eup %8441 }
 0x819   :  { %v3515_v26 = vmul.f32 %v3503_v19, %v9776_v59  ;;  %v3496_v25 = vmul.f32 0.5, %v3494_v6  ;;  %v3502_v37 = vadd.f32 1.0, %v8442_v27  ;;  %v8444_v38 = vpop.eup %8443 }
 0x81a   :  { %v8446_v44 = vpop.eup %8445 }
 0x81b   :  { %v3519_v22 = vadd.f32 %v3517_v23, %v3515_v26  ;;  %v3504_v39 = vmul.f32 0.5, %v3502_v37  ;;  %v3518_v40 = vmul.f32 %v8444_v38, %v3496_v25  ;;  %v3511_v45 = vadd.f32 1.0, %v8446_v44  ;;  %v8448_v46 = vpop.eup %8447 }
 0x81c   :  { %v3512_v48 = vadd.f32 1.0, %v8448_v46 }
 0x81d   :  { %8449 = vtanh.f32 %v3519_v22  ;;  %v3516_v41 = vmul.f32 %v3504_v39, %v9780_v0  ;;  %v3513_v47 = vmul.f32 0.5, %v3511_v45  ;;  %v8189_v0 = vld [vmem:[#allocation4] sm:$0xff]  }
 0x81e   :  { %v3514_v59 = vmul.f32 0.5, %v3512_v48 }
 0x81f   :  { %v3520_v42 = vadd.f32 %v3518_v40, %v3516_v41 }
 0x820   :  { %v10129_v12 = vpop.f32.mrf.mxu0  ;;  %v10131_v11 = vpop.f32.mrf.mxu1 }
 0x821   :  { %8451 = vtanh.f32 %v3520_v42 }
 0x822   :  { %v10133_v19 = vpop.f32.mrf.mxu0  ;;  %v10135_v23 = vpop.f32.mrf.mxu1 }
 0x824   :  { %v10137_v6 = vpop.f32.mrf.mxu0  ;;  %v10139_v27 = vpop.f32.mrf.mxu1 }
 0x826   :  { %v10141_v26 = vpop.f32.mrf.mxu0  ;;  %v10143_v25 = vpop.f32.mrf.mxu1 }
 0x828   :  { %v10145_v37 = vpop.f32.mrf.mxu0 }
 0x82a   :  { %v8450_v49 = vpop.eup %8449 }
 0x82b   :  { %v3523_v50 = vmul.f32 %v8450_v49, %v3513_v47 }
 0x82d   :  { %v3537_v28 = vmax.f32 %v3523_v50, 0.0 }
 0x82e   :  { %v8452_v51 = vpop.eup %8451 }
 0x82f   :  { %v3524_v30 = vmul.f32 %v8452_v51, %v3514_v59 }
 0x831   :  { %v7782_v61 = vpack.c.bf16 %v3524_v30, %v3523_v50  ;;  %v3538_v52 = vmax.f32 %v3524_v30, 0.0 }
 0x833   :  { %7783 = vst [vmem:[#allocation2] sm:$0xff] %v7782_v61   ;;  %v7787_v17 = vpack.c.bf16 %v3538_v52, %v3537_v28 }
 0x835   :  { %7788 = vst [vmem:[#allocation7 + $0x38] sm:$0xff] %v7787_v17  }
 0x83c   :  { %v8179_v29 = vld [vmem:[#allocation7 + $0x38] sm:$0xff]  }
 0x83d   :  { %3931 = vmatmul.mubr.bf16.gmra.mxu0 %v8179_v29  ;;  %4044 = vmatmul.mubr.bf16.gmra.mxu1 %v8179_v29 }
 0x83e   :  { %4360 = vmatprep.mubr.bf16.mxu0 %v10976_v34  ;;  %4403 = vmatprep.mubr.bf16.mxu1 %v10976_v34 }
 0x845   :  { %4361 = vmatmul.mubr.bf16.vlgmr.msra.gmra.mxu0 %v8189_v0  ;;  %4404 = vmatmul.mubr.bf16.vlgmr.msra.gmra.mxu1 %v8189_v0 }
 0x846   :  { %4685 = vmatpush1.bf16.msra.mxu0 %v9897_v54  ;;  %4728 = vmatpush1.bf16.msra.mxu1 %v9903_v55 }
 0x847   :  { %4686 = vmatprep.subr.bf16.mxu0 %v9914_v57  ;;  %4729 = vmatprep.subr.bf16.mxu1 %v9930_v62 }
 0x848   :  { %4716 = vmatprep.mubr.bf16.mxu0 %v10976_v34  ;;  %4759 = vmatprep.mubr.bf16.mxu1 %v10976_v34 }
 0x84a   :  { %4687 = vmatpush1.bf16.msra.mxu0 %v9919_v58  ;;  %4730 = vmatpush1.bf16.msra.mxu1 %v9925_v60 }
 0x84b   :  { %4688 = vmatprep.subr.bf16.mxu0 %v9939_v63  ;;  %4731 = vmatprep.subr.bf16.mxu1 %v9944_v2 }
 0x84e   :  { %4689 = vmatpush1.bf16.msra.mxu0 %v9949_v3  ;;  %4732 = vmatpush1.bf16.msra.mxu1 %v9954_v4 }
 0x84f   :  { %4690 = vmatprep.subr.bf16.mxu0 %v9963_v36  ;;  %4733 = vmatprep.subr.bf16.mxu1 %v9968_v5 }
 0x852   :  { %4691 = vmatpush1.bf16.msra.mxu0 %v9973_v32  ;;  %4734 = vmatpush1.bf16.msra.mxu1 %v9985_v35 }
 0x853   :  { %4692 = vmatprep.subr.bf16.mxu0 %v9980_v13  ;;  %4735 = vmatprep.subr.bf16.mxu1 %v10002_v20 }
 0x856   :  { %4693 = vmatpush1.bf16.msra.mxu0 %v9991_v15  ;;  %4736 = vmatpush1.bf16.msra.mxu1 %v10014_v31 }
 0x857   :  { %4694 = vmatprep.subr.bf16.mxu0 %v9997_v24  ;;  %4737 = vmatprep.subr.bf16.mxu1 %v10026_v8 }
 0x85a   :  { %4695 = vmatpush1.bf16.msra.mxu0 %v10009_v43  ;;  %4738 = vmatpush1.bf16.msra.mxu1 %v10032_v18 }
 0x85b   :  { %4696 = vmatprep.subr.bf16.mxu0 %v10019_v7  ;;  %4739 = vmatprep.subr.bf16.mxu1 %v10046_v10 }
 0x85e   :  { %4697 = vmatpush1.bf16.msra.mxu0 %v10037_v9  ;;  %4740 = vmatpush1.bf16.msra.mxu1 %v10051_v33 }
 0x85f   :  { %4698 = vmatprep.subr.bf16.mxu0 %v10062_v1  ;;  %4741 = vmatprep.subr.bf16.mxu1 %v10070_v16 }
 0x862   :  { %4699 = vmatpush1.bf16.msra.mxu0 %v10057_v14  ;;  %4742 = vmatpush1.bf16.msra.mxu1 %v10075_v21 }
 0x863   :  { %5041 = vmatprep.subr.bf16.mxu0 %v9892_v53  ;;  %5084 = vmatprep.subr.bf16.mxu1 %v9909_v56  ;;  %v10147_v53 = vpop.f32.mrf.mxu1  ;;  %v10149_v56 = vpop.f32.mrf.mxu0 }
 0x865   :  { %v10151_v38 = vpop.f32.mrf.mxu1  ;;  %v10153_v22 = vpop.f32.mrf.mxu0 }
 0x866   :  { %11026 = vst [vmem:[#allocation10_spill] sm:$0xff] %v10151_v38 }
 0x867   :  { %v10155_v39 = vpop.f32.mrf.mxu1  ;;  %v10157_v40 = vpop.f32.mrf.mxu0 }
 0x868   :  { %11027 = vst [vmem:[#allocation11_spill] sm:$0xff] %v10155_v39 }
 0x869   :  { %v10159_v41 = vpop.f32.mrf.mxu1  ;;  %v10161_v42 = vpop.f32.mrf.mxu0 }
 0x86a   :  { %11028 = vst [vmem:[#allocation13_spill] sm:$0xff] %v10159_v41  ;;  %11029 = vst [vmem:[#allocation12_spill] sm:$0xff] %v10161_v42 }
 0x86b   :  { %v10163_v44 = vpop.f32.mrf.mxu1  ;;  %v10165_v45 = vpop.f32.mrf.mxu0 }
 0x86c   :  { %11030 = vst [vmem:[#allocation17_spill] sm:$0xff] %v10163_v44  ;;  %11031 = vst [vmem:[#allocation15_spill] sm:$0xff] %v10165_v45 }
 0x86d   :  { %v10167_v46 = vpop.f32.mrf.mxu1  ;;  %v10169_v47 = vpop.f32.mrf.mxu0 }
 0x86e   :  { %11032 = vst [vmem:[#allocation16_spill] sm:$0xff] %v10167_v46  ;;  %11033 = vst [vmem:[#allocation18_spill] sm:$0xff] %v10169_v47 }
 0x86f   :  { %v10171_v48 = vpop.f32.mrf.mxu1  ;;  %v10173_v49 = vpop.f32.mrf.mxu0 }
 0x870   :  { %11034 = vst [vmem:[#allocation14_spill] sm:$0xff] %v10171_v48  ;;  %11035 = vst [vmem:[#allocation19_spill] sm:$0xff] %v10173_v49 }
 0x871   :  { %v10175_v50 = vpop.f32.mrf.mxu1  ;;  %v10177_v59 = vpop.f32.mrf.mxu0 }
 0x872   :  { %11036 = vst [vmem:[#allocation21_spill] sm:$0xff] %v10175_v50  ;;  %11037 = vst [vmem:[#allocation20_spill] sm:$0xff] %v10177_v59 }
 0x873   :  { %v10179_v51 = vpop.f32.mrf.mxu1  ;;  %v10181_v30 = vpop.f32.mrf.mxu0 }
 0x874   :  { %11038 = vst [vmem:[#allocation25_spill] sm:$0xff] %v10179_v51  ;;  %11039 = vst [vmem:[#allocation23_spill] sm:$0xff] %v10181_v30 }
 0x875   :  { %v10183_v28 = vpop.f32.mrf.mxu1  ;;  %v10185_v61 = vpop.f32.mrf.mxu0 }
 0x876   :  { %11040 = vst [vmem:[#allocation24_spill] sm:$0xff] %v10183_v28  ;;  %11041 = vst [vmem:[#allocation26_spill] sm:$0xff] %v10185_v61 }
 0x877   :  { %v10187_v52 = vpop.f32.mrf.mxu1  ;;  %v10189_v17 = vpop.f32.mrf.mxu0 }
 0x878   :  { %11042 = vst [vmem:[#allocation22_spill] sm:$0xff] %v10187_v52  ;;  %11043 = vst [vmem:[#allocation27_spill] sm:$0xff] %v10189_v17 }
 0x879   :  { %v10191_v29 = vpop.f32.mrf.mxu1  ;;  %v10193_v0 = vpop.f32.mrf.mxu0 }
 0x87a   :  { %11044 = vst [vmem:[#allocation29_spill] sm:$0xff] %v10191_v29  ;;  %11045 = vst [vmem:[#allocation28_spill] sm:$0xff] %v10193_v0 }
 0x87b   :  { %v10195_v46 = vpop.f32.mrf.mxu1  ;;  %v10197_v50 = vpop.f32.mrf.mxu0 }
 0x87c   :  { %11046 = vst [vmem:[#allocation31_spill] sm:$0xff] %v10195_v46  ;;  %11047 = vst [vmem:[#allocation33_spill] sm:$0xff] %v10197_v50 }
 0x87d   :  { %v10199_v59 = vpop.f32.mrf.mxu1  ;;  %v10201_v51 = vpop.f32.mrf.mxu0 }
 0x87e   :  { %11048 = vst [vmem:[#allocation32_spill] sm:$0xff] %v10199_v59  ;;  %11049 = vst [vmem:[#allocation30_spill] sm:$0xff] %v10201_v51 }
 0x87f   :  { %v10203_v30 = vpop.f32.mrf.mxu1  ;;  %v10205_v28 = vpop.f32.mrf.mxu0 }
 0x880   :  { %11050 = vst [vmem:[#allocation34_spill] sm:$0xff] %v10203_v30  ;;  %11051 = vst [vmem:[#allocation35_spill] sm:$0xff] %v10205_v28 }
 0x881   :  { %v10207_v61 = vpop.f32.mrf.mxu1  ;;  %v10209_v52 = vpop.f32.mrf.mxu0 }
 0x882   :  { %11052 = vst [vmem:[#allocation37_spill] sm:$0xff] %v10207_v61  ;;  %11053 = vst [vmem:[#allocation36_spill] sm:$0xff] %v10209_v52 }
 0x883   :  { %v10211_v17 = vpop.f32.mrf.mxu1  ;;  %v10213_v29 = vpop.f32.mrf.mxu0 }
 0x884   :  { %11054 = vst [vmem:[#allocation39_spill] sm:$0xff] %v10211_v17  ;;  %11055 = vst [vmem:[#allocation41_spill] sm:$0xff] %v10213_v29 }
 0x885   :  { %v10215_v0 = vpop.f32.mrf.mxu1  ;;  %v10217_v46 = vpop.f32.mrf.mxu0 }
 0x886   :  { %11056 = vst [vmem:[#allocation40_spill] sm:$0xff] %v10215_v0  ;;  %11057 = vst [vmem:[#allocation38_spill] sm:$0xff] %v10217_v46 }
 0x887   :  { %v10219_v50 = vpop.f32.mrf.mxu1  ;;  %v10221_v59 = vpop.f32.mrf.mxu0 }
 0x888   :  { %11058 = vst [vmem:[#allocation42_spill] sm:$0xff] %v10219_v50  ;;  %11059 = vst [vmem:[#allocation43_spill] sm:$0xff] %v10221_v59 }
 0x889   :  { %v10223_v51 = vpop.f32.mrf.mxu1  ;;  %v10225_v30 = vpop.f32.mrf.mxu0 }
 0x88a   :  { %11060 = vst [vmem:[#allocation45_spill] sm:$0xff] %v10223_v51  ;;  %11061 = vst [vmem:[#allocation44_spill] sm:$0xff] %v10225_v30  ;;  %v3598_v51 = vld [vmem:[%s10916_s6] sm:$0xf] }
 0x88b   :  { %v10227_v28 = vpop.f32.mrf.mxu1  ;;  %v10229_v61 = vpop.f32.mrf.mxu0 }
 0x88c   :  { %11062 = vst [vmem:[#allocation47_spill] sm:$0xff] %v10227_v28  ;;  %11063 = vst [vmem:[#allocation49_spill] sm:$0xff] %v10229_v61 }
 0x88d   :  { %v10231_v52 = vpop.f32.mrf.mxu1  ;;  %v10233_v17 = vpop.f32.mrf.mxu0 }
 0x88e   :  { %11064 = vst [vmem:[#allocation48_spill] sm:$0xff] %v10231_v52  ;;  %11065 = vst [vmem:[#allocation46_spill] sm:$0xff] %v10233_v17  ;;  %v11073_v52 = vld [vmem:[#allocation9_spill] sm:$0xff] }
 0x88f   :  { %v10235_v29 = vpop.f32.mrf.mxu1  ;;  %v10237_v0 = vpop.f32.mrf.mxu0  ;;  %v11074_v17 = vsub.s32 0, %v11073_v52 }
 0x890   :  { %11066 = vst [vmem:[#allocation50_spill] sm:$0xff] %v10235_v29  ;;  %11067 = vst [vmem:[#allocation51_spill] sm:$0xff] %v10237_v0 }
 0x891   :  { %v10239_v46 = vpop.f32.mrf.mxu1  ;;  %v10254_v59 = vrot.slane %v3598_v51, %v11074_v17 }
 0x892   :  { %11068 = vst [vmem:[#allocation53_spill] sm:$0xff] %v10239_v46  ;;  %v11077_v46 = vsub.s32 1, %v11073_v52 }
 0x893   :  { %v3863_v17 = vadd.f32 %v10129_v12, %v10254_v59 }
 0x894   :  { %v10262_v48 = vrot.slane %v3598_v51, %v11077_v46 }
 0x896   :  { %v3869_v12 = vadd.f32 %v10141_v26, %v10262_v48 }
 0x8fd   :  { %v10244_v50 = vpop.f32.mrf.mxu0  ;;  %v10246_v30 = vpop.f32.mrf.mxu1 }
 0x8fe   :  { %11069 = vst [vmem:[#allocation52_spill] sm:$0xff] %v10244_v50  ;;  %11070 = vst [vmem:[#allocation55_spill] sm:$0xff] %v10246_v30  ;;  %v11078_v50 = vsub.s32 2, %v11073_v52 }
 0x8ff   :  { %v10248_v28 = vpop.f32.mrf.mxu0  ;;  %v10250_v61 = vpop.f32.mrf.mxu1 }
 0x900   :  { %11071 = vst [vmem:[#allocation57_spill] sm:$0xff] %v10248_v28  ;;  %11072 = vst [vmem:[#allocation56_spill] sm:$0xff] %v10250_v61  ;;  %v10266_v49 = vrot.slane %v3598_v51, %v11078_v50  ;;  %v3867_v50 = vadd.f32 %v10137_v6, %v10254_v59 }
 0x901   :  { %v10256_v29 = vpop.f32.mrf.mxu0  ;;  %v10258_v0 = vpop.f32.mrf.mxu1 }
 0x902   :  { %11075 = vst [vmem:[#allocation54_spill] sm:$0xff] %v10256_v29  ;;  %11076 = vst [vmem:[#allocation58_spill] sm:$0xff] %v10258_v0  ;;  %v3865_v0 = vadd.f32 %v10133_v19, %v10262_v48  ;;  %v3976_v46 = vadd.f32 %v10131_v11, %v10266_v49  ;;  %v3980_v6 = vadd.f32 %v10139_v27, %v10266_v49 }
 0x903   :  { %v10268_v30 = vpop.f32.mrf.mxu0  ;;  %v10270_v28 = vpop.f32.mrf.mxu1 }
 0x904   :  { %11079 = vst [vmem:[#allocation9_spill] sm:$0xff] %v10268_v30  ;;  %11080 = vst [vmem:[#allocation59_spill] sm:$0xff] %v10270_v28 }
 0x905   :  { %v4362_v61 = vpop.f32.mrf.mxu0  ;;  %v4405_v47 = vpop.f32.mrf.mxu1 }
 0x906   :  { %v4414_v29 = vadd.f32 %v4362_v61, %v3863_v17  ;;  %v4416_v42 = vadd.f32 %v4405_v47, %v3976_v46  ;;  %v11081_v47 = vsub.s32 3, %v11073_v52 }
 0x907   :  { %v4364_v44 = vpop.f32.mrf.mxu0  ;;  %v4407_v28 = vpop.f32.mrf.mxu1 }
 0x908   :  { %v4424_v45 = vmul.f32 0.5, %v4414_v29  ;;  %v4415_v30 = vadd.f32 %v4364_v44, %v3865_v0  ;;  %v10286_v29 = vrot.slane %v3598_v51, %v11081_v47 }
 0x909   :  { %v4366_v41 = vpop.f32.mrf.mxu0  ;;  %v4409_v11 = vpop.f32.mrf.mxu1 }
 0x90a   :  { %8453 = vtanh.f32 %v4424_v45  ;;  %v4432_v38 = vmul.f32 0.5, %v4415_v30  ;;  %v4418_v39 = vadd.f32 %v4366_v41, %v3867_v50  ;;  %v4420_v0 = vadd.f32 %v4409_v11, %v3980_v6 }
 0x90b   :  { %v4368_v19 = vpop.f32.mrf.mxu0  ;;  %v3978_v26 = vadd.f32 %v10135_v23, %v10286_v29  ;;  %v4411_v41 = vpop.f32.mrf.mxu1 }
 0x90c   :  { %8455 = vtanh.f32 %v4432_v38  ;;  %v4425_v61 = vmul.f32 0.5, %v4418_v39  ;;  %v4419_v17 = vadd.f32 %v4368_v19, %v3869_v12  ;;  %v3982_v38 = vadd.f32 %v10143_v25, %v10286_v29 }
 0x90d   :  { %8457 = vtanh.f32 %v4416_v42  ;;  %v4417_v39 = vadd.f32 %v4407_v28, %v3978_v26 }
 0x90e   :  { %8459 = vtanh.f32 %v4425_v61  ;;  %v4433_v44 = vmul.f32 0.5, %v4419_v17  ;;  %v4421_v42 = vadd.f32 %v4411_v41, %v3982_v38 }
 0x90f   :  { %v4442_v46 = vmul.f32 0.5, %v4417_v39 }
 0x910   :  { %8461 = vtanh.f32 %v4433_v44  ;;  %v4443_v12 = vmul.f32 0.5, %v4421_v42 }
 0x911   :  { %8463 = vtanh.f32 %v4420_v0 }
 0x912   :  { %8465 = vtanh.f32 %v4442_v46 }
 0x913   :  { %8467 = vtanh.f32 %v4443_v12 }
 0x917   :  { %v8454_v45 = vpop.eup %8453 }
 0x918   :  { %v4428_v27 = vadd.f32 1.0, %v8454_v45 }
 0x919   :  { %v8456_v30 = vpop.eup %8455 }
 0x91a   :  { %v8458_v50 = vpop.eup %8457  ;;  %v4430_v52 = vmul.f32 0.5, %v4428_v27  ;;  %v4436_v51 = vadd.f32 1.0, %v8456_v30 }
 0x91b   :  { %v8460_v19 = vpop.eup %8459 }
 0x91c   :  { %v4438_v61 = vmul.f32 0.5, %v4436_v51  ;;  %v4452_v17 = vmul.f32 %v8458_v50, %v4430_v52  ;;  %v4429_v11 = vadd.f32 1.0, %v8460_v19 }
 0x91d   :  { %v8462_v23 = vpop.eup %8461 }
 0x91e   :  { %v4450_v6 = vmul.f32 0.0, %v4438_v61  ;;  %v4431_v44 = vmul.f32 0.5, %v4429_v11  ;;  %v4437_v25 = vadd.f32 1.0, %v8462_v23  ;;  %v8464_v0 = vpop.eup %8463 }
 0x91f   :  { %v8466_v39 = vpop.eup %8465 }
 0x920   :  { %v10292_v28 = vadd.f32 %v4452_v17, %v4450_v6  ;;  %v4439_v47 = vmul.f32 0.5, %v4437_v25  ;;  %v4453_v41 = vmul.f32 %v8464_v0, %v4431_v44  ;;  %v8468_v42 = vpop.eup %8467  ;;  %v4446_v45 = vadd.f32 1.0, %v8466_v39 }
 0x921   :  { %v4447_v27 = vadd.f32 1.0, %v8468_v42 }
 0x922   :  { %v4451_v26 = vmul.f32 0.0, %v4439_v47  ;;  %8469 = vtanh.f32 %v10292_v28  ;;  %v4448_v46 = vmul.f32 0.5, %v4446_v45 }
 0x923   :  { %v4449_v50 = vmul.f32 0.5, %v4447_v27 }
 0x924   :  { %v10295_v38 = vadd.f32 %v4453_v41, %v4451_v26 }
 0x926   :  { %8471 = vtanh.f32 %v10295_v38 }
 0x92f   :  { %v8470_v30 = vpop.eup %8469 }
 0x930   :  { %v4458_v51 = vmul.f32 %v8470_v30, %v4448_v46 }
 0x933   :  { %v8472_v52 = vpop.eup %8471 }
 0x934   :  { %v4459_v12 = vmul.f32 %v8472_v52, %v4449_v50 }
 0x936   :  { %v7792_v19 = vpack.c.bf16 %v4459_v12, %v4458_v51 }
 0x938   :  { %7793 = vst [vmem:[#allocation4] sm:$0xff] %v7792_v19   ;;  %7798 = vst [vmem:[%s10917_s7] sm:$0xff] %v7792_v19  }
 0x93f   :  { %v8190_v61 = vld [vmem:[#allocation4] sm:$0xff]  }
 0x940   :  { %4717 = vmatmul.mubr.bf16.vlgmr.msra.gmra.mxu0 %v8190_v61  ;;  %4760 = vmatmul.mubr.bf16.vlgmr.msra.gmra.mxu1 %v8190_v61 }
 0x941   :  { %5042 = vmatpush1.bf16.msra.mxu0 %v9897_v54  ;;  %5085 = vmatpush1.bf16.msra.mxu1 %v9903_v55  ;;  %v3873_v54 = vadd.f32 %v10145_v37, %v10254_v59 }
 0x942   :  { %5043 = vmatprep.subr.bf16.mxu0 %v9914_v57  ;;  %5086 = vmatprep.subr.bf16.mxu1 %v9930_v62  ;;  %v3986_v62 = vadd.f32 %v10147_v53, %v10266_v49 }
 0x943   :  { %5073 = vmatprep.mubr.bf16.mxu0 %v10976_v34  ;;  %5116 = vmatprep.mubr.bf16.mxu1 %v10976_v34 }
 0x945   :  { %5044 = vmatpush1.bf16.msra.mxu0 %v9919_v58  ;;  %5087 = vmatpush1.bf16.msra.mxu1 %v9925_v60  ;;  %v3875_v58 = vadd.f32 %v10149_v56, %v10262_v48 }
 0x946   :  { %5045 = vmatprep.subr.bf16.mxu0 %v9939_v63  ;;  %5088 = vmatprep.subr.bf16.mxu1 %v9944_v2 }
 0x949   :  { %5046 = vmatpush1.bf16.msra.mxu0 %v9949_v3  ;;  %5089 = vmatpush1.bf16.msra.mxu1 %v9954_v4  ;;  %v3877_v3 = vadd.f32 %v10153_v22, %v10254_v59 }
 0x94a   :  { %5047 = vmatprep.subr.bf16.mxu0 %v9963_v36  ;;  %5090 = vmatprep.subr.bf16.mxu1 %v9968_v5 }
 0x94d   :  { %5048 = vmatpush1.bf16.msra.mxu0 %v9973_v32  ;;  %5091 = vmatpush1.bf16.msra.mxu1 %v9985_v35 }
 0x94e   :  { %5049 = vmatprep.subr.bf16.mxu0 %v9980_v13  ;;  %5092 = vmatprep.subr.bf16.mxu1 %v10002_v20  ;;  %v3879_v13 = vadd.f32 %v10157_v40, %v10262_v48 }
 0x951   :  { %5050 = vmatpush1.bf16.msra.mxu0 %v9991_v15  ;;  %5093 = vmatpush1.bf16.msra.mxu1 %v10014_v31 }
 0x952   :  { %5051 = vmatprep.subr.bf16.mxu0 %v9997_v24  ;;  %5094 = vmatprep.subr.bf16.mxu1 %v10026_v8 }
 0x955   :  { %5052 = vmatpush1.bf16.msra.mxu0 %v10009_v43  ;;  %5095 = vmatpush1.bf16.msra.mxu1 %v10032_v18  ;;  %v11082_v43 = vld [vmem:[#allocation11_spill] sm:$0xff] }
 0x956   :  { %5053 = vmatprep.subr.bf16.mxu0 %v10019_v7  ;;  %5096 = vmatprep.subr.bf16.mxu1 %v10046_v10  ;;  %v3990_v31 = vadd.f32 %v11082_v43, %v10266_v49  ;;  %v11083_v10 = vld [vmem:[#allocation10_spill] sm:$0xff]  ;;  %v10437_v43 = vld [vmem:[%s10915_s5 + $0x84] ss:$16 sps:$4 sm:$0xff]  }
 0x959   :  { %5054 = vmatpush1.bf16.msra.mxu0 %v10037_v9  ;;  %5097 = vmatpush1.bf16.msra.mxu1 %v10051_v33  ;;  %v3988_v33 = vadd.f32 %v11083_v10, %v10286_v29  ;;  %v10471_v10 = vld [vmem:[%s10915_s5 + $0x60] ss:$16 sps:$4 sm:$0xff]  }
 0x95a   :  { %5055 = vmatprep.subr.bf16.mxu0 %v10062_v1  ;;  %5098 = vmatprep.subr.bf16.mxu1 %v10070_v16  ;;  %v11084_v1 = vld [vmem:[#allocation13_spill] sm:$0xff] }
 0x95b   :  { %v3992_v16 = vadd.f32 %v11084_v1, %v10286_v29  ;;  %v10490_v1 = vld [vmem:[%s10915_s5 + $0x4c] ss:$16 sps:$4 sm:$0xff]  }
 0x95d   :  { %5056 = vmatpush1.bf16.msra.mxu0 %v10057_v14  ;;  %5099 = vmatpush1.bf16.msra.mxu1 %v10075_v21 }
 0xa00   :  { %v4718_v55 = vpop.f32.mrf.mxu0  ;;  %v4761_v57 = vpop.f32.mrf.mxu1 }
 0xa01   :  { %v4770_v60 = vadd.f32 %v4718_v55, %v3873_v54  ;;  %v4772_v5 = vadd.f32 %v4761_v57, %v3986_v62 }
 0xa02   :  { %v4720_v63 = vpop.f32.mrf.mxu0  ;;  %v4763_v2 = vpop.f32.mrf.mxu1 }
 0xa03   :  { %v4780_v4 = vmul.f32 0.5, %v4770_v60  ;;  %v4771_v36 = vadd.f32 %v4720_v63, %v3875_v58  ;;  %v4773_v21 = vadd.f32 %v4763_v2, %v3988_v33  ;;  %v10365_v63 = vld [vmem:[%s10915_s5 + $0xe4] ss:$16 sps:$4 sm:$0xff]   ;;  %v10370_v2 = vld [vmem:[%s10915_s5 + $0xec] ss:$16 sps:$4 sm:$0xff]  }
 0xa04   :  { %v4722_v32 = vpop.f32.mrf.mxu0  ;;  %v4765_v24 = vpop.f32.mrf.mxu1  ;;  %5398 = vmatprep.subr.bf16.mxu0 %v10365_v63  ;;  %5441 = vmatprep.subr.bf16.mxu1 %v10370_v2  ;;  %v10476_v33 = vld [vmem:[%s10915_s5 + $0x68] ss:$16 sps:$4 sm:$0xff]  }
 0xa05   :  { %8473 = vtanh.f32 %v4780_v4  ;;  %v4788_v35 = vmul.f32 0.5, %v4771_v36  ;;  %v4774_v15 = vadd.f32 %v4722_v32, %v3877_v3  ;;  %v4776_v18 = vadd.f32 %v4765_v24, %v3990_v31  ;;  %v10375_v3 = vld [vmem:[%s10915_s5 + $0xe0] ss:$16 sps:$4 sm:$0xff]   ;;  %v10380_v4 = vld [vmem:[%s10915_s5 + $0xe8] ss:$16 sps:$4 sm:$0xff]  }
 0xa06   :  { %v4724_v20 = vpop.f32.mrf.mxu0  ;;  %v4767_v14 = vpop.f32.mrf.mxu1  ;;  %v4798_v40 = vmul.f32 0.5, %v4773_v21  ;;  %v10389_v36 = vld [vmem:[%s10915_s5 + $0xc4] ss:$16 sps:$4 sm:$0xff]   ;;  %v10399_v32 = vld [vmem:[%s10915_s5 + $0xc0] ss:$16 sps:$4 sm:$0xff]  }
 0xa07   :  { %8475 = vtanh.f32 %v4788_v35  ;;  %v4781_v7 = vmul.f32 0.5, %v4774_v15  ;;  %v4775_v8 = vadd.f32 %v4724_v20, %v3879_v13  ;;  %v4777_v37 = vadd.f32 %v4767_v14, %v3992_v16  ;;  %v10404_v13 = vld [vmem:[%s10915_s5 + $0xc8] ss:$16 sps:$4 sm:$0xff]   ;;  %v10413_v35 = vld [vmem:[%s10915_s5 + $0xa4] ss:$16 sps:$4 sm:$0xff]  }
 0xa08   :  { %8477 = vtanh.f32 %v4772_v5  ;;  %v10394_v5 = vld [vmem:[%s10915_s5 + $0xcc] ss:$16 sps:$4 sm:$0xff]   ;;  %v10423_v24 = vld [vmem:[%s10915_s5 + $0xa0] ss:$16 sps:$4 sm:$0xff]   ;;  %v10428_v20 = vld [vmem:[%s10915_s5 + $0xa8] ss:$16 sps:$4 sm:$0xff]  }
 0xa09   :  { %8479 = vtanh.f32 %v4781_v7  ;;  %v4789_v9 = vmul.f32 0.5, %v4775_v8  ;;  %v4799_v6 = vmul.f32 0.5, %v4777_v37  ;;  %v10418_v15 = vld [vmem:[%s10915_s5 + $0xac] ss:$16 sps:$4 sm:$0xff]   ;;  %v10447_v7 = vld [vmem:[%s10915_s5 + $0x80] ss:$16 sps:$4 sm:$0xff]  }
 0xa0a   :  { %v10442_v31 = vld [vmem:[%s10915_s5 + $0x8c] ss:$16 sps:$4 sm:$0xff]   ;;  %v10452_v8 = vld [vmem:[%s10915_s5 + $0x88] ss:$16 sps:$4 sm:$0xff]   ;;  %v10485_v14 = vld [vmem:[%s10915_s5 + $0x44] ss:$16 sps:$4 sm:$0xff]  }
 0xa0b   :  { %8481 = vtanh.f32 %v4789_v9  ;;  %v10466_v9 = vld [vmem:[%s10915_s5 + $0x6c] ss:$16 sps:$4 sm:$0xff]   ;;  %v10495_v16 = vld [vmem:[%s10915_s5 + $0x40] ss:$16 sps:$4 sm:$0xff]   ;;  %v10500_v21 = vld [vmem:[%s10915_s5 + $0x48] ss:$16 sps:$4 sm:$0xff]  }
 0xa0c   :  { %8483 = vtanh.f32 %v4776_v18  ;;  %v10461_v18 = vld [vmem:[%s10915_s5 + $0x64] ss:$16 sps:$4 sm:$0xff]  }
 0xa0d   :  { %8485 = vtanh.f32 %v4798_v40  ;;  %v10507_v37 = vld [vmem:[%s10915_s5 + $0x24] ss:$16 sps:$4 sm:$0xff]  }
 0xa0e   :  { %8487 = vtanh.f32 %v4799_v6  ;;  %v10530_v40 = vld [vmem:[%s10915_s5 + $0x4] ss:$16 sps:$4 sm:$0xff]   ;;  %v11085_v6 = vld [vmem:[#allocation12_spill] sm:$0xff] }
 0xa12   :  { %v8474_v53 = vpop.eup %8473 }
 0xa13   :  { %v4784_v56 = vadd.f32 1.0, %v8474_v53  ;;  %v10514_v53 = vld [vmem:[%s10915_s5 + $0x20] ss:$16 sps:$4 sm:$0xff]  }
 0xa14   :  { %v8476_v22 = vpop.eup %8475 }
 0xa15   :  { %v8478_v17 = vpop.eup %8477  ;;  %v4786_v11 = vmul.f32 0.5, %v4784_v56  ;;  %v4792_v23 = vadd.f32 1.0, %v8476_v22  ;;  %v10519_v56 = vld [vmem:[%s10915_s5 + $0x28] ss:$16 sps:$4 sm:$0xff]   ;;  %v10524_v22 = vld [vmem:[%s10915_s5 + $0x2c] ss:$16 sps:$4 sm:$0xff]  }
 0xa16   :  { %v8480_v44 = vpop.eup %8479 }
 0xa17   :  { %v4794_v25 = vmul.f32 0.5, %v4792_v23  ;;  %v4808_v47 = vmul.f32 %v8478_v17, %v4786_v11  ;;  %v4785_v0 = vadd.f32 1.0, %v8480_v44  ;;  %v10535_v17 = vld [vmem:[%s10915_s5 + $0xc] ss:$16 sps:$4 sm:$0xff]   ;;  %v10543_v11 = vld [vmem:[%s10915_s5] ss:$16 sps:$4 sm:$0xff]   ;;  %v3883_v44 = vadd.f32 %v11085_v6, %v10254_v59 }
 0xa18   :  { %v8482_v26 = vpop.eup %8481  ;;  %v10548_v23 = vld [vmem:[%s10915_s5 + $0x8] ss:$16 sps:$4 sm:$0xff]  }
 0xa19   :  { %v4806_v41 = vmul.f32 %v4794_v25, %v10292_v28  ;;  %v4787_v39 = vmul.f32 0.5, %v4785_v0  ;;  %v4793_v42 = vadd.f32 1.0, %v8482_v26  ;;  %v8484_v45 = vpop.eup %8483  ;;  %v11086_v0 = vld [vmem:[#allocation15_spill] sm:$0xff] }
 0xa1a   :  { %v8486_v51 = vpop.eup %8485  ;;  %v3885_v26 = vadd.f32 %v11086_v0, %v10262_v48 }
 0xa1b   :  { %v10350_v27 = vadd.f32 %v4808_v47, %v4806_v41  ;;  %v4795_v30 = vmul.f32 0.5, %v4793_v42  ;;  %v4809_v46 = vmul.f32 %v8484_v45, %v4787_v39  ;;  %v8488_v12 = vpop.eup %8487  ;;  %v4802_v19 = vadd.f32 1.0, %v8486_v51  ;;  %v11087_v39 = vld [vmem:[#allocation17_spill] sm:$0xff] }
 0xa1c   :  { %v4803_v28 = vadd.f32 1.0, %v8488_v12  ;;  %v3996_v42 = vadd.f32 %v11087_v39, %v10266_v49  ;;  %v11092_v39 = vld [vmem:[#allocation21_spill] sm:$0xff] }
 0xa1d   :  { %v4807_v50 = vmul.f32 %v4795_v30, %v10295_v38  ;;  %8489 = vtanh.f32 %v10350_v27  ;;  %v4804_v54 = vmul.f32 0.5, %v4802_v19 }
 0xa1e   :  { %v4805_v55 = vmul.f32 0.5, %v4803_v28 }
 0xa1f   :  { %v10354_v52 = vadd.f32 %v4809_v46, %v4807_v50  ;;  %v11088_v46 = vld [vmem:[#allocation18_spill] sm:$0xff] }
 0xa20   :  { %v3887_v50 = vadd.f32 %v11088_v46, %v10254_v59 }
 0xa21   :  { %8491 = vtanh.f32 %v10354_v52 }
 0xa2a   :  { %v8490_v61 = vpop.eup %8489 }
 0xa2b   :  { %v4814_v58 = vmul.f32 %v8490_v61, %v4804_v54  ;;  %v11089_v61 = vld [vmem:[#allocation19_spill] sm:$0xff] }
 0xa2c   :  { %v3889_v54 = vadd.f32 %v11089_v61, %v10262_v48 }
 0xa2e   :  { %v8492_v57 = vpop.eup %8491 }
 0xa2f   :  { %v4815_v60 = vmul.f32 %v8492_v57, %v4805_v55 }
 0xa31   :  { %v7802_v62 = vpack.c.bf16 %v4815_v60, %v4814_v58 }
 0xa33   :  { %7803 = vst [vmem:[#allocation4] sm:$0xff] %v7802_v62   ;;  %7869 = vst [vmem:[%s10917_s7 + $0x8] sm:$0xff] %v7802_v62   ;;  %v11090_v62 = vld [vmem:[#allocation14_spill] sm:$0xff] }
 0xa3a   :  { %v8191_v38 = vld [vmem:[#allocation4] sm:$0xff]  }
 0xa3b   :  { %5074 = vmatmul.mubr.bf16.vlgmr.msra.gmra.mxu0 %v8191_v38  ;;  %5117 = vmatmul.mubr.bf16.vlgmr.msra.gmra.mxu1 %v8191_v38  ;;  %v4000_v38 = vadd.f32 %v11090_v62, %v10266_v49 }
 0xa3c   :  { %5430 = vmatprep.mubr.bf16.mxu0 %v10976_v34  ;;  %5473 = vmatprep.mubr.bf16.mxu1 %v10976_v34 }
 0xa3d   :  { %5399 = vmatpush1.bf16.msra.mxu0 %v10375_v3  ;;  %5442 = vmatpush1.bf16.msra.mxu1 %v10380_v4 }
 0xa3e   :  { %5400 = vmatprep.subr.bf16.mxu0 %v10389_v36  ;;  %5443 = vmatprep.subr.bf16.mxu1 %v10394_v5 }
 0xa41   :  { %5401 = vmatpush1.bf16.msra.mxu0 %v10399_v32  ;;  %5444 = vmatpush1.bf16.msra.mxu1 %v10404_v13 }
 0xa42   :  { %5402 = vmatprep.subr.bf16.mxu0 %v10413_v35  ;;  %5445 = vmatprep.subr.bf16.mxu1 %v10418_v15 }
 0xa45   :  { %5403 = vmatpush1.bf16.msra.mxu0 %v10423_v24  ;;  %5446 = vmatpush1.bf16.msra.mxu1 %v10428_v20 }
 0xa46   :  { %5404 = vmatprep.subr.bf16.mxu0 %v10437_v43  ;;  %5447 = vmatprep.subr.bf16.mxu1 %v10442_v31 }
 0xa49   :  { %5405 = vmatpush1.bf16.msra.mxu0 %v10447_v7  ;;  %5448 = vmatpush1.bf16.msra.mxu1 %v10452_v8 }
 0xa4a   :  { %5406 = vmatprep.subr.bf16.mxu0 %v10461_v18  ;;  %5449 = vmatprep.subr.bf16.mxu1 %v10466_v9 }
 0xa4d   :  { %5407 = vmatpush1.bf16.msra.mxu0 %v10471_v10  ;;  %5450 = vmatpush1.bf16.msra.mxu1 %v10476_v33 }
 0xa4e   :  { %5408 = vmatprep.subr.bf16.mxu0 %v10485_v14  ;;  %5451 = vmatprep.subr.bf16.mxu1 %v10490_v1 }
 0xa51   :  { %5409 = vmatpush1.bf16.msra.mxu0 %v10495_v16  ;;  %5452 = vmatpush1.bf16.msra.mxu1 %v10500_v21 }
 0xa52   :  { %5410 = vmatprep.subr.bf16.mxu0 %v10507_v37  ;;  %5453 = vmatprep.subr.bf16.mxu1 %v10524_v22 }
 0xa55   :  { %5411 = vmatpush1.bf16.msra.mxu0 %v10514_v53  ;;  %5454 = vmatpush1.bf16.msra.mxu1 %v10519_v56 }
 0xa56   :  { %5412 = vmatprep.subr.bf16.mxu0 %v10530_v40  ;;  %5455 = vmatprep.subr.bf16.mxu1 %v10535_v17 }
 0xa59   :  { %5413 = vmatpush1.bf16.msra.mxu0 %v10543_v11  ;;  %5456 = vmatpush1.bf16.msra.mxu1 %v10548_v23 }
 0xa5a   :  { %5755 = vmatprep.subr.bf16.mxu0 %v10365_v63  ;;  %5798 = vmatprep.subr.bf16.mxu1 %v10370_v2 }
 0xafb   :  { %v5075_v25 = vpop.f32.mrf.mxu0  ;;  %v5118_v47 = vpop.f32.mrf.mxu1 }
 0xafc   :  { %v5127_v41 = vadd.f32 %v5075_v25, %v3883_v44  ;;  %v5129_v19 = vadd.f32 %v5118_v47, %v3996_v42  ;;  %v11091_v47 = vld [vmem:[#allocation16_spill] sm:$0xff]  ;;  %v4002_v42 = vadd.f32 %v11092_v39, %v10286_v29 }
 0xafd   :  { %v5077_v45 = vpop.f32.mrf.mxu0  ;;  %v5120_v30 = vpop.f32.mrf.mxu1 }
 0xafe   :  { %v5137_v51 = vmul.f32 0.5, %v5127_v41  ;;  %v5128_v12 = vadd.f32 %v5077_v45, %v3885_v26  ;;  %v3998_v26 = vadd.f32 %v11091_v47, %v10286_v29 }
 0xaff   :  { %v5079_v28 = vpop.f32.mrf.mxu0  ;;  %v5122_v58 = vpop.f32.mrf.mxu1 }
 0xb00   :  { %8493 = vtanh.f32 %v5137_v51  ;;  %v5145_v55 = vmul.f32 0.5, %v5128_v12  ;;  %v5131_v57 = vadd.f32 %v5079_v28, %v3887_v50  ;;  %v5133_v25 = vadd.f32 %v5122_v58, %v4000_v38 }
 0xb01   :  { %v5081_v60 = vpop.f32.mrf.mxu0  ;;  %v5124_v41 = vpop.f32.mrf.mxu1  ;;  %v5130_v45 = vadd.f32 %v5120_v30, %v3998_v26 }
 0xb02   :  { %8495 = vtanh.f32 %v5145_v55  ;;  %v5138_v6 = vmul.f32 0.5, %v5131_v57  ;;  %v5132_v44 = vadd.f32 %v5081_v60, %v3889_v54  ;;  %v5134_v46 = vadd.f32 %v5124_v41, %v4002_v42 }
 0xb03   :  { %8497 = vtanh.f32 %v5129_v19  ;;  %v5155_v28 = vmul.f32 0.5, %v5130_v45 }
 0xb04   :  { %8499 = vtanh.f32 %v5138_v6  ;;  %v5146_v0 = vmul.f32 0.5, %v5132_v44  ;;  %v5156_v55 = vmul.f32 0.5, %v5134_v46 }
 0xb06   :  { %8501 = vtanh.f32 %v5146_v0 }
 0xb07   :  { %8503 = vtanh.f32 %v5133_v25 }
 0xb08   :  { %8505 = vtanh.f32 %v5155_v28 }
 0xb09   :  { %8507 = vtanh.f32 %v5156_v55  ;;  %v11093_v55 = vld [vmem:[#allocation20_spill] sm:$0xff] }
 0xb0d   :  { %v8494_v50 = vpop.eup %8493 }
 0xb0e   :  { %v5141_v51 = vadd.f32 1.0, %v8494_v50 }
 0xb0f   :  { %v8496_v12 = vpop.eup %8495 }
 0xb10   :  { %v8498_v61 = vpop.eup %8497  ;;  %v5143_v19 = vmul.f32 0.5, %v5141_v51  ;;  %v5149_v54 = vadd.f32 1.0, %v8496_v12 }
 0xb11   :  { %v8500_v57 = vpop.eup %8499 }
 0xb12   :  { %v5151_v58 = vmul.f32 0.5, %v5149_v54  ;;  %v5165_v60 = vmul.f32 %v8498_v61, %v5143_v19  ;;  %v5142_v62 = vadd.f32 1.0, %v8500_v57  ;;  %v3893_v57 = vadd.f32 %v11093_v55, %v10254_v59 }
 0xb13   :  { %v8502_v38 = vpop.eup %8501 }
 0xb14   :  { %v5163_v6 = vmul.f32 %v5151_v58, %v10350_v27  ;;  %v5144_v44 = vmul.f32 0.5, %v5142_v62  ;;  %v5150_v25 = vadd.f32 1.0, %v8502_v38  ;;  %v8504_v30 = vpop.eup %8503  ;;  %v11094_v62 = vld [vmem:[#allocation23_spill] sm:$0xff] }
 0xb15   :  { %v8506_v42 = vpop.eup %8505  ;;  %v3895_v38 = vadd.f32 %v11094_v62, %v10262_v48 }
 0xb16   :  { %v10573_v0 = vadd.f32 %v5165_v60, %v5163_v6  ;;  %v5152_v47 = vmul.f32 0.5, %v5150_v25  ;;  %v5166_v26 = vmul.f32 %v8504_v30, %v5144_v44  ;;  %v8508_v45 = vpop.eup %8507  ;;  %v5159_v46 = vadd.f32 1.0, %v8506_v42  ;;  %v11095_v44 = vld [vmem:[#allocation25_spill] sm:$0xff] }
 0xb17   :  { %v5160_v27 = vadd.f32 1.0, %v8508_v45  ;;  %v4006_v25 = vadd.f32 %v11095_v44, %v10266_v49  ;;  %v11100_v44 = vld [vmem:[#allocation29_spill] sm:$0xff] }
 0xb18   :  { %v5164_v41 = vmul.f32 %v5152_v47, %v10354_v52  ;;  %8509 = vtanh.f32 %v10573_v0  ;;  %v5161_v51 = vmul.f32 0.5, %v5159_v46 }
 0xb19   :  { %v5162_v12 = vmul.f32 0.5, %v5160_v27 }
 0xb1a   :  { %v10577_v39 = vadd.f32 %v5166_v26, %v5164_v41  ;;  %v11096_v26 = vld [vmem:[#allocation26_spill] sm:$0xff] }
 0xb1b   :  { %v3897_v41 = vadd.f32 %v11096_v26, %v10254_v59 }
 0xb1c   :  { %8511 = vtanh.f32 %v10577_v39 }
 0xb25   :  { %v8510_v50 = vpop.eup %8509 }
 0xb26   :  { %v5171_v61 = vmul.f32 %v8510_v50, %v5161_v51  ;;  %v11097_v50 = vld [vmem:[#allocation27_spill] sm:$0xff] }
 0xb27   :  { %v3899_v51 = vadd.f32 %v11097_v50, %v10262_v48 }
 0xb29   :  { %v8512_v28 = vpop.eup %8511 }
 0xb2a   :  { %v5172_v19 = vmul.f32 %v8512_v28, %v5162_v12 }
 0xb2c   :  { %v7812_v54 = vpack.c.bf16 %v5172_v19, %v5171_v61 }
 0xb2e   :  { %7813 = vst [vmem:[#allocation4] sm:$0xff] %v7812_v54   ;;  %7870 = vst [vmem:[%s10917_s7 + $0x10] sm:$0xff] %v7812_v54   ;;  %v11098_v54 = vld [vmem:[#allocation22_spill] sm:$0xff] }
 0xb35   :  { %v8240_v52 = vld [vmem:[#allocation4] sm:$0xff]  }
 0xb36   :  { %5431 = vmatmul.mubr.bf16.vlgmr.msra.gmra.mxu0 %v8240_v52  ;;  %5474 = vmatmul.mubr.bf16.vlgmr.msra.gmra.mxu1 %v8240_v52  ;;  %v4010_v52 = vadd.f32 %v11098_v54, %v10266_v49 }
 0xb37   :  { %5756 = vmatpush1.bf16.msra.mxu0 %v10375_v3  ;;  %5799 = vmatpush1.bf16.msra.mxu1 %v10380_v4 }
 0xb38   :  { %5757 = vmatprep.subr.bf16.mxu0 %v10389_v36  ;;  %5800 = vmatprep.subr.bf16.mxu1 %v10394_v5 }
 0xb39   :  { %5787 = vmatprep.mubr.bf16.mxu0 %v10976_v34  ;;  %5830 = vmatprep.mubr.bf16.mxu1 %v10976_v34 }
 0xb3b   :  { %5758 = vmatpush1.bf16.msra.mxu0 %v10399_v32  ;;  %5801 = vmatpush1.bf16.msra.mxu1 %v10404_v13 }
 0xb3c   :  { %5759 = vmatprep.subr.bf16.mxu0 %v10413_v35  ;;  %5802 = vmatprep.subr.bf16.mxu1 %v10418_v15 }
 0xb3f   :  { %5760 = vmatpush1.bf16.msra.mxu0 %v10423_v24  ;;  %5803 = vmatpush1.bf16.msra.mxu1 %v10428_v20 }
 0xb40   :  { %5761 = vmatprep.subr.bf16.mxu0 %v10437_v43  ;;  %5804 = vmatprep.subr.bf16.mxu1 %v10442_v31 }
 0xb43   :  { %5762 = vmatpush1.bf16.msra.mxu0 %v10447_v7  ;;  %5805 = vmatpush1.bf16.msra.mxu1 %v10452_v8 }
 0xb44   :  { %5763 = vmatprep.subr.bf16.mxu0 %v10461_v18  ;;  %5806 = vmatprep.subr.bf16.mxu1 %v10466_v9 }
 0xb47   :  { %5764 = vmatpush1.bf16.msra.mxu0 %v10471_v10  ;;  %5807 = vmatpush1.bf16.msra.mxu1 %v10476_v33 }
 0xb48   :  { %5765 = vmatprep.subr.bf16.mxu0 %v10485_v14  ;;  %5808 = vmatprep.subr.bf16.mxu1 %v10490_v1 }
 0xb4b   :  { %5766 = vmatpush1.bf16.msra.mxu0 %v10495_v16  ;;  %5809 = vmatpush1.bf16.msra.mxu1 %v10500_v21 }
 0xb4c   :  { %5767 = vmatprep.subr.bf16.mxu0 %v10507_v37  ;;  %5810 = vmatprep.subr.bf16.mxu1 %v10524_v22 }
 0xb4f   :  { %5768 = vmatpush1.bf16.msra.mxu0 %v10514_v53  ;;  %5811 = vmatpush1.bf16.msra.mxu1 %v10519_v56 }
 0xb50   :  { %5769 = vmatprep.subr.bf16.mxu0 %v10530_v40  ;;  %5812 = vmatprep.subr.bf16.mxu1 %v10535_v17 }
 0xb53   :  { %5770 = vmatpush1.bf16.msra.mxu0 %v10543_v11  ;;  %5813 = vmatpush1.bf16.msra.mxu1 %v10548_v23 }
 0xb54   :  { %6112 = vmatprep.subr.bf16.mxu0 %v10365_v63  ;;  %6155 = vmatprep.subr.bf16.mxu1 %v10370_v2 }
 0xbf6   :  { %v5432_v58 = vpop.f32.mrf.mxu0  ;;  %v5475_v60 = vpop.f32.mrf.mxu1 }
 0xbf7   :  { %v5484_v6 = vadd.f32 %v5432_v58, %v3893_v57  ;;  %v5486_v46 = vadd.f32 %v5475_v60, %v4006_v25  ;;  %v11099_v60 = vld [vmem:[#allocation24_spill] sm:$0xff]  ;;  %v4012_v25 = vadd.f32 %v11100_v44, %v10286_v29 }
 0xbf8   :  { %v5434_v30 = vpop.f32.mrf.mxu0  ;;  %v5477_v47 = vpop.f32.mrf.mxu1 }
 0xbf9   :  { %v5494_v42 = vmul.f32 0.5, %v5484_v6  ;;  %v5485_v45 = vadd.f32 %v5434_v30, %v3895_v38  ;;  %v4008_v38 = vadd.f32 %v11099_v60, %v10286_v29 }
 0xbfa   :  { %v5436_v27 = vpop.f32.mrf.mxu0  ;;  %v5479_v61 = vpop.f32.mrf.mxu1 }
 0xbfb   :  { %8513 = vtanh.f32 %v5494_v42  ;;  %v5502_v12 = vmul.f32 0.5, %v5485_v45  ;;  %v5488_v28 = vadd.f32 %v5436_v27, %v3897_v41  ;;  %v5490_v58 = vadd.f32 %v5479_v61, %v4010_v52 }
 0xbfc   :  { %v5438_v19 = vpop.f32.mrf.mxu0  ;;  %v5481_v6 = vpop.f32.mrf.mxu1  ;;  %v5487_v30 = vadd.f32 %v5477_v47, %v4008_v38 }
 0xbfd   :  { %8515 = vtanh.f32 %v5502_v12  ;;  %v5495_v55 = vmul.f32 0.5, %v5488_v28  ;;  %v5489_v57 = vadd.f32 %v5438_v19, %v3899_v51  ;;  %v5491_v26 = vadd.f32 %v5481_v6, %v4012_v25 }
 0xbfe   :  { %8517 = vtanh.f32 %v5486_v46  ;;  %v5512_v27 = vmul.f32 0.5, %v5487_v30 }
 0xbff   :  { %8519 = vtanh.f32 %v5495_v55  ;;  %v5503_v62 = vmul.f32 0.5, %v5489_v57  ;;  %v5513_v12 = vmul.f32 0.5, %v5491_v26 }
 0xc01   :  { %8521 = vtanh.f32 %v5503_v62 }
 0xc02   :  { %8523 = vtanh.f32 %v5490_v58 }
 0xc03   :  { %8525 = vtanh.f32 %v5512_v27 }
 0xc04   :  { %8527 = vtanh.f32 %v5513_v12  ;;  %v11101_v12 = vld [vmem:[#allocation28_spill] sm:$0xff] }
 0xc08   :  { %v8514_v41 = vpop.eup %8513 }
 0xc09   :  { %v5498_v42 = vadd.f32 1.0, %v8514_v41 }
 0xc0a   :  { %v8516_v45 = vpop.eup %8515 }
 0xc0b   :  { %v8518_v50 = vpop.eup %8517  ;;  %v5500_v46 = vmul.f32 0.5, %v5498_v42  ;;  %v5506_v51 = vadd.f32 1.0, %v8516_v45 }
 0xc0c   :  { %v8520_v28 = vpop.eup %8519 }
 0xc0d   :  { %v5508_v61 = vmul.f32 0.5, %v5506_v51  ;;  %v5522_v19 = vmul.f32 %v8518_v50, %v5500_v46  ;;  %v5499_v54 = vadd.f32 1.0, %v8520_v28  ;;  %v3903_v28 = vadd.f32 %v11101_v12, %v10254_v59 }
 0xc0e   :  { %v8522_v52 = vpop.eup %8521 }
 0xc0f   :  { %v5520_v55 = vmul.f32 %v5508_v61, %v10573_v0  ;;  %v5501_v57 = vmul.f32 0.5, %v5499_v54  ;;  %v5507_v58 = vadd.f32 1.0, %v8522_v52  ;;  %v8524_v47 = vpop.eup %8523  ;;  %v11102_v54 = vld [vmem:[#allocation33_spill] sm:$0xff] }
 0xc10   :  { %v8526_v25 = vpop.eup %8525  ;;  %v3905_v52 = vadd.f32 %v11102_v54, %v10262_v48 }
 0xc11   :  { %v10634_v62 = vadd.f32 %v5522_v19, %v5520_v55  ;;  %v5509_v60 = vmul.f32 0.5, %v5507_v58  ;;  %v5523_v38 = vmul.f32 %v8524_v47, %v5501_v57  ;;  %v8528_v30 = vpop.eup %8527  ;;  %v5516_v26 = vadd.f32 1.0, %v8526_v25  ;;  %v11103_v57 = vld [vmem:[#allocation31_spill] sm:$0xff] }
 0xc12   :  { %v5517_v0 = vadd.f32 1.0, %v8528_v30  ;;  %v4016_v58 = vadd.f32 %v11103_v57, %v10266_v49 }
 0xc13   :  { %v5521_v6 = vmul.f32 %v5509_v60, %v10577_v39  ;;  %8529 = vtanh.f32 %v10634_v62  ;;  %v5518_v42 = vmul.f32 0.5, %v5516_v26  ;;  %v11105_v26 = vld [vmem:[#allocation35_spill] sm:$0xff] }
 0xc14   :  { %v5519_v45 = vmul.f32 0.5, %v5517_v0  ;;  %v3909_v0 = vadd.f32 %v11105_v26, %v10262_v48 }
 0xc15   :  { %v10638_v44 = vadd.f32 %v5523_v38, %v5521_v6  ;;  %v11104_v38 = vld [vmem:[#allocation30_spill] sm:$0xff] }
 0xc16   :  { %v3907_v6 = vadd.f32 %v11104_v38, %v10254_v59 }
 0xc17   :  { %8531 = vtanh.f32 %v10638_v44 }
 0xc20   :  { %v8530_v41 = vpop.eup %8529 }
 0xc21   :  { %v5528_v50 = vmul.f32 %v8530_v41, %v5518_v42 }
 0xc24   :  { %v8532_v27 = vpop.eup %8531 }
 0xc25   :  { %v5529_v46 = vmul.f32 %v8532_v27, %v5519_v45 }
 0xc27   :  { %v7822_v51 = vpack.c.bf16 %v5529_v46, %v5528_v50  ;;  %v11106_v50 = vld [vmem:[#allocation34_spill] sm:$0xff] }
 0xc28   :  { %v4020_v46 = vadd.f32 %v11106_v50, %v10266_v49 }
 0xc29   :  { %7823 = vst [vmem:[#allocation4] sm:$0xff] %v7822_v51   ;;  %7871 = vst [vmem:[%s10917_s7 + $0x18] sm:$0xff] %v7822_v51  }
 0xc30   :  { %v8241_v39 = vld [vmem:[#allocation4] sm:$0xff]  }
 0xc31   :  { %5788 = vmatmul.mubr.bf16.vlgmr.msra.gmra.mxu0 %v8241_v39  ;;  %5831 = vmatmul.mubr.bf16.vlgmr.msra.gmra.mxu1 %v8241_v39 }
 0xc32   :  { %6113 = vmatpush1.bf16.msra.mxu0 %v10375_v3  ;;  %6156 = vmatpush1.bf16.msra.mxu1 %v10380_v4 }
 0xc33   :  { %6114 = vmatprep.subr.bf16.mxu0 %v10389_v36  ;;  %6157 = vmatprep.subr.bf16.mxu1 %v10394_v5 }
 0xc34   :  { %6144 = vmatprep.mubr.bf16.mxu0 %v10976_v34  ;;  %6187 = vmatprep.mubr.bf16.mxu1 %v10976_v34 }
 0xc36   :  { %6115 = vmatpush1.bf16.msra.mxu0 %v10399_v32  ;;  %6158 = vmatpush1.bf16.msra.mxu1 %v10404_v13 }
 0xc37   :  { %6116 = vmatprep.subr.bf16.mxu0 %v10413_v35  ;;  %6159 = vmatprep.subr.bf16.mxu1 %v10418_v15 }
 0xc3a   :  { %6117 = vmatpush1.bf16.msra.mxu0 %v10423_v24  ;;  %6160 = vmatpush1.bf16.msra.mxu1 %v10428_v20 }
 0xc3b   :  { %6118 = vmatprep.subr.bf16.mxu0 %v10437_v43  ;;  %6161 = vmatprep.subr.bf16.mxu1 %v10442_v31 }
 0xc3e   :  { %6119 = vmatpush1.bf16.msra.mxu0 %v10447_v7  ;;  %6162 = vmatpush1.bf16.msra.mxu1 %v10452_v8 }
 0xc3f   :  { %6120 = vmatprep.subr.bf16.mxu0 %v10461_v18  ;;  %6163 = vmatprep.subr.bf16.mxu1 %v10466_v9 }
 0xc42   :  { %6121 = vmatpush1.bf16.msra.mxu0 %v10471_v10  ;;  %6164 = vmatpush1.bf16.msra.mxu1 %v10476_v33 }
 0xc43   :  { %6122 = vmatprep.subr.bf16.mxu0 %v10485_v14  ;;  %6165 = vmatprep.subr.bf16.mxu1 %v10490_v1 }
 0xc46   :  { %6123 = vmatpush1.bf16.msra.mxu0 %v10495_v16  ;;  %6166 = vmatpush1.bf16.msra.mxu1 %v10500_v21 }
 0xc47   :  { %6124 = vmatprep.subr.bf16.mxu0 %v10507_v37  ;;  %6167 = vmatprep.subr.bf16.mxu1 %v10524_v22 }
 0xc4a   :  { %6125 = vmatpush1.bf16.msra.mxu0 %v10514_v53  ;;  %6168 = vmatpush1.bf16.msra.mxu1 %v10519_v56 }
 0xc4b   :  { %6126 = vmatprep.subr.bf16.mxu0 %v10530_v40  ;;  %6169 = vmatprep.subr.bf16.mxu1 %v10535_v17 }
 0xc4e   :  { %6127 = vmatpush1.bf16.msra.mxu0 %v10543_v11  ;;  %6170 = vmatpush1.bf16.msra.mxu1 %v10548_v23 }
 0xc4f   :  { %6469 = vmatprep.subr.bf16.mxu0 %v10365_v63  ;;  %6512 = vmatprep.subr.bf16.mxu1 %v10370_v2 }
 0xcf1   :  { %v5789_v61 = vpop.f32.mrf.mxu0  ;;  %v5832_v19 = vpop.f32.mrf.mxu1 }
 0xcf2   :  { %v5841_v55 = vadd.f32 %v5789_v61, %v3903_v28  ;;  %v5843_v2 = vadd.f32 %v5832_v19, %v4016_v58  ;;  %v11107_v61 = vld [vmem:[#allocation32_spill] sm:$0xff] }
 0xcf3   :  { %v5791_v47 = vpop.f32.mrf.mxu0  ;;  %v5834_v60 = vpop.f32.mrf.mxu1  ;;  %v4018_v19 = vadd.f32 %v11107_v61, %v10286_v29 }
 0xcf4   :  { %v5851_v63 = vmul.f32 0.5, %v5841_v55  ;;  %v5842_v25 = vadd.f32 %v5791_v47, %v3905_v52  ;;  %v11108_v52 = vld [vmem:[#allocation37_spill] sm:$0xff] }
 0xcf5   :  { %v5793_v30 = vpop.f32.mrf.mxu0  ;;  %v5836_v45 = vpop.f32.mrf.mxu1  ;;  %v4022_v55 = vadd.f32 %v11108_v52, %v10286_v29  ;;  %v5844_v57 = vadd.f32 %v5834_v60, %v4018_v19 }
 0xcf6   :  { %8533 = vtanh.f32 %v5851_v63  ;;  %v5859_v41 = vmul.f32 0.5, %v5842_v25  ;;  %v5845_v42 = vadd.f32 %v5793_v30, %v3907_v6  ;;  %v5847_v12 = vadd.f32 %v5836_v45, %v4020_v46 }
 0xcf7   :  { %v5795_v27 = vpop.f32.mrf.mxu0  ;;  %v5838_v54 = vpop.f32.mrf.mxu1  ;;  %v5869_v63 = vmul.f32 0.5, %v5844_v57 }
 0xcf8   :  { %8535 = vtanh.f32 %v5859_v41  ;;  %v5852_v51 = vmul.f32 0.5, %v5845_v42  ;;  %v5846_v39 = vadd.f32 %v5795_v27, %v3909_v0  ;;  %v5848_v58 = vadd.f32 %v5838_v54, %v4022_v55 }
 0xcf9   :  { %8537 = vtanh.f32 %v5843_v2 }
 0xcfa   :  { %8539 = vtanh.f32 %v5852_v51  ;;  %v5860_v28 = vmul.f32 0.5, %v5846_v39  ;;  %v5870_v26 = vmul.f32 0.5, %v5848_v58 }
 0xcfc   :  { %8541 = vtanh.f32 %v5860_v28 }
 0xcfd   :  { %8543 = vtanh.f32 %v5847_v12 }
 0xcfe   :  { %8545 = vtanh.f32 %v5869_v63 }
 0xcff   :  { %8547 = vtanh.f32 %v5870_v26  ;;  %v11116_v26 = vld [vmem:[#allocation45_spill] sm:$0xff] }
 0xd03   :  { %v8534_v47 = vpop.eup %8533 }
 0xd04   :  { %v5855_v38 = vadd.f32 1.0, %v8534_v47 }
 0xd05   :  { %v8536_v6 = vpop.eup %8535 }
 0xd06   :  { %v8538_v25 = vpop.eup %8537  ;;  %v5857_v2 = vmul.f32 0.5, %v5855_v38  ;;  %v5863_v30 = vadd.f32 1.0, %v8536_v6 }
 0xd07   :  { %v8540_v0 = vpop.eup %8539 }
 0xd08   :  { %v5865_v41 = vmul.f32 0.5, %v5863_v30  ;;  %v5879_v42 = vmul.f32 %v8538_v25, %v5857_v2  ;;  %v5856_v45 = vadd.f32 1.0, %v8540_v0  ;;  %v4032_v0 = vadd.f32 %v11116_v26, %v10286_v29  ;;  %v8274_v26 = vld [vmem:[%s10915_s5 + $0x40] ss:$16 sps:$4 sm:$0xff]  }
 0xd09   :  { %v8542_v27 = vpop.eup %8541 }
 0xd0a   :  { %v5877_v50 = vmul.f32 %v5865_v41, %v10634_v62  ;;  %v5858_v46 = vmul.f32 0.5, %v5856_v45  ;;  %v5864_v51 = vadd.f32 1.0, %v8542_v27  ;;  %v8544_v60 = vpop.eup %8543 }
 0xd0b   :  { %v8546_v54 = vpop.eup %8545 }
 0xd0c   :  { %v10695_v39 = vadd.f32 %v5879_v42, %v5877_v50  ;;  %v5866_v12 = vmul.f32 0.5, %v5864_v51  ;;  %v5880_v28 = vmul.f32 %v8544_v60, %v5858_v46  ;;  %v8548_v52 = vpop.eup %8547  ;;  %v5873_v55 = vadd.f32 1.0, %v8546_v54 }
 0xd0d   :  { %v5874_v62 = vadd.f32 1.0, %v8548_v52 }
 0xd0e   :  { %v5878_v61 = vmul.f32 %v5866_v12, %v10638_v44  ;;  %8549 = vtanh.f32 %v10695_v39  ;;  %v5875_v58 = vmul.f32 0.5, %v5873_v55 }
 0xd0f   :  { %v5876_v47 = vmul.f32 0.5, %v5874_v62 }
 0xd10   :  { %v10699_v19 = vadd.f32 %v5880_v28, %v5878_v61 }
 0xd12   :  { %8551 = vtanh.f32 %v10699_v19 }
 0xd1b   :  { %v8550_v57 = vpop.eup %8549 }
 0xd1c   :  { %v5885_v6 = vmul.f32 %v8550_v57, %v5875_v58 }
 0xd1f   :  { %v8552_v38 = vpop.eup %8551 }
 0xd20   :  { %v5886_v63 = vmul.f32 %v8552_v38, %v5876_v47 }
 0xd22   :  { %v7832_v25 = vpack.c.bf16 %v5886_v63, %v5885_v6 }
 0xd24   :  { %7833 = vst [vmem:[#allocation4] sm:$0xff] %v7832_v25   ;;  %7872 = vst [vmem:[%s10917_s7 + $0x20] sm:$0xff] %v7832_v25  }
 0xd2b   :  { %v8242_v44 = vld [vmem:[#allocation4] sm:$0xff]  }
 0xd2c   :  { %6145 = vmatmul.mubr.bf16.vlgmr.msra.gmra.mxu0 %v8242_v44  ;;  %6188 = vmatmul.mubr.bf16.vlgmr.msra.gmra.mxu1 %v8242_v44 }
 0xd2d   :  { %6470 = vmatpush1.bf16.msra.mxu0 %v10375_v3  ;;  %6513 = vmatpush1.bf16.msra.mxu1 %v10380_v4  ;;  %v11109_v3 = vld [vmem:[#allocation36_spill] sm:$0xff] }
 0xd2e   :  { %6471 = vmatprep.subr.bf16.mxu0 %v10389_v36  ;;  %6514 = vmatprep.subr.bf16.mxu1 %v10394_v5  ;;  %v3913_v4 = vadd.f32 %v11109_v3, %v10254_v59 }
 0xd2f   :  { %6501 = vmatprep.mubr.bf16.mxu0 %v10976_v34  ;;  %6544 = vmatprep.mubr.bf16.mxu1 %v10976_v34 }
 0xd31   :  { %6472 = vmatpush1.bf16.msra.mxu0 %v10399_v32  ;;  %6515 = vmatpush1.bf16.msra.mxu1 %v10404_v13  ;;  %v11110_v32 = vld [vmem:[#allocation41_spill] sm:$0xff] }
 0xd32   :  { %6473 = vmatprep.subr.bf16.mxu0 %v10413_v35  ;;  %6516 = vmatprep.subr.bf16.mxu1 %v10418_v15  ;;  %v3915_v13 = vadd.f32 %v11110_v32, %v10262_v48  ;;  %v11111_v15 = vld [vmem:[#allocation39_spill] sm:$0xff] }
 0xd35   :  { %6474 = vmatpush1.bf16.msra.mxu0 %v10423_v24  ;;  %6517 = vmatpush1.bf16.msra.mxu1 %v10428_v20  ;;  %v4026_v24 = vadd.f32 %v11111_v15, %v10266_v49 }
 0xd36   :  { %6475 = vmatprep.subr.bf16.mxu0 %v10437_v43  ;;  %6518 = vmatprep.subr.bf16.mxu1 %v10442_v31  ;;  %v11112_v31 = vld [vmem:[#allocation38_spill] sm:$0xff] }
 0xd39   :  { %6476 = vmatpush1.bf16.msra.mxu0 %v10447_v7  ;;  %6519 = vmatpush1.bf16.msra.mxu1 %v10452_v8  ;;  %v3917_v7 = vadd.f32 %v11112_v31, %v10254_v59  ;;  %v8246_v31 = vld [vmem:[%s10915_s5 + $0xe4] ss:$16 sps:$4 sm:$0xff]  }
 0xd3a   :  { %6477 = vmatprep.subr.bf16.mxu0 %v10461_v18  ;;  %6520 = vmatprep.subr.bf16.mxu1 %v10466_v9 }
 0xd3d   :  { %6478 = vmatpush1.bf16.msra.mxu0 %v10471_v10  ;;  %6521 = vmatpush1.bf16.msra.mxu1 %v10476_v33  ;;  %v11113_v33 = vld [vmem:[#allocation43_spill] sm:$0xff] }
 0xd3e   :  { %6479 = vmatprep.subr.bf16.mxu0 %v10485_v14  ;;  %6522 = vmatprep.subr.bf16.mxu1 %v10490_v1  ;;  %v3919_v14 = vadd.f32 %v11113_v33, %v10262_v48  ;;  %v8253_v33 = vld [vmem:[%s10915_s5 + $0xc8] ss:$16 sps:$4 sm:$0xff]  }
 0xd41   :  { %6480 = vmatpush1.bf16.msra.mxu0 %v10495_v16  ;;  %6523 = vmatpush1.bf16.msra.mxu1 %v10500_v21 }
 0xd42   :  { %6481 = vmatprep.subr.bf16.mxu0 %v10507_v37  ;;  %6524 = vmatprep.subr.bf16.mxu1 %v10524_v22 }
 0xd45   :  { %6482 = vmatpush1.bf16.msra.mxu0 %v10514_v53  ;;  %6525 = vmatpush1.bf16.msra.mxu1 %v10519_v56  ;;  %v11114_v53 = vld [vmem:[#allocation42_spill] sm:$0xff] }
 0xd46   :  { %6483 = vmatprep.subr.bf16.mxu0 %v10530_v40  ;;  %6526 = vmatprep.subr.bf16.mxu1 %v10535_v17  ;;  %v4030_v56 = vadd.f32 %v11114_v53, %v10266_v49  ;;  %v8267_v53 = vld [vmem:[%s10915_s5 + $0x8c] ss:$16 sps:$4 sm:$0xff]  }
 0xd49   :  { %6484 = vmatpush1.bf16.msra.mxu0 %v10543_v11  ;;  %6527 = vmatpush1.bf16.msra.mxu1 %v10548_v23  ;;  %v11115_v23 = vld [vmem:[#allocation40_spill] sm:$0xff] }
 0xd4a   :  { %v4028_v2 = vadd.f32 %v11115_v23, %v10286_v29  ;;  %6826 = vmatprep.subr.bf16.mxu0 %v8246_v31  ;;  %v8271_v23 = vld [vmem:[%s10915_s5 + $0x68] ss:$16 sps:$4 sm:$0xff]  }
 0xdec   :  { %v6146_v36 = vpop.f32.mrf.mxu0  ;;  %v6189_v5 = vpop.f32.mrf.mxu1 }
 0xded   :  { %v6198_v35 = vadd.f32 %v6146_v36, %v3913_v4  ;;  %v6200_v9 = vadd.f32 %v6189_v5, %v4026_v24 }
 0xdee   :  { %v6148_v20 = vpop.f32.mrf.mxu0  ;;  %v6191_v43 = vpop.f32.mrf.mxu1 }
 0xdef   :  { %v6208_v8 = vmul.f32 0.5, %v6198_v35  ;;  %v6199_v18 = vadd.f32 %v6148_v20, %v3915_v13  ;;  %v6201_v41 = vadd.f32 %v6191_v43, %v4028_v2  ;;  %v8276_v2 = vld [vmem:[%s10915_s5 + $0x44] ss:$16 sps:$4 sm:$0xff]  }
 0xdf0   :  { %v6150_v10 = vpop.f32.mrf.mxu0  ;;  %v6193_v21 = vpop.f32.mrf.mxu1 }
 0xdf1   :  { %8553 = vtanh.f32 %v6208_v8  ;;  %v6216_v1 = vmul.f32 0.5, %v6199_v18  ;;  %v6202_v16 = vadd.f32 %v6150_v10, %v3917_v7  ;;  %v6204_v17 = vadd.f32 %v6193_v21, %v4030_v56  ;;  %v8249_v7 = vld [vmem:[%s10915_s5 + $0xec] ss:$16 sps:$4 sm:$0xff]   ;;  %v8244_v8 = vld [vmem:[%s10915_s5 + $0xe0] ss:$16 sps:$4 sm:$0xff]  }
 0xdf2   :  { %v6152_v37 = vpop.f32.mrf.mxu0  ;;  %v6195_v30 = vpop.f32.mrf.mxu1  ;;  %v6226_v46 = vmul.f32 0.5, %v6201_v41  ;;  %v8247_v18 = vld [vmem:[%s10915_s5 + $0xe8] ss:$16 sps:$4 sm:$0xff]   ;;  %6869 = vmatprep.subr.bf16.mxu1 %v8249_v7  ;;  %v8250_v10 = vld [vmem:[%s10915_s5 + $0xc0] ss:$16 sps:$4 sm:$0xff]  }
 0xdf3   :  { %8555 = vtanh.f32 %v6216_v1  ;;  %v6209_v22 = vmul.f32 0.5, %v6202_v16  ;;  %v6203_v40 = vadd.f32 %v6152_v37, %v3919_v14  ;;  %v6205_v42 = vadd.f32 %v6195_v30, %v4032_v0  ;;  %v8258_v14 = vld [vmem:[%s10915_s5 + $0xa4] ss:$16 sps:$4 sm:$0xff]   ;;  %v8261_v1 = vld [vmem:[%s10915_s5 + $0xac] ss:$16 sps:$4 sm:$0xff]  }
 0xdf4   :  { %8557 = vtanh.f32 %v6200_v9  ;;  %v8255_v9 = vld [vmem:[%s10915_s5 + $0xcc] ss:$16 sps:$4 sm:$0xff]   ;;  %v8256_v16 = vld [vmem:[%s10915_s5 + $0xa0] ss:$16 sps:$4 sm:$0xff]   ;;  %v8259_v21 = vld [vmem:[%s10915_s5 + $0xa8] ss:$16 sps:$4 sm:$0xff]  }
 0xdf5   :  { %8559 = vtanh.f32 %v6209_v22  ;;  %v6217_v11 = vmul.f32 0.5, %v6203_v40  ;;  %v6227_v28 = vmul.f32 0.5, %v6205_v42  ;;  %v8264_v37 = vld [vmem:[%s10915_s5 + $0x84] ss:$16 sps:$4 sm:$0xff]   ;;  %v8262_v56 = vld [vmem:[%s10915_s5 + $0x80] ss:$16 sps:$4 sm:$0xff]  }
 0xdf6   :  { %v8265_v22 = vld [vmem:[%s10915_s5 + $0x88] ss:$16 sps:$4 sm:$0xff]   ;;  %v8270_v40 = vld [vmem:[%s10915_s5 + $0x64] ss:$16 sps:$4 sm:$0xff]   ;;  %v8279_v30 = vld [vmem:[%s10915_s5 + $0x4c] ss:$16 sps:$4 sm:$0xff]  }
 0xdf7   :  { %8561 = vtanh.f32 %v6217_v11  ;;  %v8268_v11 = vld [vmem:[%s10915_s5 + $0x60] ss:$16 sps:$4 sm:$0xff]   ;;  %v8277_v0 = vld [vmem:[%s10915_s5 + $0x48] ss:$16 sps:$4 sm:$0xff]   ;;  %v8282_v41 = vld [vmem:[%s10915_s5 + $0x24] ss:$16 sps:$4 sm:$0xff]  }
 0xdf8   :  { %8563 = vtanh.f32 %v6204_v17  ;;  %v8273_v17 = vld [vmem:[%s10915_s5 + $0x6c] ss:$16 sps:$4 sm:$0xff]   ;;  %v8280_v42 = vld [vmem:[%s10915_s5 + $0x20] ss:$16 sps:$4 sm:$0xff]  }
 0xdf9   :  { %8565 = vtanh.f32 %v6226_v46  ;;  %v8291_v46 = vld [vmem:[%s10915_s5 + $0xc] ss:$16 sps:$4 sm:$0xff]  }
 0xdfa   :  { %8567 = vtanh.f32 %v6227_v28 }
 0xdfe   :  { %v8554_v45 = vpop.eup %8553 }
 0xdff   :  { %v6212_v27 = vadd.f32 1.0, %v8554_v45  ;;  %v8283_v45 = vld [vmem:[%s10915_s5 + $0x28] ss:$16 sps:$4 sm:$0xff]  }
 0xe00   :  { %v8556_v50 = vpop.eup %8555 }
 0xe01   :  { %v8558_v51 = vpop.eup %8557  ;;  %v6214_v60 = vmul.f32 0.5, %v6212_v27  ;;  %v6220_v12 = vadd.f32 1.0, %v8556_v50  ;;  %v8285_v27 = vld [vmem:[%s10915_s5 + $0x2c] ss:$16 sps:$4 sm:$0xff]   ;;  %v8288_v50 = vld [vmem:[%s10915_s5 + $0x4] ss:$16 sps:$4 sm:$0xff]  }
 0xe02   :  { %v8560_v61 = vpop.eup %8559 }
 0xe03   :  { %v6222_v54 = vmul.f32 0.5, %v6220_v12  ;;  %v6236_v52 = vmul.f32 %v8558_v51, %v6214_v60  ;;  %v6213_v55 = vadd.f32 1.0, %v8560_v61  ;;  %v8286_v51 = vld [vmem:[%s10915_s5] ss:$16 sps:$4 sm:$0xff]   ;;  %v8289_v60 = vld [vmem:[%s10915_s5 + $0x8] ss:$16 sps:$4 sm:$0xff]  }
 0xe04   :  { %v8562_v62 = vpop.eup %8561  ;;  %v11117_v12 = vld [vmem:[#allocation44_spill] sm:$0xff] }
 0xe05   :  { %v6234_v57 = vmul.f32 %v6222_v54, %v10695_v39  ;;  %v6215_v58 = vmul.f32 0.5, %v6213_v55  ;;  %v6221_v47 = vadd.f32 1.0, %v8562_v62  ;;  %v8564_v38 = vpop.eup %8563  ;;  %v3923_v28 = vadd.f32 %v11117_v12, %v10254_v59 }
 0xe06   :  { %v8566_v4 = vpop.eup %8565 }
 0xe07   :  { %v10754_v6 = vadd.f32 %v6236_v52, %v6234_v57  ;;  %v6223_v63 = vmul.f32 0.5, %v6221_v47  ;;  %v6237_v25 = vmul.f32 %v8564_v38, %v6215_v58  ;;  %v8568_v36 = vpop.eup %8567  ;;  %v6230_v5 = vadd.f32 1.0, %v8566_v4  ;;  %v11118_v52 = vld [vmem:[#allocation49_spill] sm:$0xff]  ;;  %v11119_v57 = vld [vmem:[#allocation47_spill] sm:$0xff] }
 0xe08   :  { %v6231_v39 = vadd.f32 1.0, %v8568_v36  ;;  %v3925_v55 = vadd.f32 %v11118_v52, %v10262_v48  ;;  %v4036_v58 = vadd.f32 %v11119_v57, %v10266_v49 }
 0xe09   :  { %v6235_v44 = vmul.f32 %v6223_v63, %v10699_v19  ;;  %8569 = vtanh.f32 %v10754_v6  ;;  %v6232_v13 = vmul.f32 0.5, %v6230_v5  ;;  %v11120_v63 = vld [vmem:[#allocation46_spill] sm:$0xff] }
 0xe0a   :  { %v6233_v35 = vmul.f32 0.5, %v6231_v39  ;;  %v11121_v39 = vld [vmem:[#allocation51_spill] sm:$0xff] }
 0xe0b   :  { %v10758_v3 = vadd.f32 %v6237_v25, %v6235_v44  ;;  %v3927_v25 = vadd.f32 %v11120_v63, %v10254_v59 }
 0xe0d   :  { %8571 = vtanh.f32 %v10758_v3 }
 0xe16   :  { %v8570_v32 = vpop.eup %8569 }
 0xe17   :  { %v6242_v24 = vmul.f32 %v8570_v32, %v6232_v13  ;;  %v3929_v32 = vadd.f32 %v11121_v39, %v10262_v48  ;;  %v11127_v39 = vld [vmem:[#allocation55_spill] sm:$0xff] }
 0xe1a   :  { %v8572_v15 = vpop.eup %8571 }
 0xe1b   :  { %v6243_v20 = vmul.f32 %v8572_v15, %v6233_v35 }
 0xe1d   :  { %v7842_v43 = vpack.c.bf16 %v6243_v20, %v6242_v24  ;;  %v11122_v20 = vld [vmem:[#allocation50_spill] sm:$0xff] }
 0xe1f   :  { %7873 = vst [vmem:[%s10917_s7 + $0x28] sm:$0xff] %v7842_v43   ;;  %7843 = vst [vmem:[#allocation4] sm:$0xff] %v7842_v43   ;;  %v4040_v43 = vadd.f32 %v11122_v20, %v10266_v49 }
 0xe26   :  { %v8243_v19 = vld [vmem:[#allocation4] sm:$0xff]  }
 0xe27   :  { %6502 = vmatmul.mubr.bf16.vlgmr.msra.gmra.mxu0 %v8243_v19  ;;  %6545 = vmatmul.mubr.bf16.vlgmr.msra.gmra.mxu1 %v8243_v19 }
 0xe28   :  { %6858 = vmatprep.mubr.bf16.mxu0 %v10976_v34  ;;  %6901 = vmatprep.mubr.bf16.mxu1 %v10976_v34  ;;  %v8252_v34 = vld [vmem:[%s10915_s5 + $0xc4] ss:$16 sps:$4 sm:$0xff]  }
 0xe29   :  { %6827 = vmatpush1.bf16.msra.mxu0 %v8244_v8  ;;  %6870 = vmatpush1.bf16.msra.mxu1 %v8247_v18  ;;  %v11123_v18 = vld [vmem:[#allocation48_spill] sm:$0xff] }
 0xe2a   :  { %6828 = vmatprep.subr.bf16.mxu0 %v8252_v34  ;;  %6871 = vmatprep.subr.bf16.mxu1 %v8255_v9  ;;  %v4038_v34 = vadd.f32 %v11123_v18, %v10286_v29 }
 0xe2d   :  { %6829 = vmatpush1.bf16.msra.mxu0 %v8250_v10  ;;  %6872 = vmatpush1.bf16.msra.mxu1 %v8253_v33  ;;  %v11124_v10 = vld [vmem:[#allocation53_spill] sm:$0xff] }
 0xe2e   :  { %6830 = vmatprep.subr.bf16.mxu0 %v8258_v14  ;;  %6873 = vmatprep.subr.bf16.mxu1 %v8261_v1  ;;  %v4042_v33 = vadd.f32 %v11124_v10, %v10286_v29 }
 0xe31   :  { %6831 = vmatpush1.bf16.msra.mxu0 %v8256_v16  ;;  %6874 = vmatpush1.bf16.msra.mxu1 %v8259_v21 }
 0xe32   :  { %6832 = vmatprep.subr.bf16.mxu0 %v8264_v37  ;;  %6875 = vmatprep.subr.bf16.mxu1 %v8267_v53 }
 0xe35   :  { %6833 = vmatpush1.bf16.msra.mxu0 %v8262_v56  ;;  %6876 = vmatpush1.bf16.msra.mxu1 %v8265_v22 }
 0xe36   :  { %6834 = vmatprep.subr.bf16.mxu0 %v8270_v40  ;;  %6877 = vmatprep.subr.bf16.mxu1 %v8273_v17 }
 0xe39   :  { %6835 = vmatpush1.bf16.msra.mxu0 %v8268_v11  ;;  %6878 = vmatpush1.bf16.msra.mxu1 %v8271_v23 }
 0xe3a   :  { %6836 = vmatprep.subr.bf16.mxu0 %v8276_v2  ;;  %6879 = vmatprep.subr.bf16.mxu1 %v8279_v30 }
 0xe3d   :  { %6837 = vmatpush1.bf16.msra.mxu0 %v8274_v26  ;;  %6880 = vmatpush1.bf16.msra.mxu1 %v8277_v0 }
 0xe3e   :  { %6838 = vmatprep.subr.bf16.mxu0 %v8282_v41  ;;  %6881 = vmatprep.subr.bf16.mxu1 %v8285_v27 }
 0xe41   :  { %6839 = vmatpush1.bf16.msra.mxu0 %v8280_v42  ;;  %6882 = vmatpush1.bf16.msra.mxu1 %v8283_v45 }
 0xe42   :  { %6840 = vmatprep.subr.bf16.mxu0 %v8288_v50  ;;  %6883 = vmatprep.subr.bf16.mxu1 %v8291_v46 }
 0xe45   :  { %6841 = vmatpush1.bf16.msra.mxu0 %v8286_v51  ;;  %6884 = vmatpush1.bf16.msra.mxu1 %v8289_v60 }
 0xee7   :  { %v6503_v61 = vpop.f32.mrf.mxu0  ;;  %v6546_v54 = vpop.f32.mrf.mxu1 }
 0xee8   :  { %v6555_v62 = vadd.f32 %v6503_v61, %v3923_v28  ;;  %v6557_v36 = vadd.f32 %v6546_v54, %v4036_v58 }
 0xee9   :  { %v6505_v47 = vpop.f32.mrf.mxu0  ;;  %v6548_v38 = vpop.f32.mrf.mxu1 }
 0xeea   :  { %v6565_v44 = vmul.f32 0.5, %v6555_v62  ;;  %v6556_v4 = vadd.f32 %v6505_v47, %v3925_v55  ;;  %v6558_v14 = vadd.f32 %v6548_v38, %v4038_v34  ;;  %v11125_v38 = vld [vmem:[#allocation52_spill] sm:$0xff] }
 0xeeb   :  { %v6507_v5 = vpop.f32.mrf.mxu0  ;;  %v6550_v15 = vpop.f32.mrf.mxu1  ;;  %v3933_v63 = vadd.f32 %v11125_v38, %v10254_v59 }
 0xeec   :  { %8573 = vtanh.f32 %v6565_v44  ;;  %v6573_v13 = vmul.f32 0.5, %v6556_v4  ;;  %v6559_v35 = vadd.f32 %v6507_v5, %v3927_v25  ;;  %v6561_v7 = vadd.f32 %v6550_v15, %v4040_v43  ;;  %v11126_v4 = vld [vmem:[#allocation57_spill] sm:$0xff]  ;;  %v11128_v15 = vld [vmem:[#allocation54_spill] sm:$0xff] }
 0xeed   :  { %v6509_v24 = vpop.f32.mrf.mxu0  ;;  %v6552_v9 = vpop.f32.mrf.mxu1  ;;  %v6583_v53 = vmul.f32 0.5, %v6558_v14 }
 0xeee   :  { %8575 = vtanh.f32 %v6573_v13  ;;  %v6566_v19 = vmul.f32 0.5, %v6559_v35  ;;  %v6560_v31 = vadd.f32 %v6509_v24, %v3929_v32  ;;  %v6562_v1 = vadd.f32 %v6552_v9, %v4042_v33  ;;  %v11130_v33 = vld [vmem:[#allocation58_spill] sm:$0xff] }
 0xeef   :  { %8577 = vtanh.f32 %v6557_v36  ;;  %v3935_v36 = vadd.f32 %v11126_v4, %v10262_v48  ;;  %v4046_v32 = vadd.f32 %v11127_v39, %v10266_v49  ;;  %v3937_v24 = vadd.f32 %v11128_v15, %v10254_v59 }
 0xef0   :  { %8579 = vtanh.f32 %v6566_v19  ;;  %v6574_v8 = vmul.f32 0.5, %v6560_v31  ;;  %v6584_v17 = vmul.f32 0.5, %v6562_v1  ;;  %v4050_v14 = vadd.f32 %v11130_v33, %v10266_v49 }
 0xef2   :  { %8581 = vtanh.f32 %v6574_v8 }
 0xef3   :  { %8583 = vtanh.f32 %v6561_v7  ;;  %v11129_v7 = vld [vmem:[#allocation9_spill] sm:$0xff] }
 0xef4   :  { %8585 = vtanh.f32 %v6583_v53  ;;  %v3939_v8 = vadd.f32 %v11129_v7, %v10262_v48 }
 0xef5   :  { %8587 = vtanh.f32 %v6584_v17 }
 0xef9   :  { %v8574_v16 = vpop.eup %8573 }
 0xefa   :  { %v6569_v21 = vadd.f32 1.0, %v8574_v16 }
 0xefb   :  { %v8576_v37 = vpop.eup %8575 }
 0xefc   :  { %v8578_v56 = vpop.eup %8577  ;;  %v6571_v22 = vmul.f32 0.5, %v6569_v21  ;;  %v6577_v40 = vadd.f32 1.0, %v8576_v37  ;;  %v11131_v37 = vld [vmem:[#allocation56_spill] sm:$0xff] }
 0xefd   :  { %v8580_v11 = vpop.eup %8579  ;;  %v4048_v53 = vadd.f32 %v11131_v37, %v10286_v29 }
 0xefe   :  { %v6579_v23 = vmul.f32 0.5, %v6577_v40  ;;  %v6593_v2 = vmul.f32 %v8578_v56, %v6571_v22  ;;  %v6570_v30 = vadd.f32 1.0, %v8580_v11  ;;  %v11132_v22 = vld [vmem:[#allocation59_spill] sm:$0xff] }
 0xeff   :  { %v8582_v26 = vpop.eup %8581  ;;  %v4052_v40 = vadd.f32 %v11132_v22, %v10286_v29 }
 0xf00   :  { %v6591_v0 = vmul.f32 %v6579_v23, %v10754_v6  ;;  %v6572_v41 = vmul.f32 0.5, %v6570_v30  ;;  %v6578_v42 = vadd.f32 1.0, %v8582_v26  ;;  %v8584_v45 = vpop.eup %8583 }
 0xf01   :  { %v8586_v12 = vpop.eup %8585 }
 0xf02   :  { %v10879_v27 = vadd.f32 %v6593_v2, %v6591_v0  ;;  %v6580_v50 = vmul.f32 0.5, %v6578_v42  ;;  %v6594_v46 = vmul.f32 %v8584_v45, %v6572_v41  ;;  %v8588_v28 = vpop.eup %8587  ;;  %v6587_v61 = vadd.f32 1.0, %v8586_v12 }
 0xf03   :  { %v6588_v6 = vadd.f32 1.0, %v8588_v28 }
 0xf04   :  { %v6592_v51 = vmul.f32 %v6580_v50, %v10758_v3  ;;  %8589 = vtanh.f32 %v10879_v27  ;;  %v6589_v52 = vmul.f32 0.5, %v6587_v61 }
 0xf05   :  { %v6590_v55 = vmul.f32 0.5, %v6588_v6 }
 0xf06   :  { %v10883_v60 = vadd.f32 %v6594_v46, %v6592_v51 }
 0xf08   :  { %8591 = vtanh.f32 %v10883_v60 }
 0xf11   :  { %v8590_v54 = vpop.eup %8589 }
 0xf12   :  { %v6599_v57 = vmul.f32 %v8590_v54, %v6589_v52 }
 0xf15   :  { %v8592_v62 = vpop.eup %8591 }
 0xf16   :  { %v6600_v58 = vmul.f32 %v8592_v62, %v6590_v55 }
 0xf18   :  { %v7852_v47 = vpack.c.bf16 %v6600_v58, %v6599_v57 }
 0xf1a   :  { %7874 = vst [vmem:[%s10917_s7 + $0x30] sm:$0xff] %v7852_v47   ;;  %7853 = vst [vmem:[#allocation4] sm:$0xff] %v7852_v47  }
 0xf21   :  { %v8292_v3 = vld [vmem:[#allocation4] sm:$0xff]  }
 0xf22   :  { %6859 = vmatmul.mubr.bf16.vlgmr.msra.gmra.mxu0 %v8292_v3  ;;  %6902 = vmatmul.mubr.bf16.vlgmr.msra.gmra.mxu1 %v8292_v3 }
 0xfe2   :  { %v6860_v25 = vpop.f32.mrf.mxu0  ;;  %v6903_v44 = vpop.f32.mrf.mxu1 }
 0xfe3   :  { %v6912_v5 = vadd.f32 %v6860_v25, %v3933_v63  ;;  %v6914_v19 = vadd.f32 %v6903_v44, %v4046_v32 }
 0xfe4   :  { %v6862_v13 = vpop.f32.mrf.mxu0  ;;  %v6905_v35 = vpop.f32.mrf.mxu1 }
 0xfe5   :  { %v6922_v20 = vmul.f32 0.5, %v6912_v5  ;;  %v6913_v43 = vadd.f32 %v6862_v13, %v3935_v36  ;;  %v6915_v48 = vadd.f32 %v6905_v35, %v4048_v53 }
 0xfe6   :  { %v6864_v31 = vpop.f32.mrf.mxu0  ;;  %v6907_v9 = vpop.f32.mrf.mxu1 }
 0xfe7   :  { %8593 = vtanh.f32 %v6922_v20  ;;  %v6930_v18 = vmul.f32 0.5, %v6913_v43  ;;  %v6916_v34 = vadd.f32 %v6864_v31, %v3937_v24  ;;  %v6918_v59 = vadd.f32 %v6907_v9, %v4050_v14 }
 0xfe8   :  { %v6866_v10 = vpop.f32.mrf.mxu0  ;;  %v6909_v56 = vpop.f32.mrf.mxu1  ;;  %v6940_v17 = vmul.f32 0.5, %v6915_v48 }
 0xfe9   :  { %8595 = vtanh.f32 %v6930_v18  ;;  %v6923_v1 = vmul.f32 0.5, %v6916_v34  ;;  %v6917_v16 = vadd.f32 %v6866_v10, %v3939_v8  ;;  %v6919_v11 = vadd.f32 %v6909_v56, %v4052_v40 }
 0xfea   :  { %8597 = vtanh.f32 %v6914_v19 }
 0xfeb   :  { %8599 = vtanh.f32 %v6923_v1  ;;  %v6931_v21 = vmul.f32 0.5, %v6917_v16  ;;  %v6941_v41 = vmul.f32 0.5, %v6919_v11 }
 0xfed   :  { %8601 = vtanh.f32 %v6931_v21 }
 0xfee   :  { %8603 = vtanh.f32 %v6918_v59 }
 0xfef   :  { %8605 = vtanh.f32 %v6940_v17 }
 0xff0   :  { %8607 = vtanh.f32 %v6941_v41 }
 0xff4   :  { %v8594_v49 = vpop.eup %8593 }
 0xff5   :  { %v6926_v23 = vadd.f32 1.0, %v8594_v49 }
 0xff6   :  { %v8596_v2 = vpop.eup %8595 }
 0xff7   :  { %v8598_v30 = vpop.eup %8597  ;;  %v6928_v26 = vmul.f32 0.5, %v6926_v23  ;;  %v6934_v0 = vadd.f32 1.0, %v8596_v2 }
 0xff8   :  { %v8600_v42 = vpop.eup %8599 }
 0xff9   :  { %v6936_v45 = vmul.f32 0.5, %v6934_v0  ;;  %v6950_v50 = vmul.f32 %v8598_v30, %v6928_v26  ;;  %v6927_v46 = vadd.f32 1.0, %v8600_v42 }
 0xffa   :  { %v8602_v51 = vpop.eup %8601 }
 0xffb   :  { %v6948_v12 = vmul.f32 %v6936_v45, %v10879_v27  ;;  %v6929_v28 = vmul.f32 0.5, %v6927_v46  ;;  %v6935_v61 = vadd.f32 1.0, %v8602_v51  ;;  %v8604_v29 = vpop.eup %8603 }
 0xffc   :  { %v8606_v57 = vpop.eup %8605 }
 0xffd   :  { %v6952_v6 = vadd.f32 %v6950_v50, %v6948_v12  ;;  %v6937_v54 = vmul.f32 0.5, %v6935_v61  ;;  %v6951_v52 = vmul.f32 %v8604_v29, %v6929_v28  ;;  %v6944_v58 = vadd.f32 1.0, %v8606_v57  ;;  %v8608_v47 = vpop.eup %8607 }
 0xffe   :  { %v6945_v38 = vadd.f32 1.0, %v8608_v47 }
 0xfff   :  { %8609 = vtanh.f32 %v6952_v6  ;;  %v6949_v55 = vmul.f32 %v6937_v54, %v10883_v60  ;;  %v6946_v3 = vmul.f32 0.5, %v6944_v58 }
0x1000   :  { %v6947_v27 = vmul.f32 0.5, %v6945_v38 }
0x1001   :  { %v6953_v62 = vadd.f32 %v6951_v52, %v6949_v55 }
0x1003   :  { %8611 = vtanh.f32 %v6953_v62 }
0x100c   :  { %v8610_v63 = vpop.eup %8609 }
0x100d   :  { %v6956_v25 = vmul.f32 %v8610_v63, %v6946_v3 }
0x1010   :  { %v8612_v44 = vpop.eup %8611 }
0x1011   :  { %v6957_v4 = vmul.f32 %v8612_v44, %v6947_v27 }
0x1013   :  { %v7862_v36 = vpack.c.bf16 %v6957_v4, %v6956_v25 }
0x1015   :  { %7863 = vst [vmem:[#allocation4] sm:$0xff] %v7862_v36   ;;  %7875 = vst [vmem:[%s10917_s7 + $0x38] sm:$0xff] %v7862_v36  }

</bundles_post_ra>
